<compile_context>
chip_gen: v7x
topology: tpu7x:2x2x1
jax: 0.10.0
libtpu: 0.0.40
codegen_flags: <defaults>
</compile_context>

<pallas_src>
import jax
import jax.numpy as jnp
from jax import lax
from jax.experimental import pallas as pl
from jax.experimental.pallas import tpu as pltpu


# ------------------------------ Pallas kernel -------------------------------

def _make_fused_block_kernel(H, W, C):
    """Whole ResnetBlock for one batch element per grid step."""
    HW = H * W

    def _reflect_pad1(x):
        # ReflectionPad2d(1). For pad width 1 the reflected border is just the
        # immediate inner neighbour (row/col index 1 and -2), so no flips needed.
        xr = jnp.concatenate([x[1:2], x, x[H - 2:H - 1]], axis=0)             # (H+2, W, C)
        return jnp.concatenate([xr[:, 1:2], xr, xr[:, W - 2:W - 1]], axis=1)  # (H+2, W+2, C)

    def _conv3x3_in(x_f32, w_ref, relu):
        # conv3x3 over a reflect-padded VMEM slab + InstanceNorm (+ReLU), f32 in/out.
        xp = _reflect_pad1(x_f32)                                   # (H+2, W+2, C)
        # In-VMEM im2col -> one MXU dot with K = 9*C (no HBM im2col).
        cols = jnp.concatenate(
            [xp[kh:kh + H, kw:kw + W, :] for kh in range(3) for kw in range(3)],
            axis=-1).reshape(HW, 9 * C)
        y = jnp.dot(cols.astype(jnp.bfloat16), w_ref[...],
                    preferred_element_type=jnp.float32)             # (HW, C) f32 acc
        # NOTE: conv bias is intentionally omitted - IN(affine=False) cancels it.
        # InstanceNorm2d: per-(sample, channel) biased stats over H*W, eps=1e-5.
        mean = jnp.mean(y, axis=0, keepdims=True)
        var = jnp.mean(jnp.square(y - mean), axis=0, keepdims=True)
        y = (y - mean) * lax.rsqrt(var + 1e-5)
        if relu:
            y = jnp.maximum(y, 0.0)
        return y.reshape(H, W, C)

    def kernel(x_ref, w1_ref, w2_ref, o_ref):
        x = x_ref[0].astype(jnp.float32)                  # (H, W, C), stays in VMEM
        h = _conv3x3_in(x, w1_ref, relu=True)             # stage 1 (never hits HBM)
        h = _conv3x3_in(h, w2_ref, relu=False)            # stage 2
        o_ref[...] = (x + h).reshape(1, H, W, C).astype(o_ref.dtype)   # fused residual

    return kernel


# --------------------------------- wrapper ----------------------------------

@jax.jit
def resnet_block_forward(x_nchw, params):
    """out = x + conv_block(x); conv_block = [RefPad, Conv3x3, IN, ReLU, RefPad,
    Conv3x3, IN].  Conv biases (params['b1'/'b2']) are mathematically cancelled by the
    affine-less InstanceNorm, so they are not passed to the kernel."""
    # TODO(synk): keep NHWC end-to-end in production; these transposes are overhead.
    x_nhwc = jnp.transpose(x_nchw, (0, 2, 3, 1)).astype(jnp.float32)
    N, H, W, C = x_nhwc.shape

    def pack_w(w_oihw):
        # OIHW -> (9*Cin, Cout), tap-major rows matching the im2col column order,
        # prepacked to bf16 so the MXU runs at its native bf16 rate.
        return jnp.transpose(w_oihw, (2, 3, 1, 0)).reshape(9 * C, C).astype(jnp.bfloat16)

    w1 = pack_w(params["w1"])
    w2 = pack_w(params["w2"])

    kernel = _make_fused_block_kernel(H, W, C)

    out_nhwc = pl.pallas_call(
        kernel,
        out_shape=jax.ShapeDtypeStruct((N, H, W, C), x_nhwc.dtype),
        grid=(N,),
        in_specs=[
            pl.BlockSpec((1, H, W, C), lambda n: (n, 0, 0, 0)),
            pl.BlockSpec((9 * C, C), lambda n: (0, 0)),   # weights stay resident
            pl.BlockSpec((9 * C, C), lambda n: (0, 0)),
        ],
        out_specs=pl.BlockSpec((1, H, W, C), lambda n: (n, 0, 0, 0)),
        compiler_params=pltpu.CompilerParams(dimension_semantics=("parallel",)),
    )(x_nhwc, w1, w2)

    return jnp.transpose(out_nhwc, (0, 3, 1, 2))


# ------------------------- pure-JAX f32 reference ---------------------------

@jax.jit
def reference_forward(x_nchw, params):
    def conv3x3(x, w, b):
        xp = jnp.pad(x, ((0, 0), (0, 0), (1, 1), (1, 1)), mode="reflect")
        y = lax.conv_general_dilated(xp, w, (1, 1), "VALID",
                                     dimension_numbers=("NCHW", "OIHW", "NCHW"))
        return y + b.reshape(1, -1, 1, 1)

    def instance_norm(x):
        mean = jnp.mean(x, axis=(2, 3), keepdims=True)
        var = jnp.mean(jnp.square(x - mean), axis=(2, 3), keepdims=True)
        return (x - mean) * lax.rsqrt(var + 1e-5)

    h = jnp.maximum(instance_norm(conv3x3(x_nchw, params["w1"], params["b1"])), 0.0)
    h = instance_norm(conv3x3(h, params["w2"], params["b2"]))
    return x_nchw + h


if __name__ == "__main__":
    N, dim, H, W = 2, 128, 16, 16   # dim=128 keeps the channel (lane) axis dense

    key = jax.random.PRNGKey(0)
    k1, k2, k3, k4, k5 = jax.random.split(key, 5)
    x = jax.random.normal(k1, (N, dim, H, W), jnp.float32)

    params = {
        "w1": 0.05 * jax.random.normal(k2, (dim, dim, 3, 3), jnp.float32),
        "b1": 0.10 * jax.random.normal(k3, (dim,), jnp.float32),
        "w2": 0.05 * jax.random.normal(k4, (dim, dim, 3, 3), jnp.float32),
        "b2": 0.10 * jax.random.normal(k5, (dim,), jnp.float32),
    }

    out = jax.block_until_ready(resnet_block_forward(x, params))
    ref = jax.block_until_ready(reference_forward(x, params))

    assert out.shape == (N, dim, H, W), out.shape
    # bf16 MXU operands vs. an f32 reference: tolerance covers bf16 rounding
    # amplified by the InstanceNorm rsqrt (measured max err is ~1e-2 here).
    max_err = float(jnp.max(jnp.abs(out - ref)))
    assert jnp.allclose(out, ref, rtol=5e-2, atol=5e-2), max_err
    print("KERNEL_OK")
</pallas_src>

<mosaic_0001>
module attributes {stable_mosaic.version = 11 : i64} {
  func.func @kernel(%arg0: i32, %arg1: memref<1x16x16x128xf32, #tpu.memory_space<vmem>>, %arg2: memref<1152x128xbf16, #tpu.memory_space<vmem>>, %arg3: memref<1152x128xbf16, #tpu.memory_space<vmem>>, %arg4: memref<1x16x16x128xf32, #tpu.memory_space<vmem>>) attributes {dimension_semantics = [#tpu.dimension_semantics<parallel>], iteration_bounds = array<i64: 2>, scalar_prefetch = 0 : i64, scratch_operands = 0 : i64, tpu.core_type = #tpu.core_type<tc>, window_params = [{transform_indices = @transform_0, window_bounds = array<i64: 1, 16, 16, 128>}, {pipeline_mode = #tpu.pipeline_mode<synchronous>, transform_indices = @transform_1, window_bounds = array<i64: 1152, 128>}, {pipeline_mode = #tpu.pipeline_mode<synchronous>, transform_indices = @transform_2, window_bounds = array<i64: 1152, 128>}, {transform_indices = @transform_3, window_bounds = array<i64: 1, 16, 16, 128>}]} {
    %c0 = arith.constant 0 : index
    %c0_0 = arith.constant 0 : index
    %c0_1 = arith.constant 0 : index
    %c0_2 = arith.constant 0 : index
    %0 = vector.load %arg1[%c0, %c0_0, %c0_1, %c0_2] : memref<1x16x16x128xf32, #tpu.memory_space<vmem>>, vector<1x16x16x128xf32>
    %1 = vector.shape_cast %0 : vector<1x16x16x128xf32> to vector<16x16x128xf32>
    %2 = vector.extract_strided_slice %1 {offsets = [1, 0, 0], sizes = [1, 16, 128], strides = [1, 1, 1]} : vector<16x16x128xf32> to vector<1x16x128xf32>
    %3 = vector.extract_strided_slice %1 {offsets = [14, 0, 0], sizes = [1, 16, 128], strides = [1, 1, 1]} : vector<16x16x128xf32> to vector<1x16x128xf32>
    %4 = tpu.concatenate %2, %1, %3 in 0 : vector<1x16x128xf32>, vector<16x16x128xf32>, vector<1x16x128xf32> -> vector<18x16x128xf32>
    %5 = vector.extract_strided_slice %4 {offsets = [0, 1, 0], sizes = [18, 1, 128], strides = [1, 1, 1]} : vector<18x16x128xf32> to vector<18x1x128xf32>
    %6 = vector.extract_strided_slice %4 {offsets = [0, 14, 0], sizes = [18, 1, 128], strides = [1, 1, 1]} : vector<18x16x128xf32> to vector<18x1x128xf32>
    %7 = tpu.concatenate %5, %4, %6 in 1 : vector<18x1x128xf32>, vector<18x16x128xf32>, vector<18x1x128xf32> -> vector<18x18x128xf32>
    %8 = vector.extract_strided_slice %7 {offsets = [0, 0, 0], sizes = [16, 16, 128], strides = [1, 1, 1]} : vector<18x18x128xf32> to vector<16x16x128xf32>
    %9 = vector.extract_strided_slice %7 {offsets = [0, 1, 0], sizes = [16, 16, 128], strides = [1, 1, 1]} : vector<18x18x128xf32> to vector<16x16x128xf32>
    %10 = vector.extract_strided_slice %7 {offsets = [0, 2, 0], sizes = [16, 16, 128], strides = [1, 1, 1]} : vector<18x18x128xf32> to vector<16x16x128xf32>
    %11 = vector.extract_strided_slice %7 {offsets = [1, 0, 0], sizes = [16, 16, 128], strides = [1, 1, 1]} : vector<18x18x128xf32> to vector<16x16x128xf32>
    %12 = vector.extract_strided_slice %7 {offsets = [1, 1, 0], sizes = [16, 16, 128], strides = [1, 1, 1]} : vector<18x18x128xf32> to vector<16x16x128xf32>
    %13 = vector.extract_strided_slice %7 {offsets = [1, 2, 0], sizes = [16, 16, 128], strides = [1, 1, 1]} : vector<18x18x128xf32> to vector<16x16x128xf32>
    %14 = vector.extract_strided_slice %7 {offsets = [2, 0, 0], sizes = [16, 16, 128], strides = [1, 1, 1]} : vector<18x18x128xf32> to vector<16x16x128xf32>
    %15 = vector.extract_strided_slice %7 {offsets = [2, 1, 0], sizes = [16, 16, 128], strides = [1, 1, 1]} : vector<18x18x128xf32> to vector<16x16x128xf32>
    %16 = vector.extract_strided_slice %7 {offsets = [2, 2, 0], sizes = [16, 16, 128], strides = [1, 1, 1]} : vector<18x18x128xf32> to vector<16x16x128xf32>
    %17 = tpu.concatenate %8, %9, %10, %11, %12, %13, %14, %15, %16 in 2 : vector<16x16x128xf32>, vector<16x16x128xf32>, vector<16x16x128xf32>, vector<16x16x128xf32>, vector<16x16x128xf32>, vector<16x16x128xf32>, vector<16x16x128xf32>, vector<16x16x128xf32>, vector<16x16x128xf32> -> vector<16x16x1152xf32>
    %18 = vector.shape_cast %17 : vector<16x16x1152xf32> to vector<256x1152xf32>
    %19 = arith.truncf %18 : vector<256x1152xf32> to vector<256x1152xbf16>
    %c0_3 = arith.constant 0 : index
    %c0_4 = arith.constant 0 : index
    %20 = vector.load %arg2[%c0_3, %c0_4] : memref<1152x128xbf16, #tpu.memory_space<vmem>>, vector<1152x128xbf16>
    %cst = arith.constant dense<0.000000e+00> : vector<256x128xf32>
    %21 = tpu.matmul %19, %20, %cst {dimension_numbers = #tpu.dot_dimension_numbers<[1], [0], [0], [1], [0, 0, 1, 1], [], []>} : vector<256x1152xbf16>, vector<1152x128xbf16>, vector<256x128xf32> -> vector<256x128xf32>
    %cst_5 = arith.constant dense<0.000000e+00> : vector<128xf32>
    %22 = vector.multi_reduction <add>, %21, %cst_5 [0] : vector<256x128xf32> to vector<128xf32>
    %23 = vector.shape_cast %22 : vector<128xf32> to vector<1x128xf32>
    %cst_6 = arith.constant 2.560000e+02 : f32
    %24 = vector.broadcast %cst_6 : f32 to vector<1x128xf32>
    %25 = arith.divf %23, %24 : vector<1x128xf32>
    %26 = vector.broadcast %25 : vector<1x128xf32> to vector<256x128xf32>
    %27 = arith.subf %21, %26 : vector<256x128xf32>
    %28 = arith.mulf %27, %27 : vector<256x128xf32>
    %cst_7 = arith.constant dense<0.000000e+00> : vector<128xf32>
    %29 = vector.multi_reduction <add>, %28, %cst_7 [0] : vector<256x128xf32> to vector<128xf32>
    %30 = vector.shape_cast %29 : vector<128xf32> to vector<1x128xf32>
    %cst_8 = arith.constant 2.560000e+02 : f32
    %31 = vector.broadcast %cst_8 : f32 to vector<1x128xf32>
    %32 = arith.divf %30, %31 : vector<1x128xf32>
    %33 = vector.broadcast %25 : vector<1x128xf32> to vector<256x128xf32>
    %34 = arith.subf %21, %33 : vector<256x128xf32>
    %cst_9 = arith.constant 9.99999974E-6 : f32
    %35 = vector.broadcast %cst_9 : f32 to vector<1x128xf32>
    %36 = arith.addf %32, %35 : vector<1x128xf32>
    %37 = math.rsqrt %36 : vector<1x128xf32>
    %38 = vector.broadcast %37 : vector<1x128xf32> to vector<256x128xf32>
    %39 = arith.mulf %34, %38 : vector<256x128xf32>
    %cst_10 = arith.constant 0.000000e+00 : f32
    %40 = vector.broadcast %cst_10 : f32 to vector<256x128xf32>
    %41 = arith.maximumf %39, %40 : vector<256x128xf32>
    %42 = vector.shape_cast %41 : vector<256x128xf32> to vector<16x16x128xf32>
    %43 = vector.extract_strided_slice %42 {offsets = [1, 0, 0], sizes = [1, 16, 128], strides = [1, 1, 1]} : vector<16x16x128xf32> to vector<1x16x128xf32>
    %44 = vector.extract_strided_slice %42 {offsets = [14, 0, 0], sizes = [1, 16, 128], strides = [1, 1, 1]} : vector<16x16x128xf32> to vector<1x16x128xf32>
    %45 = tpu.concatenate %43, %42, %44 in 0 : vector<1x16x128xf32>, vector<16x16x128xf32>, vector<1x16x128xf32> -> vector<18x16x128xf32>
    %46 = vector.extract_strided_slice %45 {offsets = [0, 1, 0], sizes = [18, 1, 128], strides = [1, 1, 1]} : vector<18x16x128xf32> to vector<18x1x128xf32>
    %47 = vector.extract_strided_slice %45 {offsets = [0, 14, 0], sizes = [18, 1, 128], strides = [1, 1, 1]} : vector<18x16x128xf32> to vector<18x1x128xf32>
    %48 = tpu.concatenate %46, %45, %47 in 1 : vector<18x1x128xf32>, vector<18x16x128xf32>, vector<18x1x128xf32> -> vector<18x18x128xf32>
    %49 = vector.extract_strided_slice %48 {offsets = [0, 0, 0], sizes = [16, 16, 128], strides = [1, 1, 1]} : vector<18x18x128xf32> to vector<16x16x128xf32>
    %50 = vector.extract_strided_slice %48 {offsets = [0, 1, 0], sizes = [16, 16, 128], strides = [1, 1, 1]} : vector<18x18x128xf32> to vector<16x16x128xf32>
    %51 = vector.extract_strided_slice %48 {offsets = [0, 2, 0], sizes = [16, 16, 128], strides = [1, 1, 1]} : vector<18x18x128xf32> to vector<16x16x128xf32>
    %52 = vector.extract_strided_slice %48 {offsets = [1, 0, 0], sizes = [16, 16, 128], strides = [1, 1, 1]} : vector<18x18x128xf32> to vector<16x16x128xf32>
    %53 = vector.extract_strided_slice %48 {offsets = [1, 1, 0], sizes = [16, 16, 128], strides = [1, 1, 1]} : vector<18x18x128xf32> to vector<16x16x128xf32>
    %54 = vector.extract_strided_slice %48 {offsets = [1, 2, 0], sizes = [16, 16, 128], strides = [1, 1, 1]} : vector<18x18x128xf32> to vector<16x16x128xf32>
    %55 = vector.extract_strided_slice %48 {offsets = [2, 0, 0], sizes = [16, 16, 128], strides = [1, 1, 1]} : vector<18x18x128xf32> to vector<16x16x128xf32>
    %56 = vector.extract_strided_slice %48 {offsets = [2, 1, 0], sizes = [16, 16, 128], strides = [1, 1, 1]} : vector<18x18x128xf32> to vector<16x16x128xf32>
    %57 = vector.extract_strided_slice %48 {offsets = [2, 2, 0], sizes = [16, 16, 128], strides = [1, 1, 1]} : vector<18x18x128xf32> to vector<16x16x128xf32>
    %58 = tpu.concatenate %49, %50, %51, %52, %53, %54, %55, %56, %57 in 2 : vector<16x16x128xf32>, vector<16x16x128xf32>, vector<16x16x128xf32>, vector<16x16x128xf32>, vector<16x16x128xf32>, vector<16x16x128xf32>, vector<16x16x128xf32>, vector<16x16x128xf32>, vector<16x16x128xf32> -> vector<16x16x1152xf32>
    %59 = vector.shape_cast %58 : vector<16x16x1152xf32> to vector<256x1152xf32>
    %60 = arith.truncf %59 : vector<256x1152xf32> to vector<256x1152xbf16>
    %c0_11 = arith.constant 0 : index
    %c0_12 = arith.constant 0 : index
    %61 = vector.load %arg3[%c0_11, %c0_12] : memref<1152x128xbf16, #tpu.memory_space<vmem>>, vector<1152x128xbf16>
    %cst_13 = arith.constant dense<0.000000e+00> : vector<256x128xf32>
    %62 = tpu.matmul %60, %61, %cst_13 {dimension_numbers = #tpu.dot_dimension_numbers<[1], [0], [0], [1], [0, 0, 1, 1], [], []>} : vector<256x1152xbf16>, vector<1152x128xbf16>, vector<256x128xf32> -> vector<256x128xf32>
    %cst_14 = arith.constant dense<0.000000e+00> : vector<128xf32>
    %63 = vector.multi_reduction <add>, %62, %cst_14 [0] : vector<256x128xf32> to vector<128xf32>
    %64 = vector.shape_cast %63 : vector<128xf32> to vector<1x128xf32>
    %cst_15 = arith.constant 2.560000e+02 : f32
    %65 = vector.broadcast %cst_15 : f32 to vector<1x128xf32>
    %66 = arith.divf %64, %65 : vector<1x128xf32>
    %67 = vector.broadcast %66 : vector<1x128xf32> to vector<256x128xf32>
    %68 = arith.subf %62, %67 : vector<256x128xf32>
    %69 = arith.mulf %68, %68 : vector<256x128xf32>
    %cst_16 = arith.constant dense<0.000000e+00> : vector<128xf32>
    %70 = vector.multi_reduction <add>, %69, %cst_16 [0] : vector<256x128xf32> to vector<128xf32>
    %71 = vector.shape_cast %70 : vector<128xf32> to vector<1x128xf32>
    %cst_17 = arith.constant 2.560000e+02 : f32
    %72 = vector.broadcast %cst_17 : f32 to vector<1x128xf32>
    %73 = arith.divf %71, %72 : vector<1x128xf32>
    %74 = vector.broadcast %66 : vector<1x128xf32> to vector<256x128xf32>
    %75 = arith.subf %62, %74 : vector<256x128xf32>
    %cst_18 = arith.constant 9.99999974E-6 : f32
    %76 = vector.broadcast %cst_18 : f32 to vector<1x128xf32>
    %77 = arith.addf %73, %76 : vector<1x128xf32>
    %78 = math.rsqrt %77 : vector<1x128xf32>
    %79 = vector.broadcast %78 : vector<1x128xf32> to vector<256x128xf32>
    %80 = arith.mulf %75, %79 : vector<256x128xf32>
    %81 = vector.shape_cast %80 : vector<256x128xf32> to vector<16x16x128xf32>
    %82 = arith.addf %1, %81 : vector<16x16x128xf32>
    %83 = vector.shape_cast %82 : vector<16x16x128xf32> to vector<1x16x16x128xf32>
    %c0_19 = arith.constant 0 : index
    %c0_20 = arith.constant 0 : index
    %c0_21 = arith.constant 0 : index
    %c0_22 = arith.constant 0 : index
    %84 = vector.load %arg4[%c0_19, %c0_20, %c0_21, %c0_22] : memref<1x16x16x128xf32, #tpu.memory_space<vmem>>, vector<1x16x16x128xf32>
    tpu.vector_store %arg4[%c0_19, %c0_20, %c0_21, %c0_22], %83 {strides = array<i32>} : memref<1x16x16x128xf32, #tpu.memory_space<vmem>>, vector<1x16x16x128xf32>,
    return
  }
  func.func @transform_0(%arg0: i32) -> (i32, i32, i32, i32) {
    %c0_i32 = arith.constant 0 : i32
    %c0_i32_0 = arith.constant 0 : i32
    %c0_i32_1 = arith.constant 0 : i32
    %c0_i32_2 = arith.constant 0 : i32
    return %arg0, %c0_i32, %c0_i32_0, %c0_i32_1 : i32, i32, i32, i32
  }
  func.func @transform_1(%arg0: i32) -> (i32, i32) {
    %c0_i32 = arith.constant 0 : i32
    %c0_i32_0 = arith.constant 0 : i32
    %c0_i32_1 = arith.constant 0 : i32
    return %c0_i32, %c0_i32_0 : i32, i32
  }
  func.func @transform_2(%arg0: i32) -> (i32, i32) {
    %c0_i32 = arith.constant 0 : i32
    %c0_i32_0 = arith.constant 0 : i32
    %c0_i32_1 = arith.constant 0 : i32
    return %c0_i32, %c0_i32_0 : i32, i32
  }
  func.func @transform_3(%arg0: i32) -> (i32, i32, i32, i32) {
    %c0_i32 = arith.constant 0 : i32
    %c0_i32_0 = arith.constant 0 : i32
    %c0_i32_1 = arith.constant 0 : i32
    %c0_i32_2 = arith.constant 0 : i32
    return %arg0, %c0_i32, %c0_i32_0, %c0_i32_1 : i32, i32, i32, i32
  }
}

</mosaic_0001>

<bundles_post_ra>
// kernel: resnet_block_forward.1
= control target key start
LH: loop header
LB: loop body
LE: loop exit
PB: predicated region body
PF: predicated region fallthrough
CT: control target
= control target key end

     0   :  { %8 = vsyncpa [#allocation3], 0  ;;  %s8762_s0 = inlined_call_operand.vmem [shape: f32[2,16,16,128], index: 0, kind: input, shape index: {}]   ;;  %s8763_s1 = inlined_call_operand.vmem [shape: bf16[1152,128], index: 1, kind: input, shape index: {}]   ;;  %s8764_s2 = inlined_call_operand.vmem [shape: bf16[1152,128], index: 2, kind: input, shape index: {}]   ;;  %s8765_s3 = inlined_call_operand.hbm [shape: f32[2,16,16,128], index: 3, kind: output, shape index: {}]  }
   0x1   :  { %10 = vsyncpa [#allocation3 + $0x1], 0  ;;  %s6050_s12 = smov 0   ;;  %s6052_s13 = smov 0  }
   0x2   :  { %s6054_s14 = smov 0   ;;  %s6056_s15 = smov 0  }
   0x3 LB: > { %s6071_s16 = sadd.s32 4294967295, %s6025_s15   ;;  %s4544_s17 = sadd.s32 4294967294, %s6025_s15   ;;  %s6025_s15 = sphi %s6056_s15, %s8834_s15   ;;  %s6021_s14 = sphi %s6054_s14, %s8833_s14   ;;  %s6017_s13 = sphi %s6052_s13, %s8832_s13   ;;  %s6013_s12 = sphi %s6050_s12, %s8831_s12  }
   0x4   : > { %s6075_s18 = sadd.s32 1, %s6025_s15   ;;  %s91_s19 = sadd.s32 1, %s6021_s14 }
   0x5   : > { %s88_s20 = ssub.s32 %s6025_s15, %s6075_s18  ;;  %p101_p0 = scmp.ne.s32.totalorder %s6021_s14, %s6017_s13 }
   0x6   : > { %p89_p1 = scmp.eq.s32.totalorder %s88_s20, 0  ;;  %p102_p2 = scmp.eq.s32.totalorder %s6071_s16, 1 }
   0x7   : > { %p107_p3 = scmp.ne.s32.totalorder %s6017_s13, %s6013_s12  ;;  %p108_p4 = scmp.eq.s32.totalorder %s4544_s17, 1 }
   0x8   : > { %s6086_s21 = scalar_select %p89_p1, %s6021_s14, %s91_s19  }
   0x9   : > { %p6088_p5 = por %p102_p2, %p101_p0  ;;  %p6092_p6 = por %p108_p4, %p107_p3 }
   0xa   : > { %p4547_p7 = scmp.ge.s32.totalorder %s6025_s15, 1  ;;  %p140_p8 = scmp.lt.s32.totalorder %s6025_s15, 3 }
   0xc   : > { %p141_p9 = pnand %p4547_p7, %p140_p8 }
   0xe   : > { %144 = sbr.rel (%p141_p9) target bundleno = 1406 (0x57e), region = 32 }
  0x15   : > { %v5783_v0 = vld [vmem:[%s8763_s1 + $0x40] sm:$0xff]   ;;  %v5787_v4 = vld [vmem:[%s8763_s1 + $0x48] sm:$0xff]   ;;  %v5791_v8 = vld [vmem:[%s8763_s1 + $0x50] sm:$0xff]   ;;  %p164_p10 = scmp.lt.s32.totalorder %s6071_s16, 1  ;;  %vm266_vm0 = vcmask 1040384   ;;  %vm457_vm1 = vcmask 1046528  }
  0x16   : > { %v5784_v1 = vld [vmem:[%s8763_s1 + $0xc0] sm:$0xff]   ;;  %4702 = vmatprep.subr.bf16.mxu0 %v5783_v0  ;;  %v5788_v5 = vld [vmem:[%s8763_s1 + $0xc8] sm:$0xff]   ;;  %v5792_v9 = vld [vmem:[%s8763_s1 + $0xd0] sm:$0xff]   ;;  %vm563_vm2 = vcmask 1045504   ;;  %s161_s24 = sand.u32 1, %s6017_s13   ;;  %s4701_s27 = sshll.u32 %s6071_s16, 12 }
  0x17   : > { %v5785_v2 = vld [vmem:[%s8763_s1] sm:$0xff]   ;;  %4814 = vmatprep.subr.bf16.mxu1 %v5784_v1  ;;  %v5789_v6 = vld [vmem:[%s8763_s1 + $0x8] sm:$0xff]   ;;  %v5793_v10 = vld [vmem:[%s8763_s1 + $0x10] sm:$0xff]   ;;  %s165_s7 = scalar_select %p164_p10, %s6071_s16, 1 }
  0x18   : > { %v5786_v3 = vld [vmem:[%s8763_s1 + $0x80] sm:$0xff]   ;;  %4703 = vmatpush3.bf16.msra.mxu0 %v5785_v2  ;;  %v5790_v7 = vld [vmem:[%s8763_s1 + $0x88] sm:$0xff]   ;;  %v5794_v11 = vld [vmem:[%s8763_s1 + $0x90] sm:$0xff]   ;;  %s8693_s4 = scalar_lea.hbm %s8765_s3, %s4701_s27  ;;  %s8721_s16 = scalar_lea.sflag [#allocation3], %s161_s24 }
  0x19   : > { %4815 = vmatpush3.bf16.msra.mxu1 %v5786_v3  ;;  %4704 = vmatprep.subr.bf16.mxu0 %v5787_v4  ;;  %v5795_v12 = vld [vmem:[%s8763_s1 + $0x58] sm:$0xff]   ;;  %v5799_v16 = vld [vmem:[%s8763_s1 + $0x60] sm:$0xff]   ;;  %v5803_v20 = vld [vmem:[%s8763_s1 + $0x68] sm:$0xff]   ;;  %s4700_s25 = sshll.u32 %s165_s7, 8  ;;  %s6027_s5 = smov [#allocation2]  }
  0x1a   : > { %4816 = vmatprep.subr.bf16.mxu1 %v5788_v5  ;;  %v5796_v13 = vld [vmem:[%s8763_s1 + $0xd8] sm:$0xff]   ;;  %v5800_v17 = vld [vmem:[%s8763_s1 + $0xe0] sm:$0xff]   ;;  %v5804_v21 = vld [vmem:[%s8763_s1 + $0xe8] sm:$0xff]   ;;  %s6193_s8 = scalar_lea.vmem %s8762_s0, %s4700_s25  ;;  %s4548_s25 = sshll.u32 %s161_s24, 8 }
  0x1b   : > { %v5797_v14 = vld [vmem:[%s8763_s1 + $0x18] sm:$0xff]   ;;  %v5801_v18 = vld [vmem:[%s8763_s1 + $0x20] sm:$0xff]   ;;  %v5805_v22 = vld [vmem:[%s8763_s1 + $0x28] sm:$0xff]   ;;  %s8588_s26 = scalar_lea.vmem [#allocation2], %s4548_s25  ;;  %s5967_s6 = sshll.u32 %s6027_s5, 4  ;;  %s5968_s6 = int_to_ptr.vmem [resolvable:$false] %s5967_s6 }
  0x1c   : > { %4705 = vmatpush3.bf16.msra.mxu0 %v5789_v6  ;;  %v5798_v15 = vld [vmem:[%s8763_s1 + $0x98] sm:$0xff]   ;;  %v5802_v19 = vld [vmem:[%s8763_s1 + $0xa0] sm:$0xff]   ;;  %v5806_v23 = vld [vmem:[%s8763_s1 + $0xa8] sm:$0xff]   ;;  %s4482_s28 = sshll.u32 %s8588_s26, 4  ;;  %s5969_s7 = scalar_lea.vmem %s5968_s6, 8192  ;;  %s8697_s28 = int_to_ptr.vmem [resolvable:$true] %s4482_s28 }
  0x1d   : > { %4817 = vmatpush3.bf16.msra.mxu1 %v5790_v7  ;;  %4706 = vmatprep.subr.bf16.mxu0 %v5791_v8  ;;  %v5807_v24 = vld [vmem:[%s8763_s1 + $0x70] sm:$0xff]   ;;  %v5811_v28 = vld [vmem:[%s8763_s1 + $0x78] sm:$0xff]   ;;  %v170_v34 = vld [vmem:[%s6193_s8] sm:$0xff]  ;;  %p5970_p0 = scmp.lt.s32.totalorder %s8697_s28, %s5968_s6 }
  0x1e   : > { %4818 = vmatprep.subr.bf16.mxu1 %v5792_v9  ;;  %v5808_v25 = vld [vmem:[%s8763_s1 + $0xf0] sm:$0xff]   ;;  %v5812_v29 = vld [vmem:[%s8763_s1 + $0xf8] sm:$0xff]   ;;  %v171_v39 = vld [vmem:[%s6193_s8 + $0x8] sm:$0xff]  ;;  %v219_v41 = vrot.slane %v170_v34, 1  ;;  %v270_v42 = vrot.slane %v170_v34, 7 }
  0x1f   : > { %v5809_v26 = vld [vmem:[%s8763_s1 + $0x30] sm:$0xff]   ;;  %v5813_v30 = vld [vmem:[%s8763_s1 + $0x38] sm:$0xff]   ;;  %v5815_v40 = vld [vmem:[%s8763_s1 + $0x140] sm:$0xff]   ;;  %v271_v43 = vrot.slane %v171_v39, 7  ;;  %v364_v44 = vrot.slane %v171_v39, 5 }
  0x20   : > { %4707 = vmatpush3.bf16.msra.mxu0 %v5793_v10  ;;  %v5810_v27 = vld [vmem:[%s8763_s1 + $0xb0] sm:$0xff]   ;;  %v5814_v31 = vld [vmem:[%s8763_s1 + $0xb8] sm:$0xff]   ;;  %v396_v52 = vsel %vm266_vm0, %v219_v41, %v270_v42  ;;  %v5816_v62 = vld [vmem:[%s8763_s1 + $0x100] sm:$0xff]  }
  0x21   : > { %4819 = vmatpush3.bf16.msra.mxu1 %v5794_v11  ;;  %4708 = vmatprep.subr.bf16.mxu0 %v5795_v12  ;;  %v172_v32 = vld [vmem:[%s6193_s8 + $0x10] sm:$0xff]  ;;  %v173_v33 = vld [vmem:[%s6193_s8 + $0x18] sm:$0xff]  ;;  %v272_v51 = vsel %vm266_vm0, %v270_v42, %v271_v43  ;;  %v463_v56 = vrot.slane %v396_v52, 1  ;;  %v174_v63 = vld [vmem:[%s6193_s8 + $0x20] sm:$0xff]  ;;  %v412_v2 = vsel %vm266_vm0, %v271_v43, %v364_v44  ;;  %v569_v5 = vrot.slane %v396_v52, 2 }
  0x22   : > { %4820 = vmatprep.subr.bf16.mxu1 %v5796_v13  ;;  %v218_v35 = vrot.slane %v172_v32, 1  ;;  %v267_v36 = vrot.slane %v172_v32, 7  ;;  %v268_v37 = vrot.slane %v173_v33, 7  ;;  %v363_v38 = vrot.slane %v173_v33, 5  ;;  %v175_v3 = vld [vmem:[%s6193_s8 + $0x28] sm:$0xff]  ;;  %v5822_v39 = vld [vmem:[%s8763_s1 + $0x118] sm:$0xff]  }
  0x23   : > { %v464_v53 = vrot.slane %v272_v51, 1  ;;  %v688_v59 = vpack.c.bf16 %v272_v51, %v396_v52  ;;  %v570_v0 = vrot.slane %v272_v51, 2  ;;  %v5817_v4 = vld [vmem:[%s8763_s1 + $0x148] sm:$0xff]   ;;  %v466_v8 = vrot.slane %v412_v2, 1  ;;  %v5823_v42 = vld [vmem:[%s8763_s1 + $0x160] sm:$0xff]  }
  0x24   : > { %4709 = vmatpush3.bf16.msra.mxu0 %v5797_v14  ;;  %v269_v45 = vsel %vm266_vm0, %v267_v36, %v268_v37  ;;  %v395_v46 = vsel %vm266_vm0, %v218_v35, %v267_v36  ;;  %v411_v47 = vsel %vm266_vm0, %v268_v37, %v363_v38  ;;  %v572_v10 = vrot.slane %v412_v2, 2  ;;  %v5824_v38 = vld [vmem:[%s8763_s1 + $0x1c0] sm:$0xff]  }
  0x25   : > { %4821 = vmatpush3.bf16.msra.mxu1 %v5798_v15  ;;  %4710 = vmatprep.subr.bf16.mxu0 %v5799_v16  ;;  %v458_v48 = vrot.slane %v395_v46, 1  ;;  %v459_v49 = vrot.slane %v269_v45, 1  ;;  %v461_v50 = vrot.slane %v411_v47, 1  ;;  %v6215_v57 = vpack.c.bf16 %v269_v45, %v395_v46  ;;  %v5826_v43 = vld [vmem:[%s8763_s1 + $0x180] sm:$0xff]  }
  0x26   : > { %4822 = vmatprep.subr.bf16.mxu1 %v5800_v17  ;;  %v564_v60 = vrot.slane %v395_v46, 2  ;;  %v565_v61 = vrot.slane %v269_v45, 2  ;;  %v567_v1 = vrot.slane %v411_v47, 2  ;;  %1502 = vmatprep.mubr.bf16.mxu1 %v688_v59  ;;  %v465_v7 = vsel %vm457_vm1, %v463_v56, %v464_v53  ;;  %v5818_v17 = vld [vmem:[%s8763_s1 + $0x108] sm:$0xff]  }
  0x27   : > { %v460_v54 = vsel %vm457_vm1, %v458_v48, %v459_v49  ;;  %v462_v55 = vsel %vm457_vm1, %v459_v49, %v461_v50  ;;  %v220_v11 = vrot.slane %v174_v63, 1  ;;  %v365_v12 = vrot.slane %v175_v3, 5  ;;  %v178_v49 = vld [vmem:[%s6193_s8 + $0x40] sm:$0xff]  ;;  %v179_v50 = vld [vmem:[%s6193_s8 + $0x48] sm:$0xff] }
  0x28   : > { %4711 = vmatpush3.bf16.msra.mxu0 %v5801_v18  ;;  %v6217_v58 = vpack.c.bf16 %v462_v55, %v460_v54  ;;  %v566_v6 = vsel %vm563_vm2, %v564_v60, %v565_v61  ;;  %v568_v9 = vsel %vm563_vm2, %v565_v61, %v567_v1  ;;  %v467_v14 = vsel %vm457_vm1, %v464_v53, %v466_v8  ;;  %v5825_v53 = vld [vmem:[%s8763_s1 + $0x120] sm:$0xff]   ;;  %v5827_v55 = vld [vmem:[%s8763_s1 + $0x168] sm:$0xff]   ;;  %v180_v61 = vld [vmem:[%s6193_s8 + $0x50] sm:$0xff] }
  0x29   : > { %4823 = vmatpush3.bf16.msra.mxu1 %v5802_v19  ;;  %4712 = vmatprep.subr.bf16.mxu0 %v5803_v20  ;;  %v6233_v13 = vpack.c.bf16 %v568_v9, %v566_v6  ;;  %v273_v15 = vrot.slane %v174_v63, 7  ;;  %v274_v16 = vrot.slane %v175_v3, 7  ;;  %v6239_v18 = vpack.c.bf16 %v467_v14, %v465_v7  ;;  %v5819_v19 = vld [vmem:[%s8763_s1 + $0x150] sm:$0xff]   ;;  %v5829_v3 = vld [vmem:[%s8763_s1 + $0x128] sm:$0xff]  }
  0x2a   : > { %4824 = vmatprep.subr.bf16.mxu1 %v5804_v21  ;;  %1341 = vmatprep.mubr.bf16.mxu0 %v6217_v58  ;;  %v571_v20 = vsel %vm563_vm2, %v569_v5, %v570_v0  ;;  %v573_v21 = vsel %vm563_vm2, %v570_v0, %v572_v10  ;;  %v367_v60 = vrot.slane %v179_v50, 5  ;;  %v222_v0 = vrot.slane %v178_v49, 1  ;;  %v181_v10 = vld [vmem:[%s6193_s8 + $0x58] sm:$0xff] }
  0x2b   : > { %v6269_v32 = vpack.c.bf16 %v573_v21, %v571_v20  ;;  %v279_v1 = vrot.slane %v178_v49, 7  ;;  %v280_v2 = vrot.slane %v179_v50, 7 }
  0x2c   : > { %4713 = vmatpush3.bf16.msra.mxu0 %v5805_v22  ;;  %v6250_v22 = vsel %vm266_vm0, %v274_v16, %v365_v12 }
  0x2d   : > { %4825 = vmatpush3.bf16.msra.mxu1 %v5806_v23  ;;  %4714 = vmatprep.subr.bf16.mxu0 %v5807_v24  ;;  %v176_v23 = vld [vmem:[%s6193_s8 + $0x30] sm:$0xff]  ;;  %v6254_v24 = vsel %vm266_vm0, %v273_v15, %v274_v16  ;;  %v6339_v9 = vsel %vm266_vm0, %v280_v2, %v367_v60  ;;  %v399_v14 = vsel %vm266_vm0, %v222_v0, %v279_v1  ;;  %v5838_v60 = vld [vmem:[%s8763_s1 + $0x138] sm:$0xff]  }
  0x2e   : > { %4826 = vmatprep.subr.bf16.mxu1 %v5808_v25  ;;  %v6257_v25 = vsel %vm266_vm0, %v220_v11, %v273_v15  ;;  %v221_v33 = vrot.slane %v176_v23, 1  ;;  %v276_v34 = vrot.slane %v176_v23, 7  ;;  %v575_v56 = vrot.slane %v6254_v24, 2  ;;  %v5831_v16 = vld [vmem:[%s8763_s1 + $0x170] sm:$0xff]   ;;  %v185_v0 = vld [vmem:[%s6193_s8 + $0x78] sm:$0xff] }
  0x2f   : > { %v6273_v36 = vpack.c.bf16 %v6254_v24, %v6257_v25  ;;  %v574_v46 = vrot.slane %v6257_v25, 2  ;;  %v223_v15 = vrot.slane %v180_v61, 1  ;;  %v6355_v20 = vsel %vm266_vm0, %v279_v1, %v280_v2  ;;  %v5839_v1 = vld [vmem:[%s8763_s1 + $0x1e0] sm:$0xff]  }
  0x30   : > { %4715 = vmatpush3.bf16.msra.mxu0 %v5809_v26  ;;  %v177_v26 = vld [vmem:[%s6193_s8 + $0x38] sm:$0xff]  ;;  %v6292_v44 = vsel %vm266_vm0, %v221_v33, %v276_v34  ;;  %v478_v21 = vrot.slane %v399_v14, 1  ;;  %v479_v23 = vrot.slane %v6355_v20, 1  ;;  %v5834_v33 = vld [vmem:[%s8763_s1 + $0x190] sm:$0xff]  }
  0x31   : > { %4827 = vmatpush3.bf16.msra.mxu1 %v5810_v27  ;;  %4716 = vmatprep.subr.bf16.mxu0 %v5811_v28  ;;  %v5820_v27 = vld [vmem:[%s8763_s1 + $0x110] sm:$0xff]   ;;  %v468_v28 = vrot.slane %v6257_v25, 1  ;;  %v366_v35 = vrot.slane %v177_v26, 5  ;;  %v277_v37 = vrot.slane %v177_v26, 7  ;;  %v473_v48 = vrot.slane %v6292_v44, 1 }
  0x32   : > { %4828 = vmatprep.subr.bf16.mxu1 %v5812_v29  ;;  %v469_v29 = vrot.slane %v6254_v24, 1  ;;  %v579_v7 = vrot.slane %v6292_v44, 2  ;;  %v576_v8 = vsel %vm563_vm2, %v574_v46, %v575_v56  ;;  %v481_v24 = vrot.slane %v6339_v9, 1 }
  0x33   : > { %v6295_v45 = vsel %vm266_vm0, %v277_v37, %v366_v35  ;;  %v6300_v47 = vsel %vm266_vm0, %v276_v34, %v277_v37  ;;  %v283_v25 = vrot.slane %v181_v10, 7  ;;  %v368_v26 = vrot.slane %v181_v10, 5 }
  0x34   : > { %4717 = vmatpush3.bf16.msra.mxu0 %v5813_v30  ;;  %v471_v30 = vrot.slane %v6250_v22, 1  ;;  %v474_v52 = vrot.slane %v6300_v47, 1  ;;  %v476_v54 = vrot.slane %v6295_v45, 1  ;;  %v6324_v63 = vpack.c.bf16 %v6300_v47, %v6292_v44  ;;  %v6385_v44 = vld [vmem:[%s6193_s8 + $0x70] sm:$0xff] }
  0x35   : > { %4829 = vmatpush3.bf16.msra.mxu1 %v5814_v31  ;;  %4926 = vmatprep.subr.bf16.mxu0 %v5815_v40  ;;  %v5821_v31 = vld [vmem:[%s8763_s1 + $0x158] sm:$0xff]   ;;  %v470_v40 = vsel %vm457_vm1, %v468_v28, %v469_v29  ;;  %v580_v11 = vrot.slane %v6300_v47, 2  ;;  %v582_v28 = vrot.slane %v6295_v45, 2  ;;  %v584_v34 = vrot.slane %v399_v14, 2 }
  0x36   : > { %v472_v41 = vsel %vm457_vm1, %v469_v29, %v471_v30  ;;  %5038 = vmatprep.subr.bf16.mxu1 %v5824_v38  ;;  %v475_v5 = vsel %vm457_vm1, %v473_v48, %v474_v52  ;;  %v477_v6 = vsel %vm457_vm1, %v474_v52, %v476_v54  ;;  %v5833_v29 = vld [vmem:[%s8763_s1 + $0x130] sm:$0xff]   ;;  %v6367_v30 = vpack.c.bf16 %v6355_v20, %v399_v14  ;;  %v183_v38 = vld [vmem:[%s6193_s8 + $0x68] sm:$0xff]  ;;  %v5836_v54 = vld [vmem:[%s8763_s1 + $0x198] sm:$0xff]  }
  0x37   : > { %1342 = vmatmul.mubr.bf16.vlgmr.msra.gmra.mrb[0].mxu0 %v6215_v57  ;;  %v6305_v51 = vpack.c.bf16 %v472_v41, %v470_v40  ;;  %v585_v35 = vrot.slane %v6355_v20, 2  ;;  %v480_v40 = vsel %vm457_vm1, %v478_v21, %v479_v23  ;;  %v482_v41 = vsel %vm457_vm1, %v479_v23, %v481_v24  ;;  %v5841_v24 = vld [vmem:[%s8763_s1 + $0x1e8] sm:$0xff]  }
  0x38   : > { %4927 = vmatpush3.bf16.msra.mxu0 %v5816_v62  ;;  %1503 = vmatmul.mubr.bf16.vlgmr.msra.gmra.mrb[0].mxu1 %v6233_v13  ;;  %v5828_v62 = vld [vmem:[%s8763_s1 + $0x1c8] sm:$0xff]   ;;  %v581_v45 = vsel %vm563_vm2, %v579_v7, %v580_v11  ;;  %v583_v46 = vsel %vm563_vm2, %v580_v11, %v582_v28  ;;  %v286_v52 = vrot.slane %v183_v38, 7  ;;  %v288_v10 = vrot.slane %v6385_v44, 7  ;;  %v186_v11 = vld [vmem:[%s6193_s8 + $0x80] sm:$0xff] }
  0x39   : > { %4928 = vmatprep.subr.bf16.mxu0 %v5817_v4  ;;  %1349 = vmatprep.mubr.bf16.mxu0 %v6239_v18  ;;  %v5830_v4 = vld [vmem:[%s8763_s1 + $0x188] sm:$0xff]   ;;  %v289_v28 = vrot.slane %v185_v0, 7 }
  0x3a   : > { %1510 = vmatprep.mubr.bf16.mxu1 %v6215_v57  ;;  %5039 = vmatpush3.bf16.msra.mxu1 %v5826_v43  ;;  %v416_v43 = vsel %vm266_vm0, %v283_v25, %v368_v26 }
  0x3b   : > { %5040 = vmatprep.subr.bf16.mxu1 %v5828_v62  ;;  %v587_v62 = vrot.slane %v6339_v9, 2  ;;  %v592_v9 = vrot.slane %v416_v43, 2 }
  0x3c   : > { %4929 = vmatpush3.bf16.msra.mxu0 %v5818_v17  ;;  %v5832_v17 = vld [vmem:[%s8763_s1 + $0x1d0] sm:$0xff]  }
  0x3d   : > { %4930 = vmatprep.subr.bf16.mxu0 %v5819_v19  ;;  %v6352_v19 = vpack.c.bf16 %v477_v6, %v475_v5  ;;  %v225_v5 = vrot.slane %v6385_v44, 1  ;;  %v5840_v6 = vld [vmem:[%s8763_s1 + $0x1a0] sm:$0xff]   ;;  %v588_v20 = vsel %vm563_vm2, %v585_v35, %v587_v62 }
  0x3e   : > { %5041 = vmatpush3.bf16.msra.mxu1 %v5830_v4  ;;  %v586_v4 = vsel %vm563_vm2, %v584_v34, %v585_v35  ;;  %v190_v62 = vld [vmem:[%s6193_s8 + $0xa0] sm:$0xff] }
  0x3f   : > { %1350 = vmatmul.mubr.bf16.gmra.mrb[4].mxu0 %v688_v59  ;;  %v577_v59 = vrot.slane %v6250_v22, 2  ;;  %v282_v22 = vrot.slane %v180_v61, 7  ;;  %5042 = vmatprep.subr.bf16.mxu1 %v5832_v17  ;;  %v6402_v61 = vpack.c.bf16 %v583_v46, %v581_v45  ;;  %v187_v17 = vld [vmem:[%s6193_s8 + $0x88] sm:$0xff]  ;;  %v189_v46 = vld [vmem:[%s6193_s8 + $0x98] sm:$0xff] }
  0x40   : > { %1357 = vmatprep.mubr.bf16.mxu0 %v6217_v58  ;;  %4931 = vmatpush3.bf16.msra.mxu0 %v5820_v27  ;;  %v292_v45 = vrot.slane %v187_v17, 7 }
  0x41   : > { %4932 = vmatprep.subr.bf16.mxu0 %v5821_v31  ;;  %1511 = vmatmul.mubr.bf16.gmra.mrb[4].mxu1 %v6269_v32  ;;  %v578_v12 = vsel %vm563_vm2, %v575_v56, %v577_v59  ;;  %v182_v31 = vld [vmem:[%s6193_s8 + $0x60] sm:$0xff]  ;;  %v400_v37 = vsel %vm266_vm0, %v223_v15, %v282_v22  ;;  %v6397_v56 = vpack.c.bf16 %v482_v41, %v480_v40  ;;  %v486_v59 = vrot.slane %v416_v43, 1 }
  0x42   : > { %1518 = vmatprep.mubr.bf16.mxu1 %v6273_v36  ;;  %v6359_v27 = vpack.c.bf16 %v578_v12, %v576_v8  ;;  %5043 = vmatpush3.bf16.msra.mxu1 %v5834_v33  ;;  %v483_v47 = vrot.slane %v400_v37, 1  ;;  %v224_v49 = vrot.slane %v182_v31, 1  ;;  %v285_v50 = vrot.slane %v182_v31, 7  ;;  %v5842_v31 = vld [vmem:[%s8763_s1 + $0x1a8] sm:$0xff]  }
  0x43   : > { %v589_v2 = vrot.slane %v400_v37, 2  ;;  %v226_v41 = vrot.slane %v186_v11, 1  ;;  %v6454_v43 = vpack.c.bf16 %v588_v20, %v586_v4  ;;  %v372_v4 = vrot.slane %v189_v46, 5 }
  0x44   : > { %4933 = vmatpush3.bf16.msra.mxu0 %v5822_v39  ;;  %v5835_v39 = vld [vmem:[%s8763_s1 + $0x1d8] sm:$0xff]   ;;  %v6423_v14 = vsel %vm266_vm0, %v285_v50, %v286_v52  ;;  %v401_v15 = vsel %vm266_vm0, %v224_v49, %v285_v50  ;;  %v6466_v49 = vsel %vm266_vm0, %v288_v10, %v289_v28 }
  0x45   : > { %4934 = vmatprep.subr.bf16.mxu0 %v5823_v42  ;;  %v284_v42 = vsel %vm266_vm0, %v282_v22, %v283_v25  ;;  %5044 = vmatprep.subr.bf16.mxu1 %v5835_v39  ;;  %v488_v21 = vrot.slane %v401_v15, 1  ;;  %v489_v22 = vrot.slane %v6423_v14, 1  ;;  %v594_v23 = vrot.slane %v401_v15, 2 }
  0x46   : > { %v484_v48 = vrot.slane %v284_v42, 1  ;;  %5045 = vmatpush3.bf16.msra.mxu1 %v5836_v54  ;;  %v6415_v7 = vpack.c.bf16 %v284_v42, %v400_v37  ;;  %v595_v25 = vrot.slane %v6423_v14, 2  ;;  %v6447_v37 = vsel %vm266_vm0, %v225_v5, %v288_v10  ;;  %v5846_v5 = vld [vmem:[%s8763_s1 + $0x1b8] sm:$0xff]  }
  0x47   : > { %1358 = vmatmul.mubr.bf16.gmra.mrb[8].mxu0 %v6215_v57  ;;  %5046 = vmatprep.subr.bf16.mxu1 %v5839_v1  ;;  %v493_v39 = vrot.slane %v6447_v37, 1  ;;  %v6457_v44 = vpack.c.bf16 %v6423_v14, %v401_v15  ;;  %v490_v54 = vsel %vm457_vm1, %v488_v21, %v489_v22 }
  0x48   : > { %1365 = vmatprep.mubr.bf16.mxu0 %v6305_v51  ;;  %4935 = vmatpush3.bf16.msra.mxu0 %v5825_v53  ;;  %v369_v53 = vrot.slane %v183_v38, 5  ;;  %v485_v8 = vsel %vm457_vm1, %v483_v47, %v484_v48  ;;  %v487_v12 = vsel %vm457_vm1, %v484_v48, %v486_v59  ;;  %v6450_v38 = vld [vmem:[%s6193_s8 + $0x90] sm:$0xff]  ;;  %v599_v59 = vrot.slane %v6447_v37, 2 }
  0x49   : > { %4936 = vmatprep.subr.bf16.mxu0 %v5827_v55  ;;  %1519 = vmatmul.mubr.bf16.gmra.mrb[8].mxu1 %v6233_v13  ;;  %v5837_v55 = vld [vmem:[%s8763_s1 + $0x178] sm:$0xff]   ;;  %v6442_v33 = vpack.c.bf16 %v487_v12, %v485_v8  ;;  %v5843_v47 = vld [vmem:[%s8763_s1 + $0x1f0] sm:$0xff]  }
  0x4a   : > { %1526 = vmatprep.mubr.bf16.mxu1 %v6324_v63  ;;  %5047 = vmatpush3.bf16.msra.mxu1 %v5840_v6  ;;  %v596_v6 = vsel %vm563_vm2, %v594_v23, %v595_v25 }
  0x4b   : > { %5048 = vmatprep.subr.bf16.mxu1 %v5841_v24  ;;  %v192_v24 = vld [vmem:[%s6193_s8 + $0xb0] sm:$0xff] }
  0x4c   : > { %4937 = vmatpush3.bf16.msra.mxu0 %v5829_v3  ;;  %v590_v3 = vrot.slane %v284_v42, 2  ;;  %v291_v42 = vrot.slane %v186_v11, 7  ;;  %v6501_v11 = vld [vmem:[%s8763_s1 + $0x200] sm:$0xff]  }
  0x4d   : > { %4938 = vmatprep.subr.bf16.mxu0 %v5831_v16  ;;  %v6427_v16 = vsel %vm266_vm0, %v286_v52, %v369_v53  ;;  %v371_v52 = vrot.slane %v187_v17, 5  ;;  %v5844_v53 = vld [vmem:[%s8763_s1 + $0x1b0] sm:$0xff]   ;;  %v191_v17 = vld [vmem:[%s6193_s8 + $0xa8] sm:$0xff] }
  0x4e   : > { %v591_v26 = vsel %vm563_vm2, %v589_v2, %v590_v3  ;;  %v593_v34 = vsel %vm563_vm2, %v590_v3, %v592_v9  ;;  %v491_v35 = vrot.slane %v6427_v16, 1  ;;  %v597_v40 = vrot.slane %v6427_v16, 2  ;;  %5049 = vmatpush3.bf16.msra.mxu1 %v5842_v31 }
  0x4f   : > { %1366 = vmatmul.mubr.bf16.gmra.mrb[12].mxu0 %v6273_v36  ;;  %v6463_v48 = vpack.c.bf16 %v593_v34, %v591_v26  ;;  %5050 = vmatprep.subr.bf16.mxu1 %v5843_v47  ;;  %v227_v2 = vrot.slane %v6450_v38, 1  ;;  %v294_v3 = vrot.slane %v6450_v38, 7  ;;  %v6493_v9 = vsel %vm266_vm0, %v291_v42, %v292_v45  ;;  %v193_v34 = vld [vmem:[%s6193_s8 + $0xb8] sm:$0xff]  ;;  %v198_v38 = vld [vmem:[%s6193_s8 + $0xe0] sm:$0xff] }
  0x50   : > { %1373 = vmatprep.mubr.bf16.mxu0 %v6352_v19  ;;  %4939 = vmatpush3.bf16.msra.mxu0 %v5833_v29  ;;  %v370_v29 = vrot.slane %v185_v0, 5  ;;  %v5845_v0 = vld [vmem:[%s8763_s1 + $0x1f8] sm:$0xff]   ;;  %v492_v1 = vsel %vm457_vm1, %v489_v22, %v491_v35  ;;  %v6496_v10 = vsel %vm266_vm0, %v226_v41, %v291_v42  ;;  %v6507_v15 = vsel %vm266_vm0, %v292_v45, %v371_v52 }
  0x51   : > { %1527 = vmatmul.mubr.bf16.gmra.mrb[12].mxu1 %v6359_v27  ;;  %4940 = vmatprep.subr.bf16.mxu0 %v5837_v55  ;;  %v494_v55 = vrot.slane %v6466_v49, 1  ;;  %v498_v12 = vrot.slane %v6496_v10, 1  ;;  %v604_v14 = vrot.slane %v6496_v10, 2  ;;  %v295_v16 = vrot.slane %v189_v46, 7 }
  0x52   : > { %1534 = vmatprep.mubr.bf16.mxu1 %v6367_v30  ;;  %v6469_v50 = vsel %vm266_vm0, %v289_v28, %v370_v29  ;;  %5051 = vmatpush3.bf16.msra.mxu1 %v5844_v53  ;;  %v6511_v20 = vpack.c.bf16 %v492_v1, %v490_v54  ;;  %v598_v21 = vsel %vm563_vm2, %v595_v25, %v597_v40  ;;  %v499_v22 = vrot.slane %v6493_v9, 1 }
  0x53   : > { %v496_v8 = vrot.slane %v6469_v50, 1  ;;  %5052 = vmatprep.subr.bf16.mxu1 %v5845_v0  ;;  %v602_v23 = vrot.slane %v6469_v50, 2  ;;  %v605_v26 = vrot.slane %v6493_v9, 2  ;;  %v6520_v28 = vsel %vm266_vm0, %v227_v2, %v294_v3 }
  0x54   : > { %4941 = vmatpush3.bf16.msra.mxu0 %v5838_v60  ;;  %v600_v60 = vrot.slane %v6466_v49, 2  ;;  %v6523_v29 = vsel %vm266_vm0, %v295_v16, %v372_v4  ;;  %v228_v31 = vrot.slane %v190_v62, 1  ;;  %v501_v35 = vrot.slane %v6507_v15, 1 }
  0x55   : > { %5646 = vmatprep.subr.bf16.mxu0 %v6501_v11  ;;  %v503_v25 = vrot.slane %v6520_v28, 1  ;;  %v297_v40 = vrot.slane %v190_v62, 7  ;;  %v6531_v41 = vpack.c.bf16 %v6466_v49, %v6447_v37  ;;  %v6534_v42 = vsel %vm266_vm0, %v294_v3, %v295_v16  ;;  %v194_v16 = vld [vmem:[%s6193_s8 + $0xc0] sm:$0xff] }
  0x56   : > { %5053 = vmatpush3.bf16.msra.mxu1 %v5846_v5  ;;  %v298_v45 = vrot.slane %v191_v17, 7  ;;  %v373_v46 = vrot.slane %v191_v17, 5  ;;  %v504_v47 = vrot.slane %v6534_v42, 1  ;;  %v506_v54 = vrot.slane %v6523_v29, 1 }
  0x57   : > { %1374 = vmatmul.mubr.bf16.gmra.mrb[16].mxu0 %v6324_v63  ;;  %v6542_v62 = vpack.c.bf16 %v598_v21, %v596_v6  ;;  %v229_v0 = vrot.slane %v192_v24, 1  ;;  %v300_v1 = vrot.slane %v192_v24, 7  ;;  %v495_v2 = vsel %vm457_vm1, %v493_v39, %v494_v55  ;;  %v195_v39 = vld [vmem:[%s6193_s8 + $0xc8] sm:$0xff] }
  0x58   : > { %1381 = vmatprep.mubr.bf16.mxu0 %v6397_v56  ;;  %v497_v3 = vsel %vm457_vm1, %v494_v55, %v496_v8  ;;  %v301_v5 = vrot.slane %v193_v34, 7  ;;  %v6552_v17 = vsel %vm266_vm0, %v297_v40, %v298_v45  ;;  %v6555_v6 = vsel %vm266_vm0, %v228_v31, %v297_v40  ;;  %v197_v8 = vld [vmem:[%s6193_s8 + $0xd8] sm:$0xff] }
  0x59   : > { %1535 = vmatmul.mubr.bf16.gmra.mrb[16].mxu1 %v6402_v61  ;;  %v6558_v21 = vsel %vm266_vm0, %v298_v45, %v373_v46  ;;  %v374_v24 = vrot.slane %v193_v34, 5  ;;  %v6566_v53 = vpack.c.bf16 %v497_v3, %v495_v2  ;;  %v6570_v31 = vpack.c.bf16 %v6493_v9, %v6496_v10  ;;  %v196_v45 = vld [vmem:[%s6193_s8 + $0xd0] sm:$0xff] }
  0x5a   : > { %1542 = vmatprep.mubr.bf16.mxu1 %v6415_v7  ;;  %v500_v34 = vsel %vm457_vm1, %v498_v12, %v499_v22  ;;  %v6574_v40 = vsel %vm266_vm0, %v229_v0, %v300_v1  ;;  %v502_v46 = vsel %vm457_vm1, %v499_v22, %v501_v35  ;;  %v6580_v4 = vsel %vm266_vm0, %v300_v1, %v301_v5 }
  0x5b   : > { %v6585_v52 = vsel %vm266_vm0, %v301_v5, %v374_v24  ;;  %v230_v12 = vrot.slane %v194_v16, 1  ;;  %v303_v0 = vrot.slane %v194_v16, 7  ;;  %v304_v55 = vrot.slane %v195_v39, 7  ;;  %v6604_v24 = vld [vmem:[%s6193_s8 + $0xe8] sm:$0xff] }
  0x5c   : > { %v375_v1 = vrot.slane %v195_v39, 5  ;;  %v601_v5 = vsel %vm563_vm2, %v599_v59, %v600_v60  ;;  %v603_v16 = vsel %vm563_vm2, %v600_v60, %v602_v23  ;;  %v231_v35 = vrot.slane %v196_v45, 1 }
  0x5d   : > { %v306_v2 = vrot.slane %v196_v45, 7  ;;  %v6609_v22 = vpack.c.bf16 %v502_v46, %v500_v34  ;;  %v6612_v37 = vsel %vm266_vm0, %v230_v12, %v303_v0  ;;  %v307_v50 = vrot.slane %v197_v8, 7 }
  0x5e   : > { %v376_v59 = vrot.slane %v197_v8, 5  ;;  %v6616_v49 = vsel %vm266_vm0, %v303_v0, %v304_v55  ;;  %v6621_v45 = vsel %vm266_vm0, %v304_v55, %v375_v1  ;;  %v232_v3 = vrot.slane %v198_v38, 1 }
  0x5f   : > { %1382 = vmatmul.mubr.bf16.gmra.mrb[20].mxu0 %v6367_v30  ;;  %v6626_v8 = vpack.c.bf16 %v603_v16, %v601_v5  ;;  %v6630_v0 = vpack.c.bf16 %v6534_v42, %v6520_v28  ;;  %v309_v39 = vrot.slane %v198_v38, 7  ;;  %v8766_v60 = vrot.slane %v6604_v24, 7 }
  0x60   : > { %1389 = vmatprep.mubr.bf16.mxu0 %v6442_v33  ;;  %v521_v23 = vrot.slane %v6621_v45, 1  ;;  %v6635_v55 = vsel %vm266_vm0, %v306_v2, %v307_v50  ;;  %v6638_v1 = vsel %vm266_vm0, %v231_v35, %v306_v2  ;;  %v6641_v46 = vsel %vm266_vm0, %v307_v50, %v376_v59 }
  0x61   : > { %1543 = vmatmul.mubr.bf16.gmra.mrb[20].mxu1 %v6454_v43  ;;  %v505_v2 = vsel %vm457_vm1, %v503_v25, %v504_v47  ;;  %v507_v35 = vsel %vm457_vm1, %v504_v47, %v506_v54  ;;  %v526_v59 = vrot.slane %v6641_v46, 1  ;;  %v6664_v38 = vsel %vm266_vm0, %v309_v39, %v8766_v60 }
  0x62   : > { %1550 = vmatprep.mubr.bf16.mxu1 %v6457_v44  ;;  %v6667_v12 = vsel %vm266_vm0, %v232_v3, %v309_v39  ;;  %v377_v54 = vrot.slane %v6604_v24, 5  ;;  %v606_v3 = vsel %vm563_vm2, %v604_v14, %v605_v26  ;;  %v8780_v39 = vrot.slane %v6507_v15, 2 }
  0x63   : > { %v6685_v25 = vpack.c.bf16 %v507_v35, %v505_v2  ;;  %v6692_v47 = vpack.c.bf16 %v6552_v17, %v6555_v6  ;;  %v8781_v10 = vrot.slane %v6552_v17, 1  ;;  %v8782_v14 = vrot.slane %v6555_v6, 1  ;;  %v200_v35 = vld [vmem:[%s6193_s8 + $0xf0] sm:$0xff] }
  0x64   : > { %v608_v50 = vsel %vm563_vm2, %v605_v26, %v8780_v39  ;;  %v8783_v15 = vrot.slane %v6558_v21, 1  ;;  %v8787_v16 = vrot.slane %v6523_v29, 2  ;;  %v233_v34 = vrot.slane %v200_v35, 1 }
  0x65   : > { %v6687_v5 = vpack.c.bf16 %v608_v50, %v606_v3  ;;  %v510_v9 = vsel %vm457_vm1, %v8782_v14, %v8781_v10  ;;  %v8784_v26 = vmov %v8781_v10  ;;  %v8785_v50 = vrot.slane %v6534_v42, 2 }
  0x66   : > { %v512_v2 = vsel %vm457_vm1, %v8784_v26, %v8783_v15  ;;  %v8786_v3 = vrot.slane %v6520_v28, 2  ;;  %v6725_v26 = vpack.c.bf16 %v6580_v4, %v6574_v40  ;;  %v312_v28 = vrot.slane %v200_v35, 7 }
  0x67   : > { %1390 = vmatmul.mubr.bf16.gmra.mrb[24].mxu0 %v6415_v7  ;;  %v8788_v10 = vmov %v8785_v50  ;;  %v6718_v60 = vpack.c.bf16 %v512_v2, %v510_v9  ;;  %v8789_v29 = vrot.slane %v6580_v4, 1  ;;  %v8790_v42 = vrot.slane %v6574_v40, 1 }
  0x68   : > { %1397 = vmatprep.mubr.bf16.mxu0 %v6511_v20  ;;  %v611_v39 = vsel %vm563_vm2, %v8786_v3, %v8785_v50  ;;  %v613_v14 = vsel %vm563_vm2, %v8788_v10, %v8787_v16  ;;  %v8791_v9 = vrot.slane %v6585_v52, 1  ;;  %v8793_v35 = vrot.slane %v6552_v17, 2 }
  0x69   : > { %1551 = vmatmul.mubr.bf16.gmra.mrb[24].mxu1 %v6463_v48  ;;  %v6720_v15 = vpack.c.bf16 %v613_v14, %v611_v39  ;;  %v515_v16 = vsel %vm457_vm1, %v8790_v42, %v8789_v29  ;;  %v8792_v2 = vmov %v8789_v29  ;;  %v8794_v3 = vrot.slane %v6555_v6, 2 }
  0x6a   : > { %1558 = vmatprep.mubr.bf16.mxu1 %v6531_v41  ;;  %v517_v50 = vsel %vm457_vm1, %v8792_v2, %v8791_v9  ;;  %v8795_v10 = vrot.slane %v6558_v21, 2  ;;  %v8796_v14 = vmov %v8793_v35  ;;  %v6757_v2 = vpack.c.bf16 %v6616_v49, %v6612_v37 }
  0x6b   : > { %v616_v39 = vsel %vm563_vm2, %v8794_v3, %v8793_v35  ;;  %v6750_v42 = vpack.c.bf16 %v517_v50, %v515_v16  ;;  %v8798_v6 = vrot.slane %v6616_v49, 1  ;;  %v8799_v21 = vrot.slane %v6612_v37, 1 }
  0x6c   : > { %v618_v29 = vsel %vm563_vm2, %v8796_v14, %v8795_v10  ;;  %v8801_v50 = vrot.slane %v6580_v4, 2  ;;  %v8802_v3 = vrot.slane %v6574_v40, 2  ;;  %v8803_v10 = vrot.slane %v6585_v52, 2 }
  0x6d   : > { %8797 = vst [vmem:[#allocation5_spill] sm:$0xff] %v6750_v42  ;;  %v6752_v9 = vpack.c.bf16 %v618_v29, %v616_v39  ;;  %v520_v17 = vsel %vm457_vm1, %v8799_v21, %v8798_v6  ;;  %v8800_v35 = vmov %v8798_v6  ;;  %v201_v21 = vld [vmem:[%s6193_s8 + $0xf8] sm:$0xff]  ;;  %v6791_v40 = vpack.c.bf16 %v6635_v55, %v6638_v1 }
  0x6e   : > { %v522_v16 = vsel %vm457_vm1, %v8800_v35, %v521_v23  ;;  %v621_v39 = vsel %vm563_vm2, %v8802_v3, %v8801_v50  ;;  %v8804_v14 = vmov %v8801_v50  ;;  %v8805_v35 = vrot.slane %v6604_v24, 7 }
  0x6f   : > { %1398 = vmatmul.mubr.bf16.gmra.mrb[28].mxu0 %v6457_v44  ;;  %v623_v29 = vsel %vm563_vm2, %v8804_v14, %v8803_v10  ;;  %v6780_v6 = vpack.c.bf16 %v522_v16, %v520_v17  ;;  %v8806_v52 = vrot.slane %v6635_v55, 1  ;;  %v8807_v4 = vrot.slane %v6638_v1, 1 }
  0x70   : > { %1405 = vmatprep.mubr.bf16.mxu0 %v6566_v53  ;;  %v6783_v23 = vpack.c.bf16 %v623_v29, %v621_v39  ;;  %v8809_v3 = vrot.slane %v6616_v49, 2  ;;  %v8810_v39 = vrot.slane %v6612_v37, 2  ;;  %v8811_v14 = vrot.slane %v6621_v45, 2 }
  0x71   : > { %1559 = vmatmul.mubr.bf16.gmra.mrb[28].mxu1 %v6542_v62  ;;  %v525_v17 = vsel %vm457_vm1, %v8807_v4, %v8806_v52  ;;  %v8808_v16 = vmov %v8806_v52  ;;  %v6821_v4 = vpack.c.bf16 %v6664_v38, %v6667_v12  ;;  %v8814_v37 = vrot.slane %v6664_v38, 1 }
  0x72   : > { %1566 = vmatprep.mubr.bf16.mxu1 %v6570_v31  ;;  %v527_v24 = vsel %vm457_vm1, %v8808_v16, %v526_v59  ;;  %v626_v10 = vsel %vm563_vm2, %v8810_v39, %v8809_v3  ;;  %v8812_v29 = vmov %v8809_v3  ;;  %v8815_v45 = vrot.slane %v6667_v12, 1 }
  0x73   : > { %v6814_v52 = vpack.c.bf16 %v527_v24, %v525_v17  ;;  %v8816_v16 = vmov %v8814_v37  ;;  %v8817_v24 = vrot.slane %v6635_v55, 2  ;;  %v8818_v3 = vrot.slane %v6638_v1, 2 }
  0x74   : > { %v530_v49 = vsel %vm457_vm1, %v8815_v45, %v8814_v37  ;;  %v378_v37 = vrot.slane %v201_v21, 5  ;;  %v635_v55 = vrot.slane %v6664_v38, 2 }
  0x75   : > { %8813 = vst [vmem:[#allocation6_spill] sm:$0xff] %v6814_v52  ;;  %v631_v39 = vsel %vm563_vm2, %v8818_v3, %v8817_v24 }
  0x77   : > { %1406 = vmatmul.mubr.bf16.gmra.mrb[32].mxu0 %v6531_v41 }
  0x78   : > { %1413 = vmatprep.mubr.bf16.mxu0 %v6609_v22 }
  0x79   : > { %1567 = vmatmul.mubr.bf16.gmra.mrb[32].mxu1 %v6626_v8 }
  0x7a   : > { %1574 = vmatprep.mubr.bf16.mxu1 %v6630_v0 }
  0x7f   : > { %1414 = vmatmul.mubr.bf16.gmra.mrb[36].mxu0 %v6570_v31 }
  0x80   : > { %1421 = vmatprep.mubr.bf16.mxu0 %v6685_v25 }
  0x81   : > { %1575 = vmatmul.mubr.bf16.gmra.mrb[36].mxu1 %v6687_v5 }
  0x82   : > { %1582 = vmatprep.mubr.bf16.mxu1 %v6692_v47 }
  0x87   : > { %1422 = vmatmul.mubr.bf16.gmra.mrb[40].mxu0 %v6630_v0 }
  0x88   : > { %1429 = vmatprep.mubr.bf16.mxu0 %v6718_v60 }
  0x89   : > { %1583 = vmatmul.mubr.bf16.gmra.mrb[40].mxu1 %v6720_v15 }
  0x8a   : > { %1590 = vmatprep.mubr.bf16.mxu1 %v6725_v26 }
  0x8f   : > { %1430 = vmatmul.mubr.bf16.gmra.mrb[44].mxu0 %v6692_v47 }
  0x90   : > { %1437 = vmatprep.mubr.bf16.mxu0 %v6750_v42  ;;  %v425_v42 = vsel %vm266_vm0, %v8805_v35, %v377_v54  ;;  %v313_v54 = vrot.slane %v201_v21, 7  ;;  %v628_v35 = vsel %vm563_vm2, %v8812_v29, %v8811_v14  ;;  %v8820_v14 = vmov %v8817_v24 }
  0x91   : > { %1591 = vmatmul.mubr.bf16.gmra.mrb[44].mxu1 %v6752_v9  ;;  %v531_v50 = vrot.slane %v425_v42, 1  ;;  %v6816_v59 = vpack.c.bf16 %v628_v35, %v626_v10  ;;  %v8819_v10 = vrot.slane %v6641_v46, 2  ;;  %v634_v46 = vrot.slane %v6667_v12, 2 }
  0x92   : > { %1598 = vmatprep.mubr.bf16.mxu1 %v6757_v2  ;;  %v314_v35 = vsel %vm266_vm0, %v312_v28, %v313_v54  ;;  %v426_v1 = vsel %vm266_vm0, %v313_v54, %v378_v37 }
  0x93   : > { %v532_v17 = vsel %vm457_vm1, %v8816_v16, %v531_v50  ;;  %v633_v29 = vsel %vm563_vm2, %v8820_v14, %v8819_v10  ;;  %v410_v50 = vsel %vm266_vm0, %v233_v34, %v312_v28  ;;  %v674_v3 = vrot.slane %v426_v1, 1 }
  0x94   : > { %v6846_v45 = vpack.c.bf16 %v532_v17, %v530_v49  ;;  %v671_v16 = vrot.slane %v410_v50, 1  ;;  %v6849_v24 = vpack.c.bf16 %v633_v29, %v631_v39  ;;  %v6854_v10 = vpack.c.bf16 %v314_v35, %v410_v50 }
  0x95   : > { %v637_v14 = vrot.slane %v425_v42, 2  ;;  %v678_v54 = vrot.slane %v410_v50, 2  ;;  %v679_v49 = vrot.slane %v314_v35, 2  ;;  %v636_v12 = vsel %vm563_vm2, %v634_v46, %v635_v55  ;;  %v5849_v50 = vld [vmem:[%s8763_s1 + $0x210] sm:$0xff]  }
  0x96   : > { %v681_v17 = vrot.slane %v426_v1, 2 }
  0x97   : > { %1438 = vmatmul.mubr.bf16.gmra.mrb[48].mxu0 %v6725_v26  ;;  %v638_v38 = vsel %vm563_vm2, %v635_v55, %v637_v14  ;;  %v680_v39 = vsel %vm563_vm2, %v678_v54, %v679_v49 }
  0x98   : > { %1445 = vmatprep.mubr.bf16.mxu0 %v6780_v6  ;;  %v6865_v42 = vpack.c.bf16 %v638_v38, %v636_v12  ;;  %v682_v29 = vsel %vm563_vm2, %v679_v49, %v681_v17 }
  0x99   : > { %1599 = vmatmul.mubr.bf16.gmra.mrb[48].mxu1 %v6783_v23 }
  0x9a   : > { %1606 = vmatprep.mubr.bf16.mxu1 %v6791_v40 }
  0x9f   : > { %1446 = vmatmul.mubr.bf16.gmra.mrb[52].mxu0 %v6757_v2 }
  0xa0   : > { %1453 = vmatprep.mubr.bf16.mxu0 %v6814_v52  ;;  %v672_v52 = vrot.slane %v314_v35, 1  ;;  %v5848_v35 = vld [vmem:[%s8763_s1 + $0x208] sm:$0xff]  }
  0xa1   : > { %1607 = vmatmul.mubr.bf16.gmra.mrb[52].mxu1 %v6816_v59 }
  0xa2   : > { %1614 = vmatprep.mubr.bf16.mxu1 %v6821_v4  ;;  %v673_v34 = vsel %vm457_vm1, %v671_v16, %v672_v52  ;;  %v675_v28 = vsel %vm457_vm1, %v672_v52, %v674_v3  ;;  %v6870_v52 = vpack.c.bf16 %v682_v29, %v680_v39 }
  0xa3   : > { %v6859_v21 = vpack.c.bf16 %v675_v28, %v673_v34 }
  0xa7   : > { %1454 = vmatmul.mubr.bf16.gmra.mrb[56].mxu0 %v6791_v40 }
  0xa8   : > { %1461 = vmatprep.mubr.bf16.mxu0 %v6846_v45 }
  0xa9   : > { %1615 = vmatmul.mubr.bf16.gmra.mrb[56].mxu1 %v6849_v24 }
  0xaa   : > { %1622 = vmatprep.mubr.bf16.mxu1 %v6854_v10 }
  0xaf   : > { %1462 = vmatmul.mubr.bf16.gmra.mrb[60].mxu0 %v6821_v4 }
  0xb0   : > { %1663 = vmatprep.mubr.bf16.mxu0 %v6269_v32  ;;  %v5850_v32 = vld [vmem:[%s8763_s1 + $0x218] sm:$0xff]  }
  0xb1   : > { %1623 = vmatmul.mubr.bf16.gmra.mrb[60].mxu1 %v6865_v42 }
  0xb2   : > { %1824 = vmatprep.mubr.bf16.mxu1 %v6217_v58 }
  0xb7   : > { %1664 = vmatmul.mubr.bf16.vlgmr.msra.gmra.mrb[64].mxu0 %v6239_v18  ;;  %v5851_v18 = vld [vmem:[%s8763_s1 + $0x220] sm:$0xff]  }
  0xb8   : > { %5647 = vmatpush3.bf16.msra.mxu0 %v6501_v11  ;;  %1671 = vmatprep.mubr.bf16.mxu0 %v6233_v13 }
  0xb9   : > { %5648 = vmatprep.subr.bf16.mxu0 %v5848_v35  ;;  %1825 = vmatmul.mubr.bf16.vlgmr.msra.gmra.mrb[64].mxu1 %v6215_v57  ;;  %v5852_v57 = vld [vmem:[%s8763_s1 + $0x228] sm:$0xff]  }
  0xba   : > { %1832 = vmatprep.mubr.bf16.mxu1 %v6305_v51 }
  0xbc   : > { %5649 = vmatpush3.bf16.msra.mxu0 %v5848_v35 }
  0xbd   : > { %5650 = vmatprep.subr.bf16.mxu0 %v5849_v50 }
  0xbf   : > { %1672 = vmatmul.mubr.bf16.gmra.mrb[68].mxu0 %v6217_v58  ;;  %v5853_v58 = vld [vmem:[%s8763_s1 + $0x230] sm:$0xff]  }
  0xc0   : > { %1679 = vmatprep.mubr.bf16.mxu0 %v6359_v27  ;;  %5651 = vmatpush3.bf16.msra.mxu0 %v5849_v50 }
  0xc1   : > { %5652 = vmatprep.subr.bf16.mxu0 %v5850_v32  ;;  %1833 = vmatmul.mubr.bf16.gmra.mrb[68].mxu1 %v6273_v36  ;;  %v5854_v36 = vld [vmem:[%s8763_s1 + $0x238] sm:$0xff]  }
  0xc2   : > { %1840 = vmatprep.mubr.bf16.mxu1 %v6352_v19 }
  0xc4   : > { %5653 = vmatpush3.bf16.msra.mxu0 %v5850_v32 }
  0xc5   : > { %5654 = vmatprep.subr.bf16.mxu0 %v5851_v18 }
  0xc7   : > { %1680 = vmatmul.mubr.bf16.gmra.mrb[72].mxu0 %v6305_v51  ;;  %v8821_v51 = vld [vmem:[#allocation5_spill] sm:$0xff] }
  0xc8   : > { %1687 = vmatprep.mubr.bf16.mxu0 %v6402_v61  ;;  %5655 = vmatpush3.bf16.msra.mxu0 %v5851_v18 }
  0xc9   : > { %5656 = vmatprep.subr.bf16.mxu0 %v5852_v57  ;;  %1841 = vmatmul.mubr.bf16.gmra.mrb[72].mxu1 %v6324_v63 }
  0xca   : > { %1848 = vmatprep.mubr.bf16.mxu1 %v6397_v56 }
  0xcc   : > { %5657 = vmatpush3.bf16.msra.mxu0 %v5852_v57 }
  0xcd   : > { %5658 = vmatprep.subr.bf16.mxu0 %v5853_v58 }
  0xcf   : > { %1688 = vmatmul.mubr.bf16.gmra.mrb[76].mxu0 %v6352_v19 }
  0xd0   : > { %1695 = vmatprep.mubr.bf16.mxu0 %v6454_v43  ;;  %5659 = vmatpush3.bf16.msra.mxu0 %v5853_v58 }
  0xd1   : > { %5660 = vmatprep.subr.bf16.mxu0 %v5854_v36  ;;  %1849 = vmatmul.mubr.bf16.gmra.mrb[76].mxu1 %v6367_v30 }
  0xd2   : > { %1856 = vmatprep.mubr.bf16.mxu1 %v6442_v33 }
  0xd4   : > { %5661 = vmatpush3.bf16.msra.mxu0 %v5854_v36 }
  0xd7   : > { %1696 = vmatmul.mubr.bf16.gmra.mrb[80].mxu0 %v6397_v56 }
  0xd8   : > { %1703 = vmatprep.mubr.bf16.mxu0 %v6463_v48 }
  0xd9   : > { %1857 = vmatmul.mubr.bf16.gmra.mrb[80].mxu1 %v6415_v7 }
  0xda   : > { %1864 = vmatprep.mubr.bf16.mxu1 %v6511_v20 }
  0xdf   : > { %1704 = vmatmul.mubr.bf16.gmra.mrb[84].mxu0 %v6442_v33 }
  0xe0   : > { %1711 = vmatprep.mubr.bf16.mxu0 %v6542_v62 }
  0xe1   : > { %1865 = vmatmul.mubr.bf16.gmra.mrb[84].mxu1 %v6457_v44 }
  0xe2   : > { %1872 = vmatprep.mubr.bf16.mxu1 %v6566_v53 }
  0xe7   : > { %1712 = vmatmul.mubr.bf16.gmra.mrb[88].mxu0 %v6511_v20 }
  0xe8   : > { %1719 = vmatprep.mubr.bf16.mxu0 %v6626_v8 }
  0xe9   : > { %1873 = vmatmul.mubr.bf16.gmra.mrb[88].mxu1 %v6531_v41 }
  0xea   : > { %1880 = vmatprep.mubr.bf16.mxu1 %v6609_v22 }
  0xef   : > { %1720 = vmatmul.mubr.bf16.gmra.mrb[92].mxu0 %v6566_v53 }
  0xf0   : > { %1727 = vmatprep.mubr.bf16.mxu0 %v6687_v5 }
  0xf1   : > { %1881 = vmatmul.mubr.bf16.gmra.mrb[92].mxu1 %v6570_v31 }
  0xf2   : > { %1888 = vmatprep.mubr.bf16.mxu1 %v6685_v25 }
  0xf7   : > { %1728 = vmatmul.mubr.bf16.gmra.mrb[96].mxu0 %v6609_v22 }
  0xf8   : > { %1735 = vmatprep.mubr.bf16.mxu0 %v6720_v15 }
  0xf9   : > { %1889 = vmatmul.mubr.bf16.gmra.mrb[96].mxu1 %v6630_v0 }
  0xfa   : > { %1896 = vmatprep.mubr.bf16.mxu1 %v6718_v60 }
  0xff   : > { %1736 = vmatmul.mubr.bf16.gmra.mrb[100].mxu0 %v6685_v25  ;;  %v8822_v25 = vld [vmem:[#allocation6_spill] sm:$0xff] }
 0x100   : > { %1743 = vmatprep.mubr.bf16.mxu0 %v6752_v9 }
 0x101   : > { %1897 = vmatmul.mubr.bf16.gmra.mrb[100].mxu1 %v6692_v47 }
 0x102   : > { %1904 = vmatprep.mubr.bf16.mxu1 %v8821_v51 }
 0x107   : > { %1744 = vmatmul.mubr.bf16.gmra.mrb[104].mxu0 %v6718_v60 }
 0x108   : > { %1751 = vmatprep.mubr.bf16.mxu0 %v6783_v23 }
 0x109   : > { %1905 = vmatmul.mubr.bf16.gmra.mrb[104].mxu1 %v6725_v26 }
 0x10a   : > { %v4718_v63 = vpop.f32.mrb[0].mxu0  ;;  %1912 = vmatprep.mubr.bf16.mxu1 %v6780_v6 }
 0x10b   : > { %v4719_v19 = vpop.f32.mrb[1].mxu0  ;;  %v4830_v7 = vpop.f32.mrb[0].mxu1 }
 0x10c   : > { %v4720_v30 = vadd.f32 %v4719_v19, %v4718_v63  ;;  %v4721_v56 = vpop.f32.mrb[2].mxu0  ;;  %v4831_v44 = vpop.f32.mrb[1].mxu1 }
 0x10d   : > { %v4722_v33 = vpop.f32.mrb[3].mxu0  ;;  %v4832_v20 = vadd.f32 %v4831_v44, %v4830_v7  ;;  %v4833_v41 = vpop.f32.mrb[2].mxu1 }
 0x10e   : > { %v4723_v11 = vadd.f32 %v4722_v33, %v4721_v56  ;;  %v4834_v53 = vpop.f32.mrb[3].mxu1 }
 0x10f   : > { %1752 = vmatmul.mubr.bf16.gmra.mrb[108].mxu0 %v8821_v51  ;;  %v4835_v31 = vadd.f32 %v4834_v53, %v4833_v41  ;;  %v6943_v22 = vadd.f32 %v4832_v20, %v4720_v30 }
 0x110   : > { %1759 = vmatprep.mubr.bf16.mxu0 %v6816_v59 }
 0x111   : > { %1913 = vmatmul.mubr.bf16.gmra.mrb[108].mxu1 %v6757_v2  ;;  %v6947_v47 = vadd.f32 %v4835_v31, %v4723_v11 }
 0x112   : > { %v4724_v60 = vpop.f32.mrb[4].mxu0  ;;  %1920 = vmatprep.mubr.bf16.mxu1 %v8822_v25 }
 0x113   : > { %v4725_v0 = vpop.f32.mrb[5].mxu0 }
 0x114   : > { %v4726_v26 = vadd.f32 %v4725_v0, %v4724_v60  ;;  %v4727_v37 = vpop.f32.mrb[6].mxu0  ;;  %v4836_v16 = vpop.f32.mrb[4].mxu1 }
 0x115   : > { %v4728_v1 = vpop.f32.mrb[7].mxu0  ;;  %v4837_v3 = vpop.f32.mrb[5].mxu1 }
 0x116   : > { %v4729_v46 = vadd.f32 %v4728_v1, %v4727_v37  ;;  %v4838_v55 = vadd.f32 %v4837_v3, %v4836_v16  ;;  %v4839_v14 = vpop.f32.mrb[6].mxu1 }
 0x117   : > { %1760 = vmatmul.mubr.bf16.gmra.mrb[112].mxu0 %v6780_v6  ;;  %v4840_v34 = vpop.f32.mrb[7].mxu1 }
 0x118   : > { %1767 = vmatprep.mubr.bf16.mxu0 %v6849_v24  ;;  %v4841_v2 = vadd.f32 %v4840_v34, %v4839_v14  ;;  %v6951_v28 = vadd.f32 %v4838_v55, %v4726_v26 }
 0x119   : > { %1921 = vmatmul.mubr.bf16.gmra.mrb[112].mxu1 %v6791_v40 }
 0x11a   : > { %v4730_v54 = vpop.f32.mrb[8].mxu0  ;;  %1928 = vmatprep.mubr.bf16.mxu1 %v6846_v45  ;;  %v6955_v12 = vadd.f32 %v4841_v2, %v4729_v46 }
 0x11b   : > { %v4731_v49 = vpop.f32.mrb[9].mxu0 }
 0x11c   : > { %v4732_v38 = vadd.f32 %v4731_v49, %v4730_v54  ;;  %v4733_v17 = vpop.f32.mrb[10].mxu0  ;;  %v4842_v39 = vpop.f32.mrb[8].mxu1 }
 0x11d   : > { %v4734_v29 = vpop.f32.mrb[11].mxu0  ;;  %v4843_v35 = vpop.f32.mrb[9].mxu1 }
 0x11e   : > { %v4735_v6 = vadd.f32 %v4734_v29, %v4733_v17  ;;  %v4844_v50 = vadd.f32 %v4843_v35, %v4842_v39  ;;  %v4845_v32 = vpop.f32.mrb[10].mxu1 }
 0x11f   : > { %1768 = vmatmul.mubr.bf16.gmra.mrb[116].mxu0 %v8822_v25  ;;  %v4846_v18 = vpop.f32.mrb[11].mxu1 }
 0x120   : > { %1775 = vmatprep.mubr.bf16.mxu0 %v6865_v42  ;;  %v4847_v40 = vadd.f32 %v4846_v18, %v4845_v32  ;;  %v6959_v57 = vadd.f32 %v4844_v50, %v4732_v38 }
 0x121   : > { %1929 = vmatmul.mubr.bf16.gmra.mrb[116].mxu1 %v6821_v4 }
 0x122   : > { %v4736_v58 = vpop.f32.mrb[12].mxu0  ;;  %1936 = vmatprep.mubr.bf16.mxu1 %v6859_v21  ;;  %v6963_v51 = vadd.f32 %v4847_v40, %v4735_v6 }
 0x123   : > { %v4737_v36 = vpop.f32.mrb[13].mxu0 }
 0x124   : > { %v4738_v63 = vadd.f32 %v4737_v36, %v4736_v58  ;;  %v4739_v19 = vpop.f32.mrb[14].mxu0  ;;  %v4848_v30 = vpop.f32.mrb[12].mxu1 }
 0x125   : > { %v4740_v56 = vpop.f32.mrb[15].mxu0  ;;  %v4849_v7 = vpop.f32.mrb[13].mxu1 }
 0x126   : > { %v4741_v33 = vadd.f32 %v4740_v56, %v4739_v19  ;;  %v4850_v44 = vadd.f32 %v4849_v7, %v4848_v30  ;;  %v4851_v11 = vpop.f32.mrb[14].mxu1 }
 0x127   : > { %1776 = vmatmul.mubr.bf16.gmra.mrb[120].mxu0 %v6846_v45  ;;  %v4852_v20 = vpop.f32.mrb[15].mxu1 }
 0x128   : > { %1783 = vmatprep.mubr.bf16.mxu0 %v6870_v52  ;;  %v4853_v41 = vadd.f32 %v4852_v20, %v4851_v11  ;;  %v6967_v53 = vadd.f32 %v4850_v44, %v4738_v63 }
 0x129   : > { %1937 = vmatmul.mubr.bf16.gmra.mrb[120].mxu1 %v6854_v10 }
 0x12a   : > { %v4742_v31 = vpop.f32.mrb[16].mxu0  ;;  %1944 = vmatprep.mubr.bf16.mxu1 %v6846_v45  ;;  %v6971_v0 = vadd.f32 %v4853_v41, %v4741_v33 }
 0x12b   : > { %v4743_v60 = vpop.f32.mrb[17].mxu0 }
 0x12c   : > { %v4744_v25 = vadd.f32 %v4743_v60, %v4742_v31  ;;  %v4745_v26 = vpop.f32.mrb[18].mxu0  ;;  %v4854_v37 = vpop.f32.mrb[16].mxu1 }
 0x12d   : > { %v4746_v16 = vpop.f32.mrb[19].mxu0  ;;  %v4855_v1 = vpop.f32.mrb[17].mxu1 }
 0x12e   : > { %v4747_v3 = vadd.f32 %v4746_v16, %v4745_v26  ;;  %v4856_v46 = vadd.f32 %v4855_v1, %v4854_v37  ;;  %v4857_v55 = vpop.f32.mrb[18].mxu1 }
 0x12f   : > { %1784 = vmatmul.mubr.bf16.gmra.mrb[124].mxu0 %v6859_v21  ;;  %v4858_v14 = vpop.f32.mrb[19].mxu1 }
 0x130   : > { %5662 = vmatprep.mubr.bf16.mxu0 %v6233_v13  ;;  %v4859_v10 = vadd.f32 %v4858_v14, %v4857_v55  ;;  %v6975_v34 = vadd.f32 %v4856_v46, %v4744_v25 }
 0x131   : > { %1945 = vmatmul.mubr.bf16.gmra.mrb[124].mxu1 %v6821_v4 }
 0x132   : > { %v4748_v45 = vpop.f32.mrb[20].mxu0  ;;  %v6978_v54 = vadd.f32 %v4859_v10, %v4747_v3 }
 0x133   : > { %v4749_v2 = vpop.f32.mrb[21].mxu0 }
 0x134   : > { %v4750_v49 = vadd.f32 %v4749_v2, %v4748_v45  ;;  %v4751_v38 = vpop.f32.mrb[22].mxu0  ;;  %v4860_v17 = vpop.f32.mrb[20].mxu1 }
 0x135   : > { %v4752_v39 = vpop.f32.mrb[23].mxu0  ;;  %v4861_v29 = vpop.f32.mrb[21].mxu1 }
 0x136   : > { %v4753_v35 = vadd.f32 %v4752_v39, %v4751_v38  ;;  %v4862_v6 = vadd.f32 %v4861_v29, %v4860_v17  ;;  %v4863_v21 = vpop.f32.mrb[22].mxu1 }
 0x137   : > { %5663 = vmatmul.mubr.bf16.vlgmr.msra.gmra.mrb[128].mxu0 %v6359_v27  ;;  %v4864_v13 = vpop.f32.mrb[23].mxu1 }
 0x138   : > { %5666 = vmatprep.mubr.bf16.mxu0 %v6402_v61  ;;  %v4865_v50 = vadd.f32 %v4864_v13, %v4863_v21  ;;  %v6982_v32 = vadd.f32 %v4862_v6, %v4750_v49 }
 0x13a   : > { %v4754_v4 = vpop.f32.mrb[24].mxu0  ;;  %v6984_v40 = vadd.f32 %v4865_v50, %v4753_v35 }
 0x13b   : > { %v4755_v18 = vpop.f32.mrb[25].mxu0 }
 0x13c   : > { %v4756_v58 = vadd.f32 %v4755_v18, %v4754_v4  ;;  %v4757_v36 = vpop.f32.mrb[26].mxu0  ;;  %v4866_v63 = vpop.f32.mrb[24].mxu1 }
 0x13d   : > { %v4758_v19 = vpop.f32.mrb[27].mxu0  ;;  %v4867_v30 = vpop.f32.mrb[25].mxu1 }
 0x13e   : > { %v4759_v56 = vadd.f32 %v4758_v19, %v4757_v36  ;;  %v4868_v7 = vadd.f32 %v4867_v30, %v4866_v63  ;;  %v4869_v33 = vpop.f32.mrb[26].mxu1 }
 0x13f   : > { %5667 = vmatmul.mubr.bf16.gmra.mrb[132].mxu0 %v6454_v43  ;;  %v4870_v27 = vpop.f32.mrb[27].mxu1 }
 0x140   : > { %5670 = vmatprep.mubr.bf16.mxu0 %v6463_v48  ;;  %v4871_v61 = vadd.f32 %v4870_v27, %v4869_v33  ;;  %v6988_v44 = vadd.f32 %v4868_v7, %v4756_v58 }
 0x142   : > { %v4760_v11 = vpop.f32.mrb[28].mxu0  ;;  %v6990_v41 = vadd.f32 %v4871_v61, %v4759_v56 }
 0x143   : > { %v4761_v20 = vpop.f32.mrb[29].mxu0 }
 0x144   : > { %v4762_v31 = vadd.f32 %v4761_v20, %v4760_v11  ;;  %v4763_v60 = vpop.f32.mrb[30].mxu0  ;;  %v4872_v25 = vpop.f32.mrb[28].mxu1 }
 0x145   : > { %v4764_v26 = vpop.f32.mrb[31].mxu0  ;;  %v4873_v37 = vpop.f32.mrb[29].mxu1 }
 0x146   : > { %v4765_v16 = vadd.f32 %v4764_v26, %v4763_v60  ;;  %v4874_v1 = vadd.f32 %v4873_v37, %v4872_v25  ;;  %v4875_v3 = vpop.f32.mrb[30].mxu1 }
 0x147   : > { %5671 = vmatmul.mubr.bf16.gmra.mrb[136].mxu0 %v6542_v62  ;;  %v4876_v43 = vpop.f32.mrb[31].mxu1 }
 0x148   : > { %5674 = vmatprep.mubr.bf16.mxu0 %v6626_v8  ;;  %v4877_v48 = vadd.f32 %v4876_v43, %v4875_v3  ;;  %v6994_v46 = vadd.f32 %v4874_v1, %v4762_v31 }
 0x14a   : > { %v4766_v55 = vpop.f32.mrb[32].mxu0  ;;  %v6996_v10 = vadd.f32 %v4877_v48, %v4765_v16 }
 0x14b   : > { %v4767_v14 = vpop.f32.mrb[33].mxu0 }
 0x14c   : > { %v4768_v45 = vadd.f32 %v4767_v14, %v4766_v55  ;;  %v4769_v2 = vpop.f32.mrb[34].mxu0  ;;  %v4878_v49 = vpop.f32.mrb[32].mxu1 }
 0x14d   : > { %v4770_v38 = vpop.f32.mrb[35].mxu0  ;;  %v4879_v17 = vpop.f32.mrb[33].mxu1 }
 0x14e   : > { %v4771_v39 = vadd.f32 %v4770_v38, %v4769_v2  ;;  %v4880_v29 = vadd.f32 %v4879_v17, %v4878_v49  ;;  %v4881_v35 = vpop.f32.mrb[34].mxu1 }
 0x14f   : > { %5675 = vmatmul.mubr.bf16.gmra.mrb[140].mxu0 %v6687_v5  ;;  %v4882_v62 = vpop.f32.mrb[35].mxu1 }
 0x150   : > { %5678 = vmatprep.mubr.bf16.mxu0 %v6720_v15  ;;  %v7000_v8 = vadd.f32 %v4880_v29, %v4768_v45  ;;  %v4883_v6 = vadd.f32 %v4882_v62, %v4881_v35 }
 0x152   : > { %v4772_v21 = vpop.f32.mrb[36].mxu0  ;;  %v7002_v13 = vadd.f32 %v4883_v6, %v4771_v39 }
 0x153   : > { %v4773_v50 = vpop.f32.mrb[37].mxu0 }
 0x154   : > { %v4774_v4 = vadd.f32 %v4773_v50, %v4772_v21  ;;  %v4775_v18 = vpop.f32.mrb[38].mxu0  ;;  %v4884_v58 = vpop.f32.mrb[36].mxu1 }
 0x155   : > { %v4776_v36 = vpop.f32.mrb[39].mxu0  ;;  %v4885_v63 = vpop.f32.mrb[37].mxu1 }
 0x156   : > { %v4777_v19 = vadd.f32 %v4776_v36, %v4775_v18  ;;  %v4886_v30 = vadd.f32 %v4885_v63, %v4884_v58  ;;  %v4887_v56 = vpop.f32.mrb[38].mxu1 }
 0x157   : > { %5679 = vmatmul.mubr.bf16.gmra.mrb[144].mxu0 %v6752_v9  ;;  %v4888_v5 = vpop.f32.mrb[39].mxu1 }
 0x158   : > { %5682 = vmatprep.mubr.bf16.mxu0 %v6783_v23  ;;  %v7006_v15 = vadd.f32 %v4886_v30, %v4774_v4  ;;  %v4889_v7 = vadd.f32 %v4888_v5, %v4887_v56 }
 0x15a   : > { %v4778_v33 = vpop.f32.mrb[40].mxu0  ;;  %v7008_v27 = vadd.f32 %v4889_v7, %v4777_v19 }
 0x15b   : > { %v4779_v61 = vpop.f32.mrb[41].mxu0 }
 0x15c   : > { %v4780_v11 = vadd.f32 %v4779_v61, %v4778_v33  ;;  %v4781_v20 = vpop.f32.mrb[42].mxu0  ;;  %v4890_v31 = vpop.f32.mrb[40].mxu1 }
 0x15d   : > { %v4782_v60 = vpop.f32.mrb[43].mxu0  ;;  %v4891_v25 = vpop.f32.mrb[41].mxu1 }
 0x15e   : > { %v4783_v26 = vadd.f32 %v4782_v60, %v4781_v20  ;;  %v4892_v37 = vadd.f32 %v4891_v25, %v4890_v31  ;;  %v4893_v16 = vpop.f32.mrb[42].mxu1 }
 0x15f   : > { %5683 = vmatmul.mubr.bf16.gmra.mrb[148].mxu0 %v6816_v59  ;;  %v4894_v9 = vpop.f32.mrb[43].mxu1 }
 0x160   : > { %5686 = vmatprep.mubr.bf16.mxu0 %v6849_v24  ;;  %v7012_v23 = vadd.f32 %v4892_v37, %v4780_v11  ;;  %v4895_v1 = vadd.f32 %v4894_v9, %v4893_v16 }
 0x162   : > { %v4784_v3 = vpop.f32.mrb[44].mxu0  ;;  %v7014_v43 = vadd.f32 %v4895_v1, %v4783_v26 }
 0x163   : > { %v4785_v48 = vpop.f32.mrb[45].mxu0 }
 0x164   : > { %v4786_v55 = vadd.f32 %v4785_v48, %v4784_v3  ;;  %v4787_v14 = vpop.f32.mrb[46].mxu0  ;;  %v4896_v45 = vpop.f32.mrb[44].mxu1 }
 0x165   : > { %v4788_v2 = vpop.f32.mrb[47].mxu0  ;;  %v4897_v49 = vpop.f32.mrb[45].mxu1 }
 0x166   : > { %v4789_v38 = vadd.f32 %v4788_v2, %v4787_v14  ;;  %v4898_v17 = vadd.f32 %v4897_v49, %v4896_v45  ;;  %v4899_v39 = vpop.f32.mrb[46].mxu1 }
 0x167   : > { %5687 = vmatmul.mubr.bf16.gmra.mrb[152].mxu0 %v6865_v42  ;;  %v4900_v59 = vpop.f32.mrb[47].mxu1 }
 0x168   : > { %5690 = vmatprep.mubr.bf16.mxu0 %v6870_v52  ;;  %v7018_v24 = vadd.f32 %v4898_v17, %v4786_v55  ;;  %v4901_v29 = vadd.f32 %v4900_v59, %v4899_v39 }
 0x16a   : > { %v4790_v35 = vpop.f32.mrb[48].mxu0  ;;  %v7020_v62 = vadd.f32 %v4901_v29, %v4789_v38 }
 0x16b   : > { %v4791_v6 = vpop.f32.mrb[49].mxu0 }
 0x16c   : > { %v4792_v21 = vadd.f32 %v4791_v6, %v4790_v35  ;;  %v4793_v50 = vpop.f32.mrb[50].mxu0  ;;  %v4902_v4 = vpop.f32.mrb[48].mxu1 }
 0x16d   : > { %v4794_v18 = vpop.f32.mrb[51].mxu0  ;;  %v4903_v58 = vpop.f32.mrb[49].mxu1 }
 0x16e   : > { %v4795_v36 = vadd.f32 %v4794_v18, %v4793_v50  ;;  %v4904_v63 = vadd.f32 %v4903_v58, %v4902_v4  ;;  %v4905_v19 = vpop.f32.mrb[50].mxu1 }
 0x16f   : > { %5691 = vmatmul.mubr.bf16.gmra.mrb[156].mxu0 %v6865_v42  ;;  %v4906_v30 = vpop.f32.mrb[51].mxu1 }
 0x170   : > { %v7023_v56 = vadd.f32 %v4904_v63, %v4792_v21  ;;  %v4907_v52 = vadd.f32 %v4906_v30, %v4905_v19 }
 0x172   : > { %v4796_v5 = vpop.f32.mrb[52].mxu0  ;;  %v7025_v7 = vadd.f32 %v4907_v52, %v4795_v36 }
 0x173   : > { %v4797_v33 = vpop.f32.mrb[53].mxu0 }
 0x174   : > { %v4798_v61 = vadd.f32 %v4797_v33, %v4796_v5  ;;  %v4799_v11 = vpop.f32.mrb[54].mxu0  ;;  %v4908_v20 = vpop.f32.mrb[52].mxu1 }
 0x175   : > { %v4800_v31 = vpop.f32.mrb[55].mxu0  ;;  %v4909_v60 = vpop.f32.mrb[53].mxu1 }
 0x176   : > { %v4801_v25 = vadd.f32 %v4800_v31, %v4799_v11  ;;  %v4910_v26 = vadd.f32 %v4909_v60, %v4908_v20  ;;  %v4911_v37 = vpop.f32.mrb[54].mxu1 }
 0x177   : > { %v4912_v16 = vpop.f32.mrb[55].mxu1 }
 0x178   : > { %v7027_v9 = vadd.f32 %v4910_v26, %v4798_v61  ;;  %v4913_v42 = vadd.f32 %v4912_v16, %v4911_v37 }
 0x17a   : > { %v4802_v1 = vpop.f32.mrb[56].mxu0  ;;  %v7029_v3 = vadd.f32 %v4913_v42, %v4801_v25 }
 0x17b   : > { %v4803_v48 = vpop.f32.mrb[57].mxu0 }
 0x17c   : > { %v4804_v55 = vadd.f32 %v4803_v48, %v4802_v1  ;;  %v4805_v14 = vpop.f32.mrb[58].mxu0  ;;  %v4914_v45 = vpop.f32.mrb[56].mxu1 }
 0x17d   : > { %v4806_v2 = vpop.f32.mrb[59].mxu0  ;;  %v4915_v49 = vpop.f32.mrb[57].mxu1 }
 0x17e   : > { %v4807_v38 = vadd.f32 %v4806_v2, %v4805_v14  ;;  %v4916_v17 = vadd.f32 %v4915_v49, %v4914_v45  ;;  %v4917_v39 = vpop.f32.mrb[58].mxu1 }
 0x17f   : > { %v4918_v59 = vpop.f32.mrb[59].mxu1 }
 0x180   : > { %v7031_v29 = vadd.f32 %v4916_v17, %v4804_v55  ;;  %v4919_v35 = vadd.f32 %v4918_v59, %v4917_v39 }
 0x182   : > { %v4808_v6 = vpop.f32.mrb[60].mxu0  ;;  %v7033_v21 = vadd.f32 %v4919_v35, %v4807_v38 }
 0x183   : > { %v4809_v50 = vpop.f32.mrb[61].mxu0 }
 0x184   : > { %v4810_v4 = vadd.f32 %v4809_v50, %v4808_v6  ;;  %v4811_v18 = vpop.f32.mrb[62].mxu0  ;;  %v4920_v58 = vpop.f32.mrb[60].mxu1 }
 0x185   : > { %v4812_v36 = vpop.f32.mrb[63].mxu0  ;;  %v4921_v63 = vpop.f32.mrb[61].mxu1 }
 0x186   : > { %v4813_v19 = vadd.f32 %v4812_v36, %v4811_v18  ;;  %v4922_v30 = vadd.f32 %v4921_v63, %v4920_v58  ;;  %v4923_v52 = vpop.f32.mrb[62].mxu1 }
 0x187   : > { %v4924_v5 = vpop.f32.mrb[63].mxu1 }
 0x188   : > { %v7035_v33 = vadd.f32 %v4922_v30, %v4810_v4  ;;  %v4925_v61 = vadd.f32 %v4924_v5, %v4923_v52 }
 0x18a   : > { %v4942_v11 = vpop.f32.mrb[64].mxu0  ;;  %v7037_v20 = vadd.f32 %v4925_v61, %v4813_v19 }
 0x18b   : > { %v4943_v31 = vpop.f32.mrb[65].mxu0 }
 0x18c   : > { %v4944_v60 = vadd.f32 %v4943_v31, %v4942_v11  ;;  %v4945_v25 = vpop.f32.mrb[66].mxu0  ;;  %v5054_v26 = vpop.f32.mrb[64].mxu1 }
 0x18d   : > { %v4946_v37 = vpop.f32.mrb[67].mxu0  ;;  %v5055_v1 = vpop.f32.mrb[65].mxu1 }
 0x18e   : > { %v1666_v16 = vadd.f32 %v4944_v60, %v6943_v22  ;;  %v4947_v42 = vadd.f32 %v4946_v37, %v4945_v25  ;;  %v5056_v48 = vadd.f32 %v5055_v1, %v5054_v26  ;;  %v5057_v55 = vpop.f32.mrb[66].mxu1 }
 0x18f   : > { %v5058_v45 = vpop.f32.mrb[67].mxu1 }
 0x190   : > { %v1669_v14 = vadd.f32 %v4947_v42, %v6947_v47  ;;  %v5059_v2 = vadd.f32 %v5058_v45, %v5057_v55  ;;  %v7041_v49 = vadd.f32 %v5056_v48, %v1666_v16 }
 0x192   : > { %v4948_v38 = vpop.f32.mrb[68].mxu0  ;;  %v7043_v39 = vadd.f32 %v5059_v2, %v1669_v14 }
 0x193   : > { %v4949_v17 = vpop.f32.mrb[69].mxu0 }
 0x194   : > { %v4950_v59 = vadd.f32 %v4949_v17, %v4948_v38  ;;  %v4951_v35 = vpop.f32.mrb[70].mxu0  ;;  %v5060_v6 = vpop.f32.mrb[68].mxu1 }
 0x195   : > { %v4952_v50 = vpop.f32.mrb[71].mxu0  ;;  %v5061_v18 = vpop.f32.mrb[69].mxu1 }
 0x196   : > { %v1674_v22 = vadd.f32 %v4950_v59, %v6951_v28  ;;  %v4953_v4 = vadd.f32 %v4952_v50, %v4951_v35  ;;  %v5062_v58 = vadd.f32 %v5061_v18, %v5060_v6  ;;  %v5063_v36 = vpop.f32.mrb[70].mxu1 }
 0x197   : > { %v5064_v63 = vpop.f32.mrb[71].mxu1 }
 0x198   : > { %v1677_v47 = vadd.f32 %v4953_v4, %v6955_v12  ;;  %v5065_v19 = vadd.f32 %v5064_v63, %v5063_v36  ;;  %v7047_v30 = vadd.f32 %v5062_v58, %v1674_v22 }
 0x19a   : > { %v4954_v52 = vpop.f32.mrb[72].mxu0  ;;  %v7049_v61 = vadd.f32 %v5065_v19, %v1677_v47 }
 0x19b   : > { %v4955_v5 = vpop.f32.mrb[73].mxu0 }
 0x19c   : > { %v4956_v11 = vadd.f32 %v4955_v5, %v4954_v52  ;;  %v4957_v31 = vpop.f32.mrb[74].mxu0  ;;  %v5066_v60 = vpop.f32.mrb[72].mxu1 }
 0x19d   : > { %v4958_v25 = vpop.f32.mrb[75].mxu0  ;;  %v5067_v37 = vpop.f32.mrb[73].mxu1 }
 0x19e   : > { %v1682_v28 = vadd.f32 %v4956_v11, %v6959_v57  ;;  %v4959_v26 = vadd.f32 %v4958_v25, %v4957_v31  ;;  %v5068_v16 = vadd.f32 %v5067_v37, %v5066_v60  ;;  %v5069_v42 = vpop.f32.mrb[74].mxu1 }
 0x19f   : > { %v5070_v1 = vpop.f32.mrb[75].mxu1 }
 0x1a0   : > { %v1685_v12 = vadd.f32 %v4959_v26, %v6963_v51  ;;  %v5071_v48 = vadd.f32 %v5070_v1, %v5069_v42  ;;  %v7053_v55 = vadd.f32 %v5068_v16, %v1682_v28 }
 0x1a2   : > { %v4960_v14 = vpop.f32.mrb[76].mxu0  ;;  %v7055_v2 = vadd.f32 %v5071_v48, %v1685_v12 }
 0x1a3   : > { %v4961_v45 = vpop.f32.mrb[77].mxu0 }
 0x1a4   : > { %v4962_v38 = vadd.f32 %v4961_v45, %v4960_v14  ;;  %v4963_v17 = vpop.f32.mrb[78].mxu0  ;;  %v5072_v59 = vpop.f32.mrb[76].mxu1 }
 0x1a5   : > { %v4964_v35 = vpop.f32.mrb[79].mxu0  ;;  %v5073_v50 = vpop.f32.mrb[77].mxu1 }
 0x1a6   : > { %v1690_v57 = vadd.f32 %v4962_v38, %v6967_v53  ;;  %v4965_v6 = vadd.f32 %v4964_v35, %v4963_v17  ;;  %v5074_v22 = vadd.f32 %v5073_v50, %v5072_v59  ;;  %v5075_v4 = vpop.f32.mrb[78].mxu1 }
 0x1a7   : > { %v5076_v18 = vpop.f32.mrb[79].mxu1 }
 0x1a8   : > { %v1693_v51 = vadd.f32 %v4965_v6, %v6971_v0  ;;  %v5077_v58 = vadd.f32 %v5076_v18, %v5075_v4  ;;  %v7059_v36 = vadd.f32 %v5074_v22, %v1690_v57 }
 0x1aa   : > { %v4966_v47 = vpop.f32.mrb[80].mxu0  ;;  %v7061_v19 = vadd.f32 %v5077_v58, %v1693_v51 }
 0x1ab   : > { %v4967_v63 = vpop.f32.mrb[81].mxu0 }
 0x1ac   : > { %v4968_v52 = vadd.f32 %v4967_v63, %v4966_v47  ;;  %v4969_v5 = vpop.f32.mrb[82].mxu0  ;;  %v5078_v11 = vpop.f32.mrb[80].mxu1 }
 0x1ad   : > { %v4970_v31 = vpop.f32.mrb[83].mxu0  ;;  %v5079_v25 = vpop.f32.mrb[81].mxu1 }
 0x1ae   : > { %v1698_v53 = vadd.f32 %v4968_v52, %v6975_v34  ;;  %v4971_v60 = vadd.f32 %v4970_v31, %v4969_v5  ;;  %v5080_v28 = vadd.f32 %v5079_v25, %v5078_v11  ;;  %v5081_v26 = vpop.f32.mrb[82].mxu1 }
 0x1af   : > { %v5082_v37 = vpop.f32.mrb[83].mxu1 }
 0x1b0   : > { %v1701_v0 = vadd.f32 %v4971_v60, %v6978_v54  ;;  %v5083_v16 = vadd.f32 %v5082_v37, %v5081_v26  ;;  %v7065_v42 = vadd.f32 %v5080_v28, %v1698_v53 }
 0x1b2   : > { %v4972_v12 = vpop.f32.mrb[84].mxu0  ;;  %v7067_v48 = vadd.f32 %v5083_v16, %v1701_v0 }
 0x1b3   : > { %v4973_v1 = vpop.f32.mrb[85].mxu0 }
 0x1b4   : > { %v4974_v14 = vadd.f32 %v4973_v1, %v4972_v12  ;;  %v4975_v45 = vpop.f32.mrb[86].mxu0  ;;  %v5084_v38 = vpop.f32.mrb[84].mxu1 }
 0x1b5   : > { %v4976_v17 = vpop.f32.mrb[87].mxu0  ;;  %v5085_v35 = vpop.f32.mrb[85].mxu1 }
 0x1b6   : > { %v1706_v34 = vadd.f32 %v4974_v14, %v6982_v32  ;;  %v4977_v59 = vadd.f32 %v4976_v17, %v4975_v45  ;;  %v5086_v57 = vadd.f32 %v5085_v35, %v5084_v38  ;;  %v5087_v6 = vpop.f32.mrb[86].mxu1 }
 0x1b7   : > { %v5088_v50 = vpop.f32.mrb[87].mxu1 }
 0x1b8   : > { %v1709_v54 = vadd.f32 %v4977_v59, %v6984_v40  ;;  %v5089_v22 = vadd.f32 %v5088_v50, %v5087_v6  ;;  %v7071_v4 = vadd.f32 %v5086_v57, %v1706_v34 }
 0x1ba   : > { %v4978_v51 = vpop.f32.mrb[88].mxu0  ;;  %v7073_v58 = vadd.f32 %v5089_v22, %v1709_v54 }
 0x1bb   : > { %v4979_v18 = vpop.f32.mrb[89].mxu0 }
 0x1bc   : > { %v4980_v47 = vadd.f32 %v4979_v18, %v4978_v51  ;;  %v4981_v63 = vpop.f32.mrb[90].mxu0  ;;  %v5090_v52 = vpop.f32.mrb[88].mxu1 }
 0x1bd   : > { %v4982_v5 = vpop.f32.mrb[91].mxu0  ;;  %v5091_v31 = vpop.f32.mrb[89].mxu1 }
 0x1be   : > { %v1714_v32 = vadd.f32 %v4980_v47, %v6988_v44  ;;  %v4983_v11 = vadd.f32 %v4982_v5, %v4981_v63  ;;  %v5092_v53 = vadd.f32 %v5091_v31, %v5090_v52  ;;  %v5093_v60 = vpop.f32.mrb[90].mxu1 }
 0x1bf   : > { %v5094_v25 = vpop.f32.mrb[91].mxu1 }
 0x1c0   : > { %v1717_v40 = vadd.f32 %v4983_v11, %v6990_v41  ;;  %v5095_v28 = vadd.f32 %v5094_v25, %v5093_v60  ;;  %v7077_v26 = vadd.f32 %v5092_v53, %v1714_v32 }
 0x1c2   : > { %v4984_v0 = vpop.f32.mrb[92].mxu0  ;;  %v7079_v16 = vadd.f32 %v5095_v28, %v1717_v40 }
 0x1c3   : > { %v4985_v37 = vpop.f32.mrb[93].mxu0 }
 0x1c4   : > { %v4986_v12 = vadd.f32 %v4985_v37, %v4984_v0  ;;  %v4987_v1 = vpop.f32.mrb[94].mxu0  ;;  %v5096_v14 = vpop.f32.mrb[92].mxu1 }
 0x1c5   : > { %v4988_v45 = vpop.f32.mrb[95].mxu0  ;;  %v5097_v17 = vpop.f32.mrb[93].mxu1 }
 0x1c6   : > { %v1722_v44 = vadd.f32 %v4986_v12, %v6994_v46  ;;  %v4989_v38 = vadd.f32 %v4988_v45, %v4987_v1  ;;  %v5098_v34 = vadd.f32 %v5097_v17, %v5096_v14  ;;  %v5099_v59 = vpop.f32.mrb[94].mxu1 }
 0x1c7   : > { %v5100_v35 = vpop.f32.mrb[95].mxu1 }
 0x1c8   : > { %v1725_v41 = vadd.f32 %v4989_v38, %v6996_v10  ;;  %v5101_v57 = vadd.f32 %v5100_v35, %v5099_v59  ;;  %v7083_v6 = vadd.f32 %v5098_v34, %v1722_v44 }
 0x1ca   : > { %v4990_v54 = vpop.f32.mrb[96].mxu0  ;;  %v7085_v22 = vadd.f32 %v5101_v57, %v1725_v41 }
 0x1cb   : > { %v4991_v50 = vpop.f32.mrb[97].mxu0 }
 0x1cc   : > { %v4992_v51 = vadd.f32 %v4991_v50, %v4990_v54  ;;  %v4993_v18 = vpop.f32.mrb[98].mxu0  ;;  %v5102_v47 = vpop.f32.mrb[96].mxu1 }
 0x1cd   : > { %v4994_v63 = vpop.f32.mrb[99].mxu0  ;;  %v5103_v5 = vpop.f32.mrb[97].mxu1 }
 0x1ce   : > { %v1730_v46 = vadd.f32 %v4992_v51, %v7000_v8  ;;  %v4995_v52 = vadd.f32 %v4994_v63, %v4993_v18  ;;  %v5104_v32 = vadd.f32 %v5103_v5, %v5102_v47  ;;  %v5105_v11 = vpop.f32.mrb[98].mxu1 }
 0x1cf   : > { %v5106_v31 = vpop.f32.mrb[99].mxu1 }
 0x1d0   : > { %v1733_v10 = vadd.f32 %v4995_v52, %v7002_v13  ;;  %v5107_v53 = vadd.f32 %v5106_v31, %v5105_v11  ;;  %v7089_v60 = vadd.f32 %v5104_v32, %v1730_v46 }
 0x1d2   : > { %v4996_v40 = vpop.f32.mrb[100].mxu0  ;;  %v7091_v28 = vadd.f32 %v5107_v53, %v1733_v10 }
 0x1d3   : > { %v4997_v25 = vpop.f32.mrb[101].mxu0 }
 0x1d4   : > { %v4998_v0 = vadd.f32 %v4997_v25, %v4996_v40  ;;  %v4999_v37 = vpop.f32.mrb[102].mxu0  ;;  %v5108_v12 = vpop.f32.mrb[100].mxu1 }
 0x1d5   : > { %v5000_v1 = vpop.f32.mrb[103].mxu0  ;;  %v5109_v45 = vpop.f32.mrb[101].mxu1 }
 0x1d6   : > { %v1738_v8 = vadd.f32 %v4998_v0, %v7006_v15  ;;  %v5001_v14 = vadd.f32 %v5000_v1, %v4999_v37  ;;  %v5110_v44 = vadd.f32 %v5109_v45, %v5108_v12  ;;  %v5111_v38 = vpop.f32.mrb[102].mxu1 }
 0x1d7   : > { %v5112_v17 = vpop.f32.mrb[103].mxu1 }
 0x1d8   : > { %v1741_v13 = vadd.f32 %v5001_v14, %v7008_v27  ;;  %v5113_v34 = vadd.f32 %v5112_v17, %v5111_v38  ;;  %v7095_v59 = vadd.f32 %v5110_v44, %v1738_v8 }
 0x1da   : > { %v5002_v41 = vpop.f32.mrb[104].mxu0  ;;  %v7097_v57 = vadd.f32 %v5113_v34, %v1741_v13 }
 0x1db   : > { %v5003_v35 = vpop.f32.mrb[105].mxu0 }
 0x1dc   : > { %v5004_v54 = vadd.f32 %v5003_v35, %v5002_v41  ;;  %v5005_v50 = vpop.f32.mrb[106].mxu0  ;;  %v5114_v51 = vpop.f32.mrb[104].mxu1 }
 0x1dd   : > { %v5006_v18 = vpop.f32.mrb[107].mxu0  ;;  %v5115_v63 = vpop.f32.mrb[105].mxu1 }
 0x1de   : > { %v1746_v15 = vadd.f32 %v5004_v54, %v7012_v23  ;;  %v5007_v47 = vadd.f32 %v5006_v18, %v5005_v50  ;;  %v5116_v46 = vadd.f32 %v5115_v63, %v5114_v51  ;;  %v5117_v52 = vpop.f32.mrb[106].mxu1 }
 0x1df   : > { %v5118_v5 = vpop.f32.mrb[107].mxu1 }
 0x1e0   : > { %v1749_v27 = vadd.f32 %v5007_v47, %v7014_v43  ;;  %v5119_v32 = vadd.f32 %v5118_v5, %v5117_v52  ;;  %v7101_v11 = vadd.f32 %v5116_v46, %v1746_v15 }
 0x1e2   : > { %v5008_v10 = vpop.f32.mrb[108].mxu0  ;;  %v7103_v53 = vadd.f32 %v5119_v32, %v1749_v27 }
 0x1e3   : > { %v5009_v31 = vpop.f32.mrb[109].mxu0 }
 0x1e4   : > { %v5010_v40 = vadd.f32 %v5009_v31, %v5008_v10  ;;  %v5011_v25 = vpop.f32.mrb[110].mxu0  ;;  %v5120_v0 = vpop.f32.mrb[108].mxu1 }
 0x1e5   : > { %v5012_v37 = vpop.f32.mrb[111].mxu0  ;;  %v5121_v1 = vpop.f32.mrb[109].mxu1 }
 0x1e6   : > { %v1754_v23 = vadd.f32 %v5010_v40, %v7018_v24  ;;  %v5013_v12 = vadd.f32 %v5012_v37, %v5011_v25  ;;  %v5122_v8 = vadd.f32 %v5121_v1, %v5120_v0  ;;  %v5123_v14 = vpop.f32.mrb[110].mxu1 }
 0x1e7   : > { %v5124_v45 = vpop.f32.mrb[111].mxu1 }
 0x1e8   : > { %v1757_v43 = vadd.f32 %v5013_v12, %v7020_v62  ;;  %v5125_v44 = vadd.f32 %v5124_v45, %v5123_v14  ;;  %v7107_v38 = vadd.f32 %v5122_v8, %v1754_v23 }
 0x1ea   : > { %v5014_v13 = vpop.f32.mrb[112].mxu0  ;;  %v7109_v34 = vadd.f32 %v5125_v44, %v1757_v43 }
 0x1eb   : > { %v5015_v17 = vpop.f32.mrb[113].mxu0 }
 0x1ec   : > { %v5016_v41 = vadd.f32 %v5015_v17, %v5014_v13  ;;  %v5017_v35 = vpop.f32.mrb[114].mxu0  ;;  %v5126_v54 = vpop.f32.mrb[112].mxu1 }
 0x1ed   : > { %v5018_v50 = vpop.f32.mrb[115].mxu0  ;;  %v5127_v18 = vpop.f32.mrb[113].mxu1 }
 0x1ee   : > { %v1762_v24 = vadd.f32 %v5016_v41, %v7023_v56  ;;  %v5019_v51 = vadd.f32 %v5018_v50, %v5017_v35  ;;  %v5128_v15 = vadd.f32 %v5127_v18, %v5126_v54  ;;  %v5129_v47 = vpop.f32.mrb[114].mxu1 }
 0x1ef   : > { %v5130_v63 = vpop.f32.mrb[115].mxu1 }
 0x1f0   : > { %v1765_v62 = vadd.f32 %v5019_v51, %v7025_v7  ;;  %v5131_v46 = vadd.f32 %v5130_v63, %v5129_v47  ;;  %v7113_v52 = vadd.f32 %v5128_v15, %v1762_v24 }
 0x1f2   : > { %v5020_v27 = vpop.f32.mrb[116].mxu0  ;;  %v7115_v32 = vadd.f32 %v5131_v46, %v1765_v62 }
 0x1f3   : > { %v5021_v5 = vpop.f32.mrb[117].mxu0 }
 0x1f4   : > { %v5022_v10 = vadd.f32 %v5021_v5, %v5020_v27  ;;  %v5023_v31 = vpop.f32.mrb[118].mxu0  ;;  %v5132_v40 = vpop.f32.mrb[116].mxu1 }
 0x1f5   : > { %v5024_v25 = vpop.f32.mrb[119].mxu0  ;;  %v5133_v37 = vpop.f32.mrb[117].mxu1 }
 0x1f6   : > { %v1770_v56 = vadd.f32 %v5022_v10, %v7027_v9  ;;  %v5025_v0 = vadd.f32 %v5024_v25, %v5023_v31  ;;  %v5134_v23 = vadd.f32 %v5133_v37, %v5132_v40  ;;  %v5135_v12 = vpop.f32.mrb[118].mxu1 }
 0x1f7   : > { %v5136_v1 = vpop.f32.mrb[119].mxu1 }
 0x1f8   : > { %v1773_v7 = vadd.f32 %v5025_v0, %v7029_v3  ;;  %v5137_v8 = vadd.f32 %v5136_v1, %v5135_v12  ;;  %v7119_v14 = vadd.f32 %v5134_v23, %v1770_v56 }
 0x1fa   : > { %v5026_v43 = vpop.f32.mrb[120].mxu0  ;;  %v7121_v44 = vadd.f32 %v5137_v8, %v1773_v7 }
 0x1fb   : > { %v5027_v45 = vpop.f32.mrb[121].mxu0 }
 0x1fc   : > { %v5028_v13 = vadd.f32 %v5027_v45, %v5026_v43  ;;  %v5029_v17 = vpop.f32.mrb[122].mxu0  ;;  %v5138_v41 = vpop.f32.mrb[120].mxu1 }
 0x1fd   : > { %v5030_v35 = vpop.f32.mrb[123].mxu0  ;;  %v5139_v50 = vpop.f32.mrb[121].mxu1 }
 0x1fe   : > { %v1778_v9 = vadd.f32 %v5028_v13, %v7031_v29  ;;  %v5031_v54 = vadd.f32 %v5030_v35, %v5029_v17  ;;  %v5140_v24 = vadd.f32 %v5139_v50, %v5138_v41  ;;  %v5141_v51 = vpop.f32.mrb[122].mxu1 }
 0x1ff   : > { %v5142_v18 = vpop.f32.mrb[123].mxu1 }
 0x200   : > { %v1781_v3 = vadd.f32 %v5031_v54, %v7033_v21  ;;  %v5143_v15 = vadd.f32 %v5142_v18, %v5141_v51  ;;  %v7125_v47 = vadd.f32 %v5140_v24, %v1778_v9 }
 0x202   : > { %v5032_v62 = vpop.f32.mrb[124].mxu0  ;;  %v7127_v46 = vadd.f32 %v5143_v15, %v1781_v3 }
 0x203   : > { %v5033_v63 = vpop.f32.mrb[125].mxu0 }
 0x204   : > { %v5034_v27 = vadd.f32 %v5033_v63, %v5032_v62  ;;  %v5035_v5 = vpop.f32.mrb[126].mxu0  ;;  %v5144_v10 = vpop.f32.mrb[124].mxu1 }
 0x205   : > { %v5036_v31 = vpop.f32.mrb[127].mxu0  ;;  %v5145_v25 = vpop.f32.mrb[125].mxu1 }
 0x206   : > { %v1786_v29 = vadd.f32 %v5034_v27, %v7035_v33  ;;  %v5037_v40 = vadd.f32 %v5036_v31, %v5035_v5  ;;  %v5146_v56 = vadd.f32 %v5145_v25, %v5144_v10  ;;  %v5147_v0 = vpop.f32.mrb[126].mxu1 }
 0x207   : > { %v5148_v37 = vpop.f32.mrb[127].mxu1 }
 0x208   : > { %v1789_v21 = vadd.f32 %v5037_v40, %v7037_v20  ;;  %v5149_v23 = vadd.f32 %v5148_v37, %v5147_v0  ;;  %v7131_v12 = vadd.f32 %v5146_v56, %v1786_v29 }
 0x20a   : > { %v5664_v7 = vpop.f32.mrb[128].mxu0  ;;  %v7136_v43 = vadd.f32 %v5149_v23, %v1789_v21 }
 0x20b   : > { %v7134_v1 = vadd.f32 %v5664_v7, %v7047_v30  ;;  %v1987_v8 = vpop.f32.mrb[129].mxu0 }
 0x20c   : > { %v7139_v45 = vadd.f32 %v1987_v8, %v7041_v49  ;;  %v5665_v33 = vpop.f32.mrb[130].mxu0 }
 0x20d   : > { %v7142_v13 = vadd.f32 %v5665_v33, %v7049_v61  ;;  %v1990_v17 = vpop.f32.mrb[131].mxu0 }
 0x20e   : > { %v7145_v20 = vadd.f32 %v1990_v17, %v7043_v39 }
 0x210   : > { %v2114_v41 = vadd.f32 %v7145_v20, %v7139_v45 }
 0x212   : > { %v2115_v30 = vadd.f32 %v2114_v41, %v7134_v1  ;;  %v5668_v35 = vpop.f32.mrb[132].mxu0 }
 0x213   : > { %v7151_v9 = vadd.f32 %v5668_v35, %v7059_v36  ;;  %v2003_v54 = vpop.f32.mrb[133].mxu0 }
 0x214   : > { %v7154_v49 = vadd.f32 %v2003_v54, %v7053_v55  ;;  %v2116_v61 = vadd.f32 %v2115_v30, %v7142_v13  ;;  %v5669_v50 = vpop.f32.mrb[134].mxu0 }
 0x215   : > { %v7158_v24 = vadd.f32 %v5669_v50, %v7061_v19  ;;  %v2006_v39 = vpop.f32.mrb[135].mxu0 }
 0x216   : > { %v2117_v51 = vadd.f32 %v2116_v61, %v7154_v49  ;;  %v7162_v3 = vadd.f32 %v2006_v39, %v7055_v2 }
 0x218   : > { %v2118_v18 = vadd.f32 %v2117_v51, %v7162_v3 }
 0x21a   : > { %v2119_v36 = vadd.f32 %v2118_v18, %v7151_v9  ;;  %v5672_v15 = vpop.f32.mrb[136].mxu0 }
 0x21b   : > { %v7167_v55 = vadd.f32 %v5672_v15, %v7071_v4  ;;  %v2019_v62 = vpop.f32.mrb[137].mxu0 }
 0x21c   : > { %v7170_v63 = vadd.f32 %v2019_v62, %v7065_v42  ;;  %v2120_v19 = vadd.f32 %v2119_v36, %v7158_v24  ;;  %v5673_v27 = vpop.f32.mrb[138].mxu0 }
 0x21d   : > { %v7174_v5 = vadd.f32 %v5673_v27, %v7073_v58  ;;  %v2022_v2 = vpop.f32.mrb[139].mxu0 }
 0x21e   : > { %v2121_v10 = vadd.f32 %v2120_v19, %v7170_v63  ;;  %v7178_v31 = vadd.f32 %v2022_v2, %v7067_v48 }
 0x220   : > { %v2122_v29 = vadd.f32 %v2121_v10, %v7178_v31 }
 0x222   : > { %v2123_v4 = vadd.f32 %v2122_v29, %v7167_v55  ;;  %v5676_v40 = vpop.f32.mrb[140].mxu0 }
 0x223   : > { %v7183_v42 = vadd.f32 %v5676_v40, %v7083_v6  ;;  %v2035_v25 = vpop.f32.mrb[141].mxu0 }
 0x224   : > { %v7186_v56 = vadd.f32 %v2035_v25, %v7077_v26  ;;  %v2124_v58 = vadd.f32 %v2123_v4, %v7174_v5  ;;  %v5677_v0 = vpop.f32.mrb[142].mxu0 }
 0x225   : > { %v7190_v21 = vadd.f32 %v5677_v0, %v7085_v22  ;;  %v2038_v48 = vpop.f32.mrb[143].mxu0 }
 0x226   : > { %v2125_v37 = vadd.f32 %v2124_v58, %v7186_v56  ;;  %v7194_v23 = vadd.f32 %v2038_v48, %v7079_v16 }
 0x228   : > { %v2126_v7 = vadd.f32 %v2125_v37, %v7194_v23 }
 0x22a   : > { %v2127_v6 = vadd.f32 %v2126_v7, %v7183_v42  ;;  %v5680_v8 = vpop.f32.mrb[144].mxu0 }
 0x22b   : > { %v7199_v26 = vadd.f32 %v5680_v8, %v7095_v59  ;;  %v2051_v33 = vpop.f32.mrb[145].mxu0 }
 0x22c   : > { %v7202_v17 = vadd.f32 %v2051_v33, %v7089_v60  ;;  %v2128_v22 = vadd.f32 %v2127_v6, %v7190_v21  ;;  %v5681_v41 = vpop.f32.mrb[146].mxu0 }
 0x22d   : > { %v7206_v30 = vadd.f32 %v5681_v41, %v7097_v57  ;;  %v2054_v16 = vpop.f32.mrb[147].mxu0 }
 0x22e   : > { %v2129_v35 = vadd.f32 %v2128_v22, %v7202_v17  ;;  %v7210_v54 = vadd.f32 %v2054_v16, %v7091_v28  ;;  %v5869_v16 = vld [vmem:[%s8764_s2 + $0x80] sm:$0xff]  }
 0x230   : > { %v2130_v61 = vadd.f32 %v2129_v35, %v7210_v54 }
 0x232   : > { %v2131_v59 = vadd.f32 %v2130_v61, %v7199_v26  ;;  %v5684_v50 = vpop.f32.mrb[148].mxu0  ;;  %v5871_v61 = vld [vmem:[%s8764_s2 + $0xc8] sm:$0xff]  }
 0x233   : > { %v7215_v60 = vadd.f32 %v5684_v50, %v7107_v38  ;;  %v2067_v39 = vpop.f32.mrb[149].mxu0  ;;  %v5857_v50 = vld [vmem:[%s8764_s2 + $0x48] sm:$0xff]  }
 0x234   : > { %v7218_v51 = vadd.f32 %v2067_v39, %v7101_v11  ;;  %v2132_v57 = vadd.f32 %v2131_v59, %v7206_v30  ;;  %v5685_v18 = vpop.f32.mrb[150].mxu0  ;;  %v5872_v39 = vld [vmem:[%s8764_s2 + $0x88] sm:$0xff]  }
 0x235   : > { %v7222_v36 = vadd.f32 %v5685_v18, %v7109_v34  ;;  %v2070_v28 = vpop.f32.mrb[151].mxu0 }
 0x236   : > { %v2133_v15 = vadd.f32 %v2132_v57, %v7218_v51  ;;  %v7226_v62 = vadd.f32 %v2070_v28, %v7103_v53  ;;  %v5858_v57 = vld [vmem:[%s8764_s2 + $0x8] sm:$0xff]   ;;  %v5873_v28 = vld [vmem:[%s8764_s2 + $0xd0] sm:$0xff]  }
 0x238   : > { %v2134_v19 = vadd.f32 %v2133_v15, %v7226_v62 }
 0x23a   : > { %v2135_v38 = vadd.f32 %v2134_v19, %v7215_v60  ;;  %v5688_v27 = vpop.f32.mrb[152].mxu0  ;;  %v5859_v19 = vld [vmem:[%s8764_s2 + $0x50] sm:$0xff]  }
 0x23b   : > { %v7231_v11 = vadd.f32 %v5688_v27, %v7119_v14  ;;  %v2083_v2 = vpop.f32.mrb[153].mxu0  ;;  %v5860_v27 = vld [vmem:[%s8764_s2 + $0x10] sm:$0xff]  }
 0x23c   : > { %v7234_v10 = vadd.f32 %v2083_v2, %v7113_v52  ;;  %v2136_v34 = vadd.f32 %v2135_v38, %v7222_v36  ;;  %v5689_v29 = vpop.f32.mrb[154].mxu0  ;;  %v5874_v38 = vld [vmem:[%s8764_s2 + $0x90] sm:$0xff]  }
 0x23d   : > { %v7238_v4 = vadd.f32 %v5689_v29, %v7121_v44  ;;  %v2086_v53 = vpop.f32.mrb[155].mxu0 }
 0x23e   : > { %v2137_v40 = vadd.f32 %v2136_v34, %v7234_v10  ;;  %v7242_v25 = vadd.f32 %v2086_v53, %v7115_v32  ;;  %v5875_v34 = vld [vmem:[%s8764_s2 + $0xd8] sm:$0xff]  }
 0x23f   : > { %v5861_v53 = vld [vmem:[%s8764_s2 + $0x58] sm:$0xff]  }
 0x240   : > { %v2138_v58 = vadd.f32 %v2137_v40, %v7242_v25  ;;  %v5876_v40 = vld [vmem:[%s8764_s2 + $0x98] sm:$0xff]  }
 0x242   : > { %v2139_v14 = vadd.f32 %v2138_v58, %v7231_v11  ;;  %v5692_v0 = vpop.f32.mrb[156].mxu0  ;;  %v5862_v58 = vld [vmem:[%s8764_s2 + $0x18] sm:$0xff]  }
 0x243   : > { %v7247_v52 = vadd.f32 %v5692_v0, %v7131_v12  ;;  %v2099_v48 = vpop.f32.mrb[157].mxu0  ;;  %v5877_v0 = vld [vmem:[%s8764_s2 + $0xe0] sm:$0xff]  }
 0x244   : > { %v7250_v37 = vadd.f32 %v2099_v48, %v7125_v47  ;;  %v2140_v44 = vadd.f32 %v2139_v14, %v7238_v4  ;;  %v5693_v7 = vpop.f32.mrb[158].mxu0  ;;  %v5867_v47 = vld [vmem:[%s8764_s2 + $0xc0] sm:$0xff]  }
 0x245   : > { %v7254_v6 = vadd.f32 %v5693_v7, %v7136_v43  ;;  %v2102_v32 = vpop.f32.mrb[159].mxu0  ;;  %v5855_v43 = vld [vmem:[%s8764_s2 + $0x40] sm:$0xff]   ;;  %5286 = vmatprep.subr.bf16.mxu0 %v5867_v47 }
 0x246   : > { %v2141_v8 = vadd.f32 %v2140_v44, %v7250_v37  ;;  %v7258_v33 = vadd.f32 %v2102_v32, %v7127_v46  ;;  %v5856_v46 = vld [vmem:[%s8764_s2] sm:$0xff]   ;;  %5174 = vmatprep.subr.bf16.mxu1 %v5855_v43  ;;  %5287 = vmatpush3.bf16.msra.mxu0 %v5869_v16  ;;  %v5866_v16 = vld [vmem:[%s8764_s2 + $0x28] sm:$0xff]  }
 0x247   : > { %5175 = vmatpush3.bf16.msra.mxu1 %v5856_v46  ;;  %5288 = vmatprep.subr.bf16.mxu0 %v5871_v61  ;;  %v5863_v48 = vld [vmem:[%s8764_s2 + $0x60] sm:$0xff]   ;;  %v5885_v61 = vld [vmem:[%s8764_s2 + $0xf8] sm:$0xff]  }
 0x248   : > { %v2142_v22 = vadd.f32 %v2141_v8, %v7258_v33  ;;  %5176 = vmatprep.subr.bf16.mxu1 %v5857_v50  ;;  %v5879_v44 = vld [vmem:[%s8764_s2 + $0xa0] sm:$0xff]  }
 0x249   : > { %v5864_v7 = vld [vmem:[%s8764_s2 + $0x20] sm:$0xff]  }
 0x24a   : > { %v2143_v12 = vadd.f32 %v2142_v22, %v7247_v52  ;;  %5289 = vmatpush3.bf16.msra.mxu0 %v5872_v39 }
 0x24b   : > { %5177 = vmatpush3.bf16.msra.mxu1 %v5858_v57  ;;  %5290 = vmatprep.subr.bf16.mxu0 %v5873_v28  ;;  %v5886_v57 = vld [vmem:[%s8764_s2 + $0xb8] sm:$0xff]  }
 0x24c   : > { %v2144_v41 = vadd.f32 %v2143_v12, %v7254_v6  ;;  %5178 = vmatprep.subr.bf16.mxu1 %v5859_v19 }
 0x24e   : > { %v2145_v35 = vrot.slane %v2144_v41, 4  ;;  %5291 = vmatpush3.bf16.msra.mxu0 %v5874_v38 }
 0x24f   : > { %5179 = vmatpush3.bf16.msra.mxu1 %v5860_v27  ;;  %5292 = vmatprep.subr.bf16.mxu0 %v5875_v34  ;;  %v5887_v27 = vld [vmem:[%s8764_s2 + $0x140] sm:$0xff]  }
 0x250   : > { %v2146_v59 = vadd.f32 %v2145_v35, %v2144_v41  ;;  %5180 = vmatprep.subr.bf16.mxu1 %v5861_v53  ;;  %v5865_v41 = vld [vmem:[%s8764_s2 + $0x68] sm:$0xff]   ;;  %v5870_v35 = vld [vmem:[%s8764_s2 + $0x30] sm:$0xff]  }
 0x252   : > { %v2147_v18 = vrot.slane %v2146_v59, 2  ;;  %5293 = vmatpush3.bf16.msra.mxu0 %v5876_v40 }
 0x253   : > { %5181 = vmatpush3.bf16.msra.mxu1 %v5862_v58  ;;  %5294 = vmatprep.subr.bf16.mxu0 %v5877_v0 }
 0x254   : > { %v2148_v15 = vadd.f32 %v2147_v18, %v2146_v59  ;;  %5182 = vmatprep.subr.bf16.mxu1 %v5863_v48 }
 0x256   : > { %v2149_v2 = vrot.slane %v2148_v15, 1  ;;  %5295 = vmatpush3.bf16.msra.mxu0 %v5879_v44 }
 0x257   : > { %5183 = vmatpush3.bf16.msra.mxu1 %v5864_v7 }
 0x258   : > { %v2150_v29 = vadd.f32 %v2149_v2, %v2148_v15  ;;  %5184 = vmatprep.subr.bf16.mxu1 %v5865_v41 }
 0x25a   : > { %v7311_v14 = vmul.f32 0.00390625, %v2150_v29 }
 0x25b   : > { %5185 = vmatpush3.bf16.msra.mxu1 %v5866_v16 }
 0x25c   : > { %v7327_v32 = vsub.f32 %v7170_v63, %v7311_v14  ;;  %v7331_v8 = vsub.f32 %v7178_v31, %v7311_v14  ;;  %v7335_v22 = vsub.f32 %v7167_v55, %v7311_v14  ;;  %v7339_v12 = vsub.f32 %v7174_v5, %v7311_v14  ;;  %v5881_v5 = vld [vmem:[%s8764_s2 + $0xe8] sm:$0xff]  }
 0x25d   : > { %v7343_v47 = vsub.f32 %v7186_v56, %v7311_v14  ;;  %v7347_v63 = vsub.f32 %v7194_v23, %v7311_v14  ;;  %v7351_v31 = vsub.f32 %v7183_v42, %v7311_v14  ;;  %v7355_v55 = vsub.f32 %v7190_v21, %v7311_v14  ;;  %5296 = vmatprep.subr.bf16.mxu0 %v5881_v5 }
 0x25e   : > { %v7362_v56 = vsub.f32 %v7202_v17, %v7311_v14  ;;  %v7366_v23 = vsub.f32 %v7210_v54, %v7311_v14  ;;  %v7370_v42 = vsub.f32 %v7199_v26, %v7311_v14  ;;  %v7374_v21 = vsub.f32 %v7206_v30, %v7311_v14  ;;  %v5882_v17 = vld [vmem:[%s8764_s2 + $0xa8] sm:$0xff]  }
 0x25f   : > { %v7384_v54 = vsub.f32 %v7218_v51, %v7311_v14  ;;  %v7388_v26 = vsub.f32 %v7226_v62, %v7311_v14  ;;  %v7392_v30 = vsub.f32 %v7215_v60, %v7311_v14  ;;  %v7396_v43 = vsub.f32 %v7222_v36, %v7311_v14  ;;  %5297 = vmatpush3.bf16.msra.mxu0 %v5882_v17 }
 0x260   : > { %v7403_v51 = vsub.f32 %v7234_v10, %v7311_v14  ;;  %v7407_v62 = vsub.f32 %v7242_v25, %v7311_v14  ;;  %v7411_v60 = vsub.f32 %v7231_v11, %v7311_v14  ;;  %v7415_v36 = vsub.f32 %v7238_v4, %v7311_v14  ;;  %v5883_v4 = vld [vmem:[%s8764_s2 + $0xf0] sm:$0xff]  }
 0x261   : > { %v7419_v46 = vsub.f32 %v7250_v37, %v7311_v14  ;;  %v7423_v10 = vsub.f32 %v7258_v33, %v7311_v14  ;;  %v7427_v25 = vsub.f32 %v7247_v52, %v7311_v14  ;;  %v7431_v11 = vsub.f32 %v7254_v6, %v7311_v14  ;;  %v5868_v52 = vld [vmem:[%s8764_s2 + $0x70] sm:$0xff]   ;;  %5298 = vmatprep.subr.bf16.mxu0 %v5883_v4 }
 0x262   : > { %v7438_v37 = vsub.f32 %v7139_v45, %v7311_v14  ;;  %v7442_v33 = vsub.f32 %v7145_v20, %v7311_v14  ;;  %v5884_v6 = vld [vmem:[%s8764_s2 + $0xb0] sm:$0xff]   ;;  %5186 = vmatprep.subr.bf16.mxu1 %v5868_v52  ;;  %v5878_v45 = vld [vmem:[%s8764_s2 + $0x78] sm:$0xff]   ;;  %v7464_v59 = vsub.f32 %v7134_v1, %v7311_v14  ;;  %v7475_v18 = vsub.f32 %v7142_v13, %v7311_v14 }
 0x263   : > { %5187 = vmatpush3.bf16.msra.mxu1 %v5870_v35  ;;  %v5880_v20 = vld [vmem:[%s8764_s2 + $0x38] sm:$0xff]   ;;  %5299 = vmatpush3.bf16.msra.mxu0 %v5884_v6  ;;  %v7479_v1 = vsub.f32 %v7154_v49, %v7311_v14  ;;  %v7485_v19 = vsub.f32 %v7162_v3, %v7311_v14  ;;  %v7494_v49 = vsub.f32 %v7151_v9, %v7311_v14 }
 0x264   : > { %v2185_v50 = vmul.f32 %v7438_v37, %v7438_v37  ;;  %v2186_v39 = vmul.f32 %v7442_v33, %v7442_v33  ;;  %5188 = vmatprep.subr.bf16.mxu1 %v5878_v45  ;;  %5300 = vmatprep.subr.bf16.mxu0 %v5885_v61  ;;  %v2187_v28 = vmul.f32 %v7464_v59, %v7464_v59 }
 0x265   : > { %v2188_v38 = vmul.f32 %v7475_v18, %v7475_v18  ;;  %v2189_v2 = vmul.f32 %v7479_v1, %v7479_v1  ;;  %v7500_v3 = vsub.f32 %v7158_v24, %v7311_v14  ;;  %v2190_v29 = vmul.f32 %v7485_v19, %v7485_v19 }
 0x266   : > { %v2217_v15 = vadd.f32 %v2186_v39, %v2185_v50  ;;  %v2191_v40 = vmul.f32 %v7494_v49, %v7494_v49  ;;  %v2193_v48 = vmul.f32 %v7327_v32, %v7327_v32  ;;  %v2194_v24 = vmul.f32 %v7331_v8, %v7331_v8 }
 0x267   : > { %5189 = vmatpush3.bf16.msra.mxu1 %v5880_v20  ;;  %5301 = vmatpush3.bf16.msra.mxu0 %v5886_v57  ;;  %v2192_v9 = vmul.f32 %v7500_v3, %v7500_v3  ;;  %v2195_v7 = vmul.f32 %v7335_v22, %v7335_v22  ;;  %v2196_v41 = vmul.f32 %v7339_v12, %v7339_v12 }
 0x268   : > { %v2218_v13 = vadd.f32 %v2217_v15, %v2187_v28  ;;  %5398 = vmatprep.subr.bf16.mxu1 %v5887_v27  ;;  %v2197_v16 = vmul.f32 %v7343_v47, %v7343_v47  ;;  %v2198_v52 = vmul.f32 %v7347_v63, %v7347_v63  ;;  %v2199_v35 = vmul.f32 %v7351_v31, %v7351_v31 }
 0x269   : > { %v2200_v20 = vmul.f32 %v7355_v55, %v7355_v55  ;;  %v2201_v50 = vmul.f32 %v7362_v56, %v7362_v56  ;;  %v2202_v57 = vmul.f32 %v7366_v23, %v7366_v23  ;;  %v2203_v15 = vmul.f32 %v7370_v42, %v7370_v42 }
 0x26a   : > { %v2219_v34 = vadd.f32 %v2218_v13, %v2188_v38  ;;  %v2204_v13 = vmul.f32 %v7374_v21, %v7374_v21 }
 0x26c   : > { %v2220_v53 = vadd.f32 %v2219_v34, %v2189_v2  ;;  %v2205_v2 = vmul.f32 %v7384_v54, %v7384_v54 }
 0x26e   : > { %v2221_v58 = vadd.f32 %v2220_v53, %v2190_v29  ;;  %v2206_v29 = vmul.f32 %v7388_v26, %v7388_v26 }
 0x270   : > { %v2222_v0 = vadd.f32 %v2221_v58, %v2191_v40  ;;  %v2207_v40 = vmul.f32 %v7392_v30, %v7392_v30 }
 0x272   : > { %v2223_v44 = vadd.f32 %v2222_v0, %v2192_v9  ;;  %v2208_v9 = vmul.f32 %v7396_v43, %v7396_v43 }
 0x274   : > { %v2224_v14 = vadd.f32 %v2223_v44, %v2193_v48  ;;  %v2209_v48 = vmul.f32 %v7403_v51, %v7403_v51 }
 0x276   : > { %v2225_v5 = vadd.f32 %v2224_v14, %v2194_v24  ;;  %v2210_v24 = vmul.f32 %v7407_v62, %v7407_v62 }
 0x278   : > { %v2226_v17 = vadd.f32 %v2225_v5, %v2195_v7  ;;  %v2211_v7 = vmul.f32 %v7411_v60, %v7411_v60 }
 0x27a   : > { %v2227_v4 = vadd.f32 %v2226_v17, %v2196_v41  ;;  %v2212_v41 = vmul.f32 %v7415_v36, %v7415_v36 }
 0x27c   : > { %v2228_v6 = vadd.f32 %v2227_v4, %v2197_v16  ;;  %v2213_v16 = vmul.f32 %v7419_v46, %v7419_v46 }
 0x27e   : > { %v2229_v45 = vadd.f32 %v2228_v6, %v2198_v52  ;;  %v2214_v52 = vmul.f32 %v7423_v10, %v7423_v10 }
 0x280   : > { %v2230_v61 = vadd.f32 %v2229_v45, %v2199_v35  ;;  %v2215_v35 = vmul.f32 %v7427_v25, %v7427_v25 }
 0x282   : > { %v2231_v39 = vadd.f32 %v2230_v61, %v2200_v20  ;;  %v2216_v20 = vmul.f32 %v7431_v11, %v7431_v11 }
 0x284   : > { %v2232_v28 = vadd.f32 %v2231_v39, %v2201_v50 }
 0x286   : > { %v2233_v38 = vadd.f32 %v2232_v28, %v2202_v57  ;;  %v5896_v28 = vld [vmem:[%s8764_s2 + $0x1c0] sm:$0xff]  }
 0x287   : > { %5510 = vmatprep.subr.bf16.mxu0 %v5896_v28 }
 0x288   : > { %v2234_v27 = vadd.f32 %v2233_v38, %v2203_v15 }
 0x28a   : > { %v2235_v34 = vadd.f32 %v2234_v27, %v2204_v13 }
 0x28c   : > { %v2236_v53 = vadd.f32 %v2235_v34, %v2205_v2 }
 0x28e   : > { %v2237_v58 = vadd.f32 %v2236_v53, %v2206_v29 }
 0x290   : > { %v2238_v0 = vadd.f32 %v2237_v58, %v2207_v40 }
 0x292   : > { %v2239_v44 = vadd.f32 %v2238_v0, %v2208_v9 }
 0x294   : > { %v2240_v14 = vadd.f32 %v2239_v44, %v2209_v48 }
 0x296   : > { %v2241_v5 = vadd.f32 %v2240_v14, %v2210_v24 }
 0x298   : > { %v2242_v17 = vadd.f32 %v2241_v5, %v2211_v7 }
 0x29a   : > { %v2243_v4 = vadd.f32 %v2242_v17, %v2212_v41 }
 0x29c   : > { %v2244_v6 = vadd.f32 %v2243_v4, %v2213_v16 }
 0x29e   : > { %v2245_v45 = vadd.f32 %v2244_v6, %v2214_v52 }
 0x2a0   : > { %v2246_v61 = vadd.f32 %v2245_v45, %v2215_v35 }
 0x2a2   : > { %v2247_v50 = vadd.f32 %v2246_v61, %v2216_v20 }
 0x2a4   : > { %v2248_v39 = vrot.slane %v2247_v50, 4 }
 0x2a6   : > { %v2249_v57 = vadd.f32 %v2248_v39, %v2247_v50 }
 0x2a8   : > { %v2250_v15 = vrot.slane %v2249_v57, 2 }
 0x2aa   : > { %v2251_v38 = vadd.f32 %v2250_v15, %v2249_v57 }
 0x2ac   : > { %v2252_v13 = vrot.slane %v2251_v38, 1 }
 0x2ae   : > { %v2253_v27 = vadd.f32 %v2252_v13, %v2251_v38 }
 0x2b0   : > { %v2254_v2 = vmul.f32 0.00390625, %v2253_v27 }
 0x2b2   : > { %v2255_v34 = vadd.f32 1e-05, %v2254_v2 }
 0x2b4   : > { %5927 = vrsqrt.f32 %v2255_v34 }
 0x2be   : > { %v7559_v29 = vpop.eup %5927 }
 0x2bf   : > { %v2259_v53 = vmul.f32 %v7559_v29, %v7464_v59  ;;  %v2260_v40 = vmul.f32 %v7559_v29, %v7475_v18  ;;  %v2257_v58 = vmul.f32 %v7559_v29, %v7438_v37  ;;  %v2258_v9 = vmul.f32 %v7559_v29, %v7442_v33 }
 0x2c0   : > { %v2261_v18 = vmul.f32 %v7559_v29, %v7479_v1  ;;  %v2262_v37 = vmul.f32 %v7559_v29, %v7485_v19  ;;  %v7576_v33 = vmul.f32 %v7559_v29, %v7494_v49  ;;  %v7580_v52 = vmul.f32 %v7559_v29, %v7500_v3 }
 0x2c1   : > { %v2291_v0 = vmax.f32 %v2259_v53, 0.0  ;;  %v2292_v48 = vmax.f32 %v2260_v40, 0.0  ;;  %v2289_v44 = vmax.f32 %v2257_v58, 0.0  ;;  %v2290_v24 = vmax.f32 %v2258_v9, 0.0 }
 0x2c2   : > { %v2293_v57 = vmax.f32 %v2261_v18, 0.0  ;;  %v2294_v49 = vmax.f32 %v2262_v37, 0.0  ;;  %v5889_v18 = vld [vmem:[%s8764_s2 + $0x148] sm:$0xff]   ;;  %v5898_v37 = vld [vmem:[%s8764_s2 + $0x180] sm:$0xff]  }
 0x2c3   : > { %v2385_v14 = vrot.slane %v2291_v0, 7  ;;  %v2386_v7 = vrot.slane %v2292_v48, 7  ;;  %v2337_v5 = vrot.slane %v2291_v0, 1  ;;  %v2388_v41 = vrot.slane %v2289_v44, 7 }
 0x2c4   : > { %v2389_v17 = vrot.slane %v2290_v24, 7  ;;  %v2481_v16 = vrot.slane %v2292_v48, 5  ;;  %v2338_v59 = vrot.slane %v2289_v44, 1  ;;  %v2482_v6 = vrot.slane %v2290_v24, 5 }
 0x2c5   : > { %v2387_v4 = vsel %vm266_vm0, %v2385_v14, %v2386_v7  ;;  %v2513_v35 = vsel %vm266_vm0, %v2337_v5, %v2385_v14 }
 0x2c6   : > { %v2529_v45 = vsel %vm266_vm0, %v2386_v7, %v2481_v16  ;;  %v2681_v20 = vrot.slane %v2387_v4, 2  ;;  %v2390_v61 = vsel %vm266_vm0, %v2388_v41, %v2389_v17  ;;  %v2680_v50 = vrot.slane %v2513_v35, 2  ;;  %v5888_v7 = vld [vmem:[%s8764_s2 + $0x100] sm:$0xff]  }
 0x2c7   : > { %v2578_v1 = vrot.slane %v2529_v45, 1  ;;  %v2683_v39 = vrot.slane %v2529_v45, 2  ;;  %v2514_v19 = vsel %vm266_vm0, %v2338_v59, %v2388_v41  ;;  %v2581_v15 = vrot.slane %v2390_v61, 1 }
 0x2c8   : > { %v2580_v28 = vrot.slane %v2514_v19, 1  ;;  %v2804_v38 = vpack.c.bf16 %v2390_v61, %v2514_v19  ;;  %v2575_v3 = vrot.slane %v2513_v35, 1  ;;  %v2576_v13 = vrot.slane %v2387_v4, 1 }
 0x2c9   : > { %v2682_v27 = vsel %vm563_vm2, %v2680_v50, %v2681_v20  ;;  %v2685_v2 = vrot.slane %v2514_v19, 2  ;;  %v2684_v34 = vsel %vm563_vm2, %v2681_v20, %v2683_v39  ;;  %v2530_v53 = vsel %vm266_vm0, %v2389_v17, %v2482_v6  ;;  %v5900_v6 = vld [vmem:[%s8764_s2 + $0x1c8] sm:$0xff]  }
 0x2ca   : > { %v2582_v40 = vsel %vm457_vm1, %v2580_v28, %v2581_v15  ;;  %3618 = vmatprep.mubr.bf16.mxu0 %v2804_v38  ;;  %v2577_v58 = vsel %vm457_vm1, %v2575_v3, %v2576_v13  ;;  %v2579_v9 = vsel %vm457_vm1, %v2576_v13, %v2578_v1  ;;  %v7592_v0 = vpack.c.bf16 %v2684_v34, %v2682_v27  ;;  %v5892_v13 = vld [vmem:[%s8764_s2 + $0x110] sm:$0xff]  }
 0x2cb   : > { %v2583_v48 = vrot.slane %v2530_v53, 1  ;;  %v2686_v44 = vrot.slane %v2390_v61, 2  ;;  %v7594_v24 = vpack.c.bf16 %v2579_v9, %v2577_v58  ;;  %v7596_v14 = vpack.c.bf16 %v2387_v4, %v2513_v35  ;;  %v5890_v61 = vld [vmem:[%s8764_s2 + $0x108] sm:$0xff]  }
 0x2cc   : > { %v2688_v5 = vrot.slane %v2530_v53, 2  ;;  %v2339_v41 = vrot.slane %v2293_v57, 1  ;;  %v2391_v17 = vrot.slane %v2293_v57, 7  ;;  %v2392_v16 = vrot.slane %v2294_v49, 7  ;;  %3619 = vmatmul.mubr.bf16.vlgmr.msra.gmra.mrb[160].mxu0 %v7592_v0  ;;  %v5891_v57 = vld [vmem:[%s8764_s2 + $0x150] sm:$0xff]  }
 0x2cd   : > { %v2584_v59 = vsel %vm457_vm1, %v2581_v15, %v2583_v48  ;;  %3457 = vmatprep.mubr.bf16.mxu1 %v7594_v24  ;;  %3626 = vmatprep.mubr.bf16.mxu0 %v7596_v14  ;;  %v2483_v35 = vrot.slane %v2294_v49, 5  ;;  %v2687_v45 = vsel %vm563_vm2, %v2685_v2, %v2686_v44  ;;  %v2295_v1 = vmax.f32 %v7576_v33, 0.0  ;;  %v5902_v49 = vld [vmem:[%s8764_s2 + $0x188] sm:$0xff]   ;;  %v5904_v33 = vld [vmem:[%s8764_s2 + $0x1d0] sm:$0xff]   ;;  %v5907_v48 = vld [vmem:[%s8764_s2 + $0x1d8] sm:$0xff]  }
 0x2ce   : > { %v7608_v4 = vpack.c.bf16 %v2584_v59, %v2582_v40  ;;  %3458 = vmatmul.mubr.bf16.vlgmr.msra.gmra.mrb[128].mxu1 %v7596_v14  ;;  %v2689_v20 = vsel %vm563_vm2, %v2686_v44, %v2688_v5  ;;  %v2296_v50 = vmax.f32 %v7580_v52, 0.0  ;;  %v7626_v39 = vsel %vm266_vm0, %v2391_v17, %v2392_v16  ;;  %5511 = vmatpush3.bf16.msra.mxu0 %v5898_v37  ;;  %v5906_v40 = vld [vmem:[%s8764_s2 + $0x190] sm:$0xff]   ;;  %v5908_v59 = vld [vmem:[%s8764_s2 + $0x198] sm:$0xff]  }
 0x2cf   : > { %5399 = vmatpush3.bf16.msra.mxu1 %v5888_v7  ;;  %v7629_v19 = vsel %vm266_vm0, %v2339_v41, %v2391_v17  ;;  %v7637_v28 = vpack.c.bf16 %v2689_v20, %v2687_v45  ;;  %5512 = vmatprep.subr.bf16.mxu0 %v5900_v6  ;;  %v2265_v52 = vmul.f32 %v7559_v29, %v7327_v32  ;;  %v2340_v2 = vrot.slane %v2295_v1, 1  ;;  %v5893_v32 = vld [vmem:[%s8764_s2 + $0x158] sm:$0xff]   ;;  %v5909_v45 = vld [vmem:[%s8764_s2 + $0x1e0] sm:$0xff]  }
 0x2d0   : > { %3465 = vmatprep.mubr.bf16.mxu1 %v7608_v4  ;;  %5400 = vmatprep.subr.bf16.mxu1 %v5889_v18  ;;  %v7646_v15 = vpack.c.bf16 %v7626_v39, %v7629_v19  ;;  %v7649_v3 = vsel %vm266_vm0, %v2392_v16, %v2483_v35  ;;  %v2266_v27 = vmul.f32 %v7559_v29, %v7331_v8  ;;  %v2394_v34 = vrot.slane %v2295_v1, 7  ;;  %v5894_v7 = vld [vmem:[%s8764_s2 + $0x118] sm:$0xff]   ;;  %v5895_v16 = vld [vmem:[%s8764_s2 + $0x160] sm:$0xff]  }
 0x2d1   : > { %v2395_v53 = vrot.slane %v2296_v50, 7  ;;  %v2585_v8 = vrot.slane %v7629_v19, 1  ;;  %v2586_v58 = vrot.slane %v7626_v39, 1  ;;  %v2588_v9 = vrot.slane %v7649_v3, 1 }
 0x2d2   : > { %5513 = vmatpush3.bf16.msra.mxu0 %v5902_v49  ;;  %v2484_v44 = vrot.slane %v2296_v50, 5  ;;  %v2298_v5 = vmax.f32 %v2266_v27, 0.0  ;;  %v7678_v17 = vsel %vm266_vm0, %v2340_v2, %v2394_v34  ;;  %v2267_v18 = vmul.f32 %v7559_v29, %v7335_v22  ;;  %v5897_v50 = vld [vmem:[%s8764_s2 + $0x120] sm:$0xff]   ;;  %v5913_v2 = vld [vmem:[%s8764_s2 + $0x1e8] sm:$0xff]  }
 0x2d3   : > { %5401 = vmatpush3.bf16.msra.mxu1 %v5890_v61  ;;  %5514 = vmatprep.subr.bf16.mxu0 %v5904_v33  ;;  %v7675_v41 = vsel %vm266_vm0, %v2394_v34, %v2395_v53  ;;  %v2691_v37 = vrot.slane %v7626_v39, 2  ;;  %v2587_v6 = vsel %vm457_vm1, %v2585_v8, %v2586_v58  ;;  %v2589_v35 = vsel %vm457_vm1, %v2586_v58, %v2588_v9  ;;  %v5899_v33 = vld [vmem:[%s8764_s2 + $0x168] sm:$0xff]  }
 0x2d4   : > { %3627 = vmatmul.mubr.bf16.gmra.mrb[164].mxu0 %v7637_v28  ;;  %5402 = vmatprep.subr.bf16.mxu1 %v5891_v57  ;;  %v2690_v20 = vrot.slane %v7629_v19, 2  ;;  %v7697_v61 = vpack.c.bf16 %v7675_v41, %v7678_v17  ;;  %v2693_v1 = vrot.slane %v7649_v3, 2  ;;  %v7701_v22 = vsel %vm266_vm0, %v2395_v53, %v2484_v44  ;;  %v5911_v3 = vld [vmem:[%s8764_s2 + $0x1a0] sm:$0xff]   ;;  %v5903_v44 = vld [vmem:[%s8764_s2 + $0x170] sm:$0xff]  }
 0x2d5   : > { %3634 = vmatprep.mubr.bf16.mxu0 %v7646_v15  ;;  %v2268_v39 = vmul.f32 %v7559_v29, %v7339_v12  ;;  %v2398_v19 = vrot.slane %v2298_v5, 7  ;;  %v2590_v12 = vrot.slane %v7678_v17, 1  ;;  %v2593_v27 = vrot.slane %v7701_v22, 1 }
 0x2d6   : > { %3466 = vmatmul.mubr.bf16.gmra.mrb[132].mxu1 %v2804_v38  ;;  %v2297_v38 = vmax.f32 %v2265_v52, 0.0  ;;  %5515 = vmatpush3.bf16.msra.mxu0 %v5906_v40  ;;  %v7713_v52 = vpack.c.bf16 %v2589_v35, %v2587_v6  ;;  %v2485_v34 = vrot.slane %v2298_v5, 5  ;;  %v2692_v53 = vsel %vm563_vm2, %v2690_v20, %v2691_v37  ;;  %v5901_v40 = vld [vmem:[%s8764_s2 + $0x128] sm:$0xff]  }
 0x2d7   : > { %3473 = vmatprep.mubr.bf16.mxu1 %v7594_v24  ;;  %5403 = vmatpush3.bf16.msra.mxu1 %v5892_v13  ;;  %v2591_v13 = vrot.slane %v7675_v41, 1  ;;  %v2299_v8 = vmax.f32 %v2267_v18, 0.0  ;;  %v2300_v58 = vmax.f32 %v2268_v39, 0.0  ;;  %v2695_v5 = vrot.slane %v7678_v17, 2 }
 0x2d8   : > { %5404 = vmatprep.subr.bf16.mxu1 %v5893_v32  ;;  %5516 = vmatprep.subr.bf16.mxu0 %v5907_v48  ;;  %v2341_v57 = vrot.slane %v2297_v38, 1  ;;  %v2397_v49 = vrot.slane %v2297_v38, 7  ;;  %v2694_v32 = vsel %vm563_vm2, %v2691_v37, %v2693_v1  ;;  %v5914_v38 = vld [vmem:[%s8764_s2 + $0x1a8] sm:$0xff]   ;;  %v5915_v37 = vld [vmem:[%s8764_s2 + $0x1f0] sm:$0xff]   ;;  %v2698_v35 = vrot.slane %v7701_v22, 2  ;;  %v5910_v22 = vld [vmem:[%s8764_s2 + $0x178] sm:$0xff]  }
 0x2d9   : > { %v2594_v18 = vsel %vm457_vm1, %v2591_v13, %v2593_v27  ;;  %v7760_v17 = vsel %vm266_vm0, %v2398_v19, %v2485_v34  ;;  %v2270_v20 = vmul.f32 %v7559_v29, %v7347_v63  ;;  %v2342_v1 = vrot.slane %v2299_v8, 1  ;;  %v5912_v27 = vld [vmem:[%s8764_s2 + $0x138] sm:$0xff]  }
 0x2da   : > { %5517 = vmatpush3.bf16.msra.mxu0 %v5908_v59  ;;  %v7732_v9 = vsel %vm266_vm0, %v2397_v49, %v2398_v19  ;;  %v7735_v48 = vsel %vm266_vm0, %v2341_v57, %v2397_v49  ;;  %v2592_v59 = vsel %vm457_vm1, %v2590_v12, %v2591_v13  ;;  %v5916_v57 = vld [vmem:[%s8764_s2 + $0x1b0] sm:$0xff]   ;;  %v2598_v19 = vrot.slane %v7760_v17, 1 }
 0x2db   : > { %5405 = vmatpush3.bf16.msra.mxu1 %v5894_v7  ;;  %5518 = vmatprep.subr.bf16.mxu0 %v5909_v45  ;;  %v2269_v7 = vmul.f32 %v7559_v29, %v7343_v47  ;;  %v2696_v47 = vrot.slane %v7675_v41, 2  ;;  %v7756_v6 = vpack.c.bf16 %v7732_v9, %v7735_v48  ;;  %v5905_v45 = vld [vmem:[%s8764_s2 + $0x130] sm:$0xff]   ;;  %v2401_v41 = vrot.slane %v2300_v58, 7 }
 0x2dc   : > { %3635 = vmatmul.mubr.bf16.gmra.mrb[168].mxu0 %v7592_v0  ;;  %5406 = vmatprep.subr.bf16.mxu1 %v5895_v16  ;;  %v7746_v16 = vpack.c.bf16 %v2694_v32, %v2692_v53  ;;  %v7772_v39 = vpack.c.bf16 %v2594_v18, %v2592_v59  ;;  %v2595_v63 = vrot.slane %v7735_v48, 1  ;;  %v2596_v49 = vrot.slane %v7732_v9, 1 }
 0x2dd   : > { %3642 = vmatprep.mubr.bf16.mxu0 %v7697_v61  ;;  %v2697_v12 = vsel %vm563_vm2, %v2695_v5, %v2696_v47  ;;  %v2699_v13 = vsel %vm563_vm2, %v2696_v47, %v2698_v35  ;;  %v2302_v34 = vmax.f32 %v2270_v20, 0.0  ;;  %v2701_v59 = vrot.slane %v7732_v9, 2 }
 0x2de   : > { %3474 = vmatmul.mubr.bf16.gmra.mrb[136].mxu1 %v7596_v14  ;;  %5519 = vmatpush3.bf16.msra.mxu0 %v5911_v3  ;;  %v2486_v3 = vrot.slane %v2300_v58, 5  ;;  %v5918_v58 = vld [vmem:[%s8764_s2 + $0x1b8] sm:$0xff]   ;;  %v2599_v5 = vsel %vm457_vm1, %v2596_v49, %v2598_v19 }
 0x2df   : > { %3481 = vmatprep.mubr.bf16.mxu1 %v7713_v52  ;;  %5407 = vmatpush3.bf16.msra.mxu1 %v5897_v50  ;;  %v2400_v50 = vrot.slane %v2299_v8, 7  ;;  %v2271_v8 = vmul.f32 %v7559_v29, %v7351_v31  ;;  %v2703_v31 = vrot.slane %v7760_v17, 2  ;;  %v2273_v17 = vmul.f32 %v7559_v29, %v7362_v56 }
 0x2e0   : > { %5408 = vmatprep.subr.bf16.mxu1 %v5899_v33  ;;  %5520 = vmatprep.subr.bf16.mxu0 %v5913_v2  ;;  %v5917_v33 = vld [vmem:[%s8764_s2 + $0x1f8] sm:$0xff]   ;;  %v2301_v2 = vmax.f32 %v2269_v7, 0.0  ;;  %v7807_v7 = vpack.c.bf16 %v2699_v13, %v2697_v12  ;;  %v2288_v12 = vmul.f32 %v7559_v29, %v7431_v11 }
 0x2e1   : > { %v7791_v53 = vsel %vm266_vm0, %v2400_v50, %v2401_v41  ;;  %v7794_v32 = vsel %vm266_vm0, %v2342_v1, %v2400_v50  ;;  %v7832_v50 = vmul.f32 %v7559_v29, %v7366_v23  ;;  %v7845_v23 = vmul.f32 %v7559_v29, %v7374_v21 }
 0x2e2   : > { %5521 = vmatpush3.bf16.msra.mxu0 %v5914_v38  ;;  %v2597_v38 = vsel %vm457_vm1, %v2595_v63, %v2596_v49  ;;  %v7814_v18 = vpack.c.bf16 %v7791_v53, %v7794_v32  ;;  %v2343_v47 = vrot.slane %v2301_v2, 1  ;;  %v2403_v35 = vrot.slane %v2301_v2, 7 }
 0x2e3   : > { %5409 = vmatpush3.bf16.msra.mxu1 %v5901_v40  ;;  %5522 = vmatprep.subr.bf16.mxu0 %v5915_v37  ;;  %v7799_v40 = vld [vmem:[%s8764_s2 + $0x200] sm:$0xff]   ;;  %v2534_v37 = vsel %vm266_vm0, %v2401_v41, %v2486_v3  ;;  %v7823_v9 = vpack.c.bf16 %v2599_v5, %v2597_v38  ;;  %v2600_v20 = vrot.slane %v7794_v32, 1  ;;  %v2487_v41 = vrot.slane %v2302_v34, 5 }
 0x2e4   : > { %3643 = vmatmul.mubr.bf16.gmra.mrb[172].mxu0 %v7746_v16  ;;  %5410 = vmatprep.subr.bf16.mxu1 %v5903_v44  ;;  %v2700_v44 = vrot.slane %v7735_v48, 2  ;;  %8823 = vst [vmem:[#allocation5_spill] sm:$0xff] %v7814_v18  ;;  %v2272_v48 = vmul.f32 %v7559_v29, %v7355_v55  ;;  %v2601_v55 = vrot.slane %v7791_v53, 1  ;;  %v2603_v1 = vrot.slane %v2534_v37, 1 }
 0x2e5   : > { %3650 = vmatprep.mubr.bf16.mxu0 %v7756_v6  ;;  %v2303_v63 = vmax.f32 %v2271_v8, 0.0  ;;  %v2519_v19 = vsel %vm266_vm0, %v2343_v47, %v2403_v35  ;;  %v2287_v3 = vmul.f32 %v7559_v29, %v7427_v25  ;;  %v2705_v13 = vrot.slane %v7794_v32, 2 }
 0x2e6   : > { %3482 = vmatmul.mubr.bf16.gmra.mrb[140].mxu1 %v7646_v15  ;;  %5523 = vmatpush3.bf16.msra.mxu0 %v5916_v57  ;;  %v2704_v57 = vsel %vm563_vm2, %v2701_v59, %v2703_v31  ;;  %v2304_v56 = vmax.f32 %v2272_v48, 0.0  ;;  %v2602_v2 = vsel %vm457_vm1, %v2600_v20, %v2601_v55  ;;  %v2708_v21 = vrot.slane %v2534_v37, 2 }
 0x2e7   : > { %3489 = vmatprep.mubr.bf16.mxu1 %v7772_v39  ;;  %5411 = vmatpush3.bf16.msra.mxu1 %v5905_v45  ;;  %v2404_v45 = vrot.slane %v2302_v34, 7  ;;  %v2604_v34 = vsel %vm457_vm1, %v2601_v55, %v2603_v1  ;;  %v7862_v25 = vmul.f32 %v7559_v29, %v7384_v54  ;;  %v2344_v11 = vrot.slane %v2303_v63, 1 }
 0x2e8   : > { %5412 = vmatprep.subr.bf16.mxu1 %v5910_v22  ;;  %5524 = vmatprep.subr.bf16.mxu0 %v5917_v33  ;;  %v2702_v22 = vsel %vm563_vm2, %v2700_v44, %v2701_v59  ;;  %v7841_v33 = vmul.f32 %v7559_v29, %v7370_v42  ;;  %v2706_v42 = vrot.slane %v7791_v53, 2  ;;  %v2406_v44 = vrot.slane %v2303_v63, 7 }
 0x2e9   : > { %v2405_v49 = vsel %vm266_vm0, %v2403_v35, %v2404_v45  ;;  %v2407_v32 = vrot.slane %v2304_v56, 7  ;;  %v2305_v38 = vmax.f32 %v2273_v17, 0.0  ;;  %v2319_v5 = vmax.f32 %v2287_v3, 0.0 }
 0x2ea   : > { %5525 = vmatpush3.bf16.msra.mxu0 %v5918_v58  ;;  %v7857_v8 = vpack.c.bf16 %v2405_v49, %v2519_v19  ;;  %v2535_v58 = vsel %vm266_vm0, %v2404_v45, %v2487_v41  ;;  %v2320_v59 = vmax.f32 %v2288_v12, 0.0  ;;  %v7866_v53 = vpack.c.bf16 %v2604_v34, %v2602_v2 }
 0x2eb   : > { %5413 = vmatpush3.bf16.msra.mxu1 %v5912_v27  ;;  %v7852_v27 = vpack.c.bf16 %v2704_v57, %v2702_v22  ;;  %v2306_v31 = vmax.f32 %v7832_v50, 0.0  ;;  %v2605_v37 = vrot.slane %v2519_v19, 1  ;;  %v2606_v48 = vrot.slane %v2405_v49, 1 }
 0x2ec   : > { %3651 = vmatmul.mubr.bf16.gmra.mrb[176].mxu0 %v7807_v7  ;;  %5694 = vmatprep.subr.bf16.mxu1 %v7799_v40  ;;  %v2608_v54 = vrot.slane %v2535_v58, 1  ;;  %v2307_v47 = vmax.f32 %v7841_v33, 0.0  ;;  %v2488_v35 = vrot.slane %v2304_v56, 5  ;;  %v2707_v45 = vsel %vm563_vm2, %v2705_v13, %v2706_v42 }
 0x2ed   : > { %3658 = vmatprep.mubr.bf16.mxu0 %v7814_v18  ;;  %8824 = vst [vmem:[#allocation6_spill] sm:$0xff] %v7852_v27  ;;  %v2709_v17 = vsel %vm563_vm2, %v2706_v42, %v2708_v21  ;;  %v2710_v20 = vrot.slane %v2519_v19, 2  ;;  %v2711_v55 = vrot.slane %v2405_v49, 2  ;;  %v7875_v1 = vsel %vm266_vm0, %v2406_v44, %v2407_v32 }
 0x2ee   : > { %3490 = vmatmul.mubr.bf16.gmra.mrb[144].mxu1 %v7697_v61  ;;  %v7878_v50 = vsel %vm266_vm0, %v2344_v11, %v2406_v44  ;;  %v2352_v41 = vrot.slane %v2319_v5, 1  ;;  %v2430_v22 = vrot.slane %v2319_v5, 7  ;;  %v2431_v57 = vrot.slane %v2320_v59, 7 }
 0x2ef   : > { %3497 = vmatprep.mubr.bf16.mxu1 %v7823_v9  ;;  %v2713_v63 = vrot.slane %v2535_v58, 2  ;;  %v2345_v33 = vrot.slane %v2305_v38, 1  ;;  %v7880_v56 = vpack.c.bf16 %v2709_v17, %v2707_v45  ;;  %v2607_v3 = vsel %vm457_vm1, %v2605_v37, %v2606_v48 }
 0x2f0   : > { %v2609_v12 = vsel %vm457_vm1, %v2606_v48, %v2608_v54  ;;  %v2409_v13 = vrot.slane %v2305_v38, 7  ;;  %v2410_v19 = vrot.slane %v2306_v31, 7  ;;  %v7886_v49 = vpack.c.bf16 %v7875_v1, %v7878_v50 }
 0x2f1   : > { %8825 = vst [vmem:[#allocation7_spill] sm:$0xff] %v7880_v56  ;;  %v2536_v2 = vsel %vm266_vm0, %v2407_v32, %v2488_v35  ;;  %v2496_v34 = vrot.slane %v2320_v59, 5  ;;  %v2610_v42 = vrot.slane %v7878_v50, 1  ;;  %v2611_v21 = vrot.slane %v7875_v1, 1 }
 0x2f2   : > { %v2712_v58 = vsel %vm563_vm2, %v2710_v20, %v2711_v55  ;;  %v7894_v11 = vpack.c.bf16 %v2609_v12, %v2607_v3  ;;  %v2714_v44 = vsel %vm563_vm2, %v2711_v55, %v2713_v63  ;;  %v7898_v38 = vsel %vm266_vm0, %v2430_v22, %v2431_v57 }
 0x2f3   : > { %v7901_v32 = vsel %vm266_vm0, %v2352_v41, %v2430_v22  ;;  %v2613_v5 = vrot.slane %v2536_v2, 1  ;;  %v2788_v37 = vrot.slane %v7898_v38, 1  ;;  %v2278_v54 = vmul.f32 %v7559_v29, %v7388_v26 }
 0x2f4   : > { %3659 = vmatmul.mubr.bf16.gmra.mrb[180].mxu0 %v7852_v27  ;;  %8826 = vst [vmem:[#allocation8_spill] sm:$0xff] %v7894_v11  ;;  %v2787_v59 = vrot.slane %v7901_v32, 1  ;;  %v2794_v48 = vrot.slane %v7901_v32, 2  ;;  %v2308_v35 = vmax.f32 %v7845_v23, 0.0  ;;  %v2489_v45 = vrot.slane %v2306_v31, 5 }
 0x2f5   : > { %3666 = vmatprep.mubr.bf16.mxu0 %v7857_v8  ;;  %v2795_v17 = vrot.slane %v7898_v38, 2  ;;  %v2346_v20 = vrot.slane %v2307_v47, 1  ;;  %v2715_v55 = vrot.slane %v7878_v50, 2  ;;  %v2411_v41 = vsel %vm266_vm0, %v2409_v13, %v2410_v19 }
 0x2f6   : > { %3498 = vmatmul.mubr.bf16.gmra.mrb[148].mxu1 %v7756_v6  ;;  %v2521_v22 = vsel %vm266_vm0, %v2345_v33, %v2409_v13  ;;  %v7915_v63 = vpack.c.bf16 %v2714_v44, %v2712_v58  ;;  %v2612_v3 = vsel %vm457_vm1, %v2610_v42, %v2611_v21  ;;  %v2544_v26 = vsel %vm266_vm0, %v2431_v57, %v2496_v34 }
 0x2f7   : > { %3505 = vmatprep.mubr.bf16.mxu1 %v7866_v53  ;;  %v2789_v23 = vsel %vm457_vm1, %v2787_v59, %v2788_v37  ;;  %v2614_v31 = vsel %vm457_vm1, %v2611_v21, %v2613_v5  ;;  %v2790_v12 = vrot.slane %v2544_v26, 1  ;;  %v2716_v50 = vrot.slane %v7875_v1, 2 }
 0x2f8   : > { %v2718_v27 = vrot.slane %v2536_v2, 2  ;;  %v2537_v33 = vsel %vm266_vm0, %v2410_v19, %v2489_v45  ;;  %v2412_v13 = vrot.slane %v2307_v47, 7  ;;  %v2413_v58 = vrot.slane %v2308_v35, 7 }
 0x2f9   : > { %v2791_v57 = vsel %vm457_vm1, %v2788_v37, %v2790_v12  ;;  %v7930_v42 = vpack.c.bf16 %v2614_v31, %v2612_v3  ;;  %v2615_v2 = vrot.slane %v2521_v22, 1  ;;  %v2616_v19 = vrot.slane %v2411_v41, 1 }
 0x2fa   : > { %v7932_v21 = vpack.c.bf16 %v2791_v57, %v2789_v23  ;;  %v2618_v47 = vrot.slane %v2537_v33, 1  ;;  %v2490_v44 = vrot.slane %v2308_v35, 5  ;;  %v2717_v5 = vsel %vm563_vm2, %v2715_v55, %v2716_v50 }
 0x2fb   : > { %v2309_v59 = vmax.f32 %v7862_v25, 0.0  ;;  %v2310_v37 = vmax.f32 %v2278_v54, 0.0  ;;  %v2279_v45 = vmul.f32 %v7559_v29, %v7392_v30  ;;  %v2617_v35 = vsel %vm457_vm1, %v2615_v2, %v2616_v19 }
 0x2fc   : > { %3667 = vmatmul.mubr.bf16.gmra.mrb[184].mxu0 %v7880_v56  ;;  %v2796_v56 = vsel %vm563_vm2, %v2794_v48, %v2795_v17  ;;  %v2414_v48 = vsel %vm266_vm0, %v2412_v13, %v2413_v58  ;;  %v2721_v55 = vrot.slane %v2411_v41, 2  ;;  %v2538_v25 = vsel %vm266_vm0, %v2413_v58, %v2490_v44 }
 0x2fd   : > { %3674 = vmatprep.mubr.bf16.mxu0 %v7886_v49  ;;  %v2280_v54 = vmul.f32 %v7559_v29, %v7396_v43  ;;  %v2415_v31 = vrot.slane %v2309_v59, 7  ;;  %v2416_v12 = vrot.slane %v2310_v37, 7  ;;  %v2311_v58 = vmax.f32 %v2279_v45, 0.0 }
 0x2fe   : > { %3506 = vmatmul.mubr.bf16.gmra.mrb[152].mxu1 %v7814_v18  ;;  %v7923_v18 = vpack.c.bf16 %v2411_v41, %v2521_v22 }
 0x2ff   : > { %3513 = vmatprep.mubr.bf16.mxu1 %v7894_v11  ;;  %v2797_v11 = vrot.slane %v2544_v26, 2  ;;  %v2619_v26 = vsel %vm457_vm1, %v2616_v19, %v2618_v47  ;;  %v2312_v57 = vmax.f32 %v2280_v54, 0.0  ;;  %v2281_v19 = vmul.f32 %v7559_v29, %v7403_v51 }
 0x300   : > { %v7956_v30 = vpack.c.bf16 %v2619_v26, %v2617_v35  ;;  %v2282_v35 = vmul.f32 %v7559_v29, %v7407_v62  ;;  %v2348_v26 = vrot.slane %v2311_v58, 1 }
 0x301   : > { %v2798_v34 = vsel %vm563_vm2, %v2795_v17, %v2797_v11  ;;  %v2719_v11 = vsel %vm563_vm2, %v2716_v50, %v2718_v27  ;;  %v2720_v17 = vrot.slane %v2521_v22, 2  ;;  %v2723_v27 = vrot.slane %v2537_v33, 2 }
 0x302   : > { %v7934_v1 = vpack.c.bf16 %v2798_v34, %v2796_v56  ;;  %v2522_v56 = vsel %vm266_vm0, %v2346_v20, %v2412_v13  ;;  %v7945_v3 = vpack.c.bf16 %v2719_v11, %v2717_v5  ;;  %v2347_v20 = vrot.slane %v2309_v59, 1 }
 0x303   : > { %v7949_v23 = vpack.c.bf16 %v2414_v48, %v2522_v56  ;;  %v2620_v41 = vrot.slane %v2522_v56, 1  ;;  %v2621_v22 = vrot.slane %v2414_v48, 1  ;;  %v2623_v50 = vrot.slane %v2538_v25, 1 }
 0x304   : > { %3675 = vmatmul.mubr.bf16.gmra.mrb[188].mxu0 %v7915_v63  ;;  %v2491_v33 = vrot.slane %v2310_v37, 5  ;;  %v2722_v13 = vsel %vm563_vm2, %v2720_v17, %v2721_v55  ;;  %v2724_v43 = vsel %vm563_vm2, %v2721_v55, %v2723_v27  ;;  %v2417_v34 = vsel %vm266_vm0, %v2415_v31, %v2416_v12 }
 0x305   : > { %3682 = vmatprep.mubr.bf16.mxu0 %v7923_v18  ;;  %v2523_v2 = vsel %vm266_vm0, %v2347_v20, %v2415_v31  ;;  %v2725_v47 = vrot.slane %v2522_v56, 2  ;;  %v7966_v44 = vpack.c.bf16 %v2724_v43, %v2722_v13  ;;  %v2622_v5 = vsel %vm457_vm1, %v2620_v41, %v2621_v22 }
 0x306   : > { %3514 = vmatmul.mubr.bf16.gmra.mrb[156].mxu1 %v7857_v8  ;;  %v2624_v11 = vsel %vm457_vm1, %v2621_v22, %v2623_v50  ;;  %v2726_v59 = vrot.slane %v2414_v48, 2  ;;  %v7970_v37 = vpack.c.bf16 %v2417_v34, %v2523_v2  ;;  %v2728_v17 = vrot.slane %v2538_v25, 2 }
 0x307   : > { %3521 = vmatprep.mubr.bf16.mxu1 %v7930_v42  ;;  %v2539_v45 = vsel %vm266_vm0, %v2416_v12, %v2491_v33  ;;  %v2418_v55 = vrot.slane %v2311_v58, 7  ;;  %v2419_v27 = vrot.slane %v2312_v57, 7  ;;  %v7977_v51 = vpack.c.bf16 %v2624_v11, %v2622_v5 }
 0x308   : > { %v2625_v48 = vrot.slane %v2523_v2, 1  ;;  %v2626_v56 = vrot.slane %v2417_v34, 1  ;;  %v2628_v54 = vrot.slane %v2539_v45, 1  ;;  %v2492_v25 = vrot.slane %v2312_v57, 5 }
 0x309   : > { %v2727_v20 = vsel %vm563_vm2, %v2725_v47, %v2726_v59  ;;  %v2729_v62 = vsel %vm563_vm2, %v2726_v59, %v2728_v17  ;;  %v2313_v31 = vmax.f32 %v2281_v19, 0.0  ;;  %v2314_v12 = vmax.f32 %v2282_v35, 0.0 }
 0x30a   : > { %v2420_v41 = vsel %vm266_vm0, %v2418_v55, %v2419_v27  ;;  %v2524_v22 = vsel %vm266_vm0, %v2348_v26, %v2418_v55  ;;  %v2283_v50 = vmul.f32 %v7559_v29, %v7411_v60  ;;  %v2730_v33 = vrot.slane %v2523_v2, 2 }
 0x30b   : > { %v7987_v13 = vpack.c.bf16 %v2729_v62, %v2727_v20  ;;  %v2627_v43 = vsel %vm457_vm1, %v2625_v48, %v2626_v56  ;;  %v2629_v58 = vsel %vm457_vm1, %v2626_v56, %v2628_v54  ;;  %v2731_v57 = vrot.slane %v2417_v34, 2 }
 0x30c   : > { %3683 = vmatmul.mubr.bf16.gmra.mrb[192].mxu0 %v7945_v3  ;;  %v7991_v47 = vpack.c.bf16 %v2420_v41, %v2524_v22  ;;  %v2733_v5 = vrot.slane %v2539_v45, 2  ;;  %v2540_v19 = vsel %vm266_vm0, %v2419_v27, %v2492_v25  ;;  %v2284_v11 = vmul.f32 %v7559_v29, %v7415_v36 }
 0x30d   : > { %3690 = vmatprep.mubr.bf16.mxu0 %v7949_v23  ;;  %v2349_v59 = vrot.slane %v2313_v31, 1  ;;  %v2421_v17 = vrot.slane %v2313_v31, 7  ;;  %v2422_v35 = vrot.slane %v2314_v12, 7  ;;  %v7998_v60 = vpack.c.bf16 %v2629_v58, %v2627_v43 }
 0x30e   : > { %3522 = vmatmul.mubr.bf16.gmra.mrb[160].mxu1 %v7886_v49  ;;  %v2630_v34 = vrot.slane %v2524_v22, 1  ;;  %v2631_v2 = vrot.slane %v2420_v41, 1  ;;  %v2633_v26 = vrot.slane %v2540_v19, 1  ;;  %v2493_v45 = vrot.slane %v2314_v12, 5 }
 0x30f   : > { %3529 = vmatprep.mubr.bf16.mxu1 %v7956_v30  ;;  %v2732_v55 = vsel %vm563_vm2, %v2730_v33, %v2731_v57  ;;  %v2734_v36 = vsel %vm563_vm2, %v2731_v57, %v2733_v5  ;;  %v2315_v27 = vmax.f32 %v2283_v50, 0.0  ;;  %v2316_v48 = vmax.f32 %v2284_v11, 0.0 }
 0x310   : > { %v2423_v56 = vsel %vm266_vm0, %v2421_v17, %v2422_v35  ;;  %v2525_v54 = vsel %vm266_vm0, %v2349_v59, %v2421_v17  ;;  %v2286_v25 = vmul.f32 %v7559_v29, %v7423_v10  ;;  %v2735_v20 = vrot.slane %v2524_v22, 2 }
 0x311   : > { %v8008_v62 = vpack.c.bf16 %v2734_v36, %v2732_v55  ;;  %v2632_v31 = vsel %vm457_vm1, %v2630_v34, %v2631_v2  ;;  %v2634_v12 = vsel %vm457_vm1, %v2631_v2, %v2633_v26  ;;  %v2736_v43 = vrot.slane %v2420_v41, 2 }
 0x312   : > { %v8012_v33 = vpack.c.bf16 %v2423_v56, %v2525_v54  ;;  %v2738_v58 = vrot.slane %v2540_v19, 2  ;;  %v2541_v50 = vsel %vm266_vm0, %v2422_v35, %v2493_v45  ;;  %v2285_v57 = vmul.f32 %v7559_v29, %v7419_v46 }
 0x313   : > { %v2350_v5 = vrot.slane %v2315_v27, 1  ;;  %v2424_v11 = vrot.slane %v2315_v27, 7  ;;  %v2425_v59 = vrot.slane %v2316_v48, 7  ;;  %v8019_v10 = vpack.c.bf16 %v2634_v12, %v2632_v31 }
 0x314   : > { %3691 = vmatmul.mubr.bf16.gmra.mrb[196].mxu0 %v7966_v44  ;;  %v2635_v41 = vrot.slane %v2525_v54, 1  ;;  %v2636_v22 = vrot.slane %v2423_v56, 1  ;;  %v2638_v17 = vrot.slane %v2541_v50, 1  ;;  %v2494_v19 = vrot.slane %v2316_v48, 5 }
 0x315   : > { %3698 = vmatprep.mubr.bf16.mxu0 %v7970_v37  ;;  %v2737_v35 = vsel %vm563_vm2, %v2735_v20, %v2736_v43  ;;  %v2739_v46 = vsel %vm563_vm2, %v2736_v43, %v2738_v58  ;;  %v2318_v29 = vmax.f32 %v2286_v25, 0.0  ;;  %v2317_v34 = vmax.f32 %v2285_v57, 0.0 }
 0x316   : > { %3530 = vmatmul.mubr.bf16.gmra.mrb[164].mxu1 %v7923_v18  ;;  %v2426_v2 = vsel %vm266_vm0, %v2424_v11, %v2425_v59  ;;  %v2526_v26 = vsel %vm266_vm0, %v2350_v5, %v2424_v11  ;;  %v2740_v45 = vrot.slane %v2525_v54, 2  ;;  %v8027_v55 = vpack.c.bf16 %v2739_v46, %v2737_v35 }
 0x317   : > { %3537 = vmatprep.mubr.bf16.mxu1 %v7977_v51  ;;  %v2637_v36 = vsel %vm457_vm1, %v2635_v41, %v2636_v22  ;;  %v2639_v27 = vsel %vm457_vm1, %v2636_v22, %v2638_v17  ;;  %v2741_v48 = vrot.slane %v2423_v56, 2  ;;  %v8031_v31 = vpack.c.bf16 %v2426_v2, %v2526_v26 }
 0x318   : > { %v2743_v12 = vrot.slane %v2541_v50, 2  ;;  %v2542_v20 = vsel %vm266_vm0, %v2425_v59, %v2494_v19  ;;  %v2428_v43 = vrot.slane %v2318_v29, 7  ;;  %v2351_v25 = vrot.slane %v2317_v34, 1 }
 0x319   : > { %v2427_v58 = vrot.slane %v2317_v34, 7  ;;  %v8036_v54 = vpack.c.bf16 %v2639_v27, %v2637_v36  ;;  %v2495_v57 = vrot.slane %v2318_v29, 5  ;;  %v2640_v5 = vrot.slane %v2526_v26, 1 }
 0x31a   : > { %v2641_v11 = vrot.slane %v2426_v2, 1  ;;  %v2643_v56 = vrot.slane %v2542_v20, 1  ;;  %v2742_v50 = vsel %vm563_vm2, %v2740_v45, %v2741_v48  ;;  %v2744_v59 = vsel %vm563_vm2, %v2741_v48, %v2743_v12 }
 0x31b   : > { %v2429_v41 = vsel %vm266_vm0, %v2427_v58, %v2428_v43  ;;  %v2527_v22 = vsel %vm266_vm0, %v2351_v25, %v2427_v58  ;;  %v2543_v17 = vsel %vm266_vm0, %v2428_v43, %v2495_v57  ;;  %v8045_v19 = vpack.c.bf16 %v2744_v59, %v2742_v50 }
 0x31c   : > { %3699 = vmatmul.mubr.bf16.gmra.mrb[200].mxu0 %v7987_v13  ;;  %v2642_v35 = vsel %vm457_vm1, %v2640_v5, %v2641_v11  ;;  %v2644_v46 = vsel %vm457_vm1, %v2641_v11, %v2643_v56  ;;  %v2745_v29 = vrot.slane %v2526_v26, 2  ;;  %v2746_v34 = vrot.slane %v2426_v2, 2 }
 0x31d   : > { %3706 = vmatprep.mubr.bf16.mxu0 %v7991_v47  ;;  %v8049_v36 = vpack.c.bf16 %v2429_v41, %v2527_v22  ;;  %v2748_v27 = vrot.slane %v2542_v20, 2  ;;  %v8053_v45 = vpack.c.bf16 %v2644_v46, %v2642_v35  ;;  %v2648_v48 = vrot.slane %v2543_v17, 1 }
 0x31e   : > { %3538 = vmatmul.mubr.bf16.gmra.mrb[168].mxu1 %v7949_v23  ;;  %v2645_v12 = vrot.slane %v2527_v22, 1  ;;  %v2646_v43 = vrot.slane %v2429_v41, 1  ;;  %v2747_v25 = vsel %vm563_vm2, %v2745_v29, %v2746_v34  ;;  %v2753_v57 = vrot.slane %v2543_v17, 2 }
 0x31f   : > { %3545 = vmatprep.mubr.bf16.mxu1 %v7998_v60  ;;  %v2749_v2 = vsel %vm563_vm2, %v2746_v34, %v2748_v27  ;;  %v2750_v5 = vrot.slane %v2527_v22, 2  ;;  %v2751_v11 = vrot.slane %v2429_v41, 2  ;;  %v8065_v56 = vpack.c.bf16 %v7898_v38, %v7901_v32  ;;  %v5920_v38 = vld [vmem:[%s8764_s2 + $0x208] sm:$0xff]   ;;  %v5921_v32 = vld [vmem:[%s8764_s2 + $0x210] sm:$0xff]  }
 0x320   : > { %v8059_v26 = vpack.c.bf16 %v2749_v2, %v2747_v25  ;;  %v2647_v20 = vsel %vm457_vm1, %v2645_v12, %v2646_v43  ;;  %v2649_v58 = vsel %vm457_vm1, %v2646_v43, %v2648_v48 }
 0x321   : > { %v8069_v50 = vpack.c.bf16 %v2649_v58, %v2647_v20  ;;  %v2752_v59 = vsel %vm563_vm2, %v2750_v5, %v2751_v11  ;;  %v2754_v17 = vsel %vm563_vm2, %v2751_v11, %v2753_v57 }
 0x322   : > { %v8075_v22 = vpack.c.bf16 %v2754_v17, %v2752_v59 }
 0x324   : > { %3707 = vmatmul.mubr.bf16.gmra.mrb[204].mxu0 %v8008_v62 }
 0x325   : > { %3714 = vmatprep.mubr.bf16.mxu0 %v8012_v33 }
 0x326   : > { %3546 = vmatmul.mubr.bf16.gmra.mrb[172].mxu1 %v7970_v37 }
 0x327   : > { %3553 = vmatprep.mubr.bf16.mxu1 %v8019_v10 }
 0x32c   : > { %3715 = vmatmul.mubr.bf16.gmra.mrb[208].mxu0 %v8027_v55 }
 0x32d   : > { %3722 = vmatprep.mubr.bf16.mxu0 %v8031_v31 }
 0x32e   : > { %3554 = vmatmul.mubr.bf16.gmra.mrb[176].mxu1 %v7991_v47 }
 0x32f   : > { %3561 = vmatprep.mubr.bf16.mxu1 %v8036_v54 }
 0x334   : > { %3723 = vmatmul.mubr.bf16.gmra.mrb[212].mxu0 %v8045_v19 }
 0x335   : > { %3730 = vmatprep.mubr.bf16.mxu0 %v8049_v36 }
 0x336   : > { %3562 = vmatmul.mubr.bf16.gmra.mrb[180].mxu1 %v8012_v33 }
 0x337   : > { %3569 = vmatprep.mubr.bf16.mxu1 %v8053_v45 }
 0x33c   : > { %3731 = vmatmul.mubr.bf16.gmra.mrb[216].mxu0 %v8059_v26 }
 0x33d   : > { %3738 = vmatprep.mubr.bf16.mxu0 %v8065_v56 }
 0x33e   : > { %3570 = vmatmul.mubr.bf16.gmra.mrb[184].mxu1 %v8031_v31 }
 0x33f   : > { %3577 = vmatprep.mubr.bf16.mxu1 %v8069_v50 }
 0x344   : > { %3739 = vmatmul.mubr.bf16.gmra.mrb[220].mxu0 %v8075_v22 }
 0x345   : > { %3940 = vmatprep.mubr.bf16.mxu0 %v7594_v24 }
 0x346   : > { %3578 = vmatmul.mubr.bf16.gmra.mrb[188].mxu1 %v8049_v36 }
 0x347   : > { %3779 = vmatprep.mubr.bf16.mxu1 %v7637_v28  ;;  %v5924_v28 = vld [vmem:[%s8764_s2 + $0x228] sm:$0xff]  }
 0x34c   : > { %3941 = vmatmul.mubr.bf16.vlgmr.msra.gmra.mrb[224].mxu0 %v7596_v14  ;;  %v5922_v14 = vld [vmem:[%s8764_s2 + $0x218] sm:$0xff]  }
 0x34d   : > { %3948 = vmatprep.mubr.bf16.mxu0 %v7713_v52 }
 0x34e   : > { %3780 = vmatmul.mubr.bf16.vlgmr.msra.gmra.mrb[192].mxu1 %v7608_v4  ;;  %v5923_v4 = vld [vmem:[%s8764_s2 + $0x220] sm:$0xff]  }
 0x34f   : > { %3787 = vmatprep.mubr.bf16.mxu1 %v7592_v0  ;;  %5695 = vmatpush3.bf16.msra.mxu1 %v7799_v40  ;;  %v8829_v40 = vld [vmem:[#allocation8_spill] sm:$0xff] }
 0x350   : > { %5696 = vmatprep.subr.bf16.mxu1 %v5920_v38 }
 0x353   : > { %5697 = vmatpush3.bf16.msra.mxu1 %v5920_v38 }
 0x354   : > { %3949 = vmatmul.mubr.bf16.gmra.mrb[228].mxu0 %v7646_v15  ;;  %5698 = vmatprep.subr.bf16.mxu1 %v5921_v32  ;;  %v5926_v15 = vld [vmem:[%s8764_s2 + $0x238] sm:$0xff]  }
 0x355   : > { %3956 = vmatprep.mubr.bf16.mxu0 %v7772_v39 }
 0x356   : > { %3788 = vmatmul.mubr.bf16.gmra.mrb[196].mxu1 %v7594_v24  ;;  %v5925_v24 = vld [vmem:[%s8764_s2 + $0x230] sm:$0xff]  }
 0x357   : > { %3795 = vmatprep.mubr.bf16.mxu1 %v7746_v16  ;;  %5699 = vmatpush3.bf16.msra.mxu1 %v5921_v32 }
 0x358   : > { %5700 = vmatprep.subr.bf16.mxu1 %v5922_v14 }
 0x35b   : > { %5701 = vmatpush3.bf16.msra.mxu1 %v5922_v14 }
 0x35c   : > { %3957 = vmatmul.mubr.bf16.gmra.mrb[232].mxu0 %v7697_v61  ;;  %5702 = vmatprep.subr.bf16.mxu1 %v5923_v4  ;;  %v8827_v61 = vld [vmem:[#allocation6_spill] sm:$0xff] }
 0x35d   : > { %3964 = vmatprep.mubr.bf16.mxu0 %v7823_v9 }
 0x35e   : > { %3796 = vmatmul.mubr.bf16.gmra.mrb[200].mxu1 %v7713_v52  ;;  %v8828_v52 = vld [vmem:[#allocation5_spill] sm:$0xff] }
 0x35f   : > { %3803 = vmatprep.mubr.bf16.mxu1 %v7807_v7  ;;  %5703 = vmatpush3.bf16.msra.mxu1 %v5923_v4 }
 0x360   : > { %5704 = vmatprep.subr.bf16.mxu1 %v5924_v28 }
 0x363   : > { %5705 = vmatpush3.bf16.msra.mxu1 %v5924_v28 }
 0x364   : > { %3965 = vmatmul.mubr.bf16.gmra.mrb[236].mxu0 %v7756_v6  ;;  %5706 = vmatprep.subr.bf16.mxu1 %v5925_v24  ;;  %v8830_v6 = vld [vmem:[#allocation7_spill] sm:$0xff] }
 0x365   : > { %3972 = vmatprep.mubr.bf16.mxu0 %v7866_v53 }
 0x366   : > { %3804 = vmatmul.mubr.bf16.gmra.mrb[204].mxu1 %v7772_v39 }
 0x367   : > { %3811 = vmatprep.mubr.bf16.mxu1 %v8827_v61  ;;  %5707 = vmatpush3.bf16.msra.mxu1 %v5925_v24 }
 0x368   : > { %5708 = vmatprep.subr.bf16.mxu1 %v5926_v15 }
 0x36b   : > { %5709 = vmatpush3.bf16.msra.mxu1 %v5926_v15 }
 0x36c   : > { %3973 = vmatmul.mubr.bf16.gmra.mrb[240].mxu0 %v8828_v52 }
 0x36d   : > { %3980 = vmatprep.mubr.bf16.mxu0 %v8829_v40 }
 0x36e   : > { %3812 = vmatmul.mubr.bf16.gmra.mrb[208].mxu1 %v7823_v9 }
 0x36f   : > { %3819 = vmatprep.mubr.bf16.mxu1 %v8830_v6 }
 0x374   : > { %3981 = vmatmul.mubr.bf16.gmra.mrb[244].mxu0 %v7857_v8 }
 0x375   : > { %3988 = vmatprep.mubr.bf16.mxu0 %v7930_v42 }
 0x376   : > { %3820 = vmatmul.mubr.bf16.gmra.mrb[212].mxu1 %v7866_v53 }
 0x377   : > { %3827 = vmatprep.mubr.bf16.mxu1 %v7915_v63 }
 0x37c   : > { %3989 = vmatmul.mubr.bf16.gmra.mrb[248].mxu0 %v7886_v49 }
 0x37d   : > { %3996 = vmatprep.mubr.bf16.mxu0 %v7956_v30 }
 0x37e   : > { %3828 = vmatmul.mubr.bf16.gmra.mrb[216].mxu1 %v8829_v40 }
 0x37f   : > { %3835 = vmatprep.mubr.bf16.mxu1 %v7945_v3 }
 0x384   : > { %3997 = vmatmul.mubr.bf16.gmra.mrb[252].mxu0 %v7923_v18 }
 0x385   : > { %4004 = vmatprep.mubr.bf16.mxu0 %v7977_v51 }
 0x386   : > { %3836 = vmatmul.mubr.bf16.gmra.mrb[220].mxu1 %v7930_v42 }
 0x387   : > { %3843 = vmatprep.mubr.bf16.mxu1 %v7966_v44 }
 0x38c   : > { %4005 = vmatmul.mubr.bf16.gmra.mrb[0].mxu0 %v7949_v23 }
 0x38d   : > { %4012 = vmatprep.mubr.bf16.mxu0 %v7998_v60 }
 0x38e   : > { %3844 = vmatmul.mubr.bf16.gmra.mrb[224].mxu1 %v7956_v30 }
 0x38f   : > { %3851 = vmatprep.mubr.bf16.mxu1 %v7987_v13 }
 0x394   : > { %4013 = vmatmul.mubr.bf16.gmra.mrb[4].mxu0 %v7970_v37 }
 0x395   : > { %4020 = vmatprep.mubr.bf16.mxu0 %v8019_v10 }
 0x396   : > { %3852 = vmatmul.mubr.bf16.gmra.mrb[228].mxu1 %v7977_v51 }
 0x397   : > { %3859 = vmatprep.mubr.bf16.mxu1 %v8008_v62 }
 0x39c   : > { %4021 = vmatmul.mubr.bf16.gmra.mrb[8].mxu0 %v7991_v47 }
 0x39d   : > { %4028 = vmatprep.mubr.bf16.mxu0 %v8036_v54 }
 0x39e   : > { %3860 = vmatmul.mubr.bf16.gmra.mrb[232].mxu1 %v7998_v60 }
 0x39f   : > { %3867 = vmatprep.mubr.bf16.mxu1 %v8027_v55  ;;  %v5302_v39 = vpop.f32.mrb[160].mxu0 }
 0x3a0   : > { %v5303_v18 = vpop.f32.mrb[161].mxu0 }
 0x3a1   : > { %v5190_v9 = vpop.f32.mrb[128].mxu1  ;;  %v5304_v8 = vadd.f32 %v5303_v18, %v5302_v39  ;;  %v5305_v53 = vpop.f32.mrb[162].mxu0 }
 0x3a2   : > { %v5191_v49 = vpop.f32.mrb[129].mxu1  ;;  %v5306_v42 = vpop.f32.mrb[163].mxu0 }
 0x3a3   : > { %v5192_v23 = vadd.f32 %v5191_v49, %v5190_v9  ;;  %v5193_v30 = vpop.f32.mrb[130].mxu1  ;;  %v5307_v37 = vadd.f32 %v5306_v42, %v5305_v53 }
 0x3a4   : > { %v5194_v51 = vpop.f32.mrb[131].mxu1  ;;  %4029 = vmatmul.mubr.bf16.gmra.mrb[12].mxu0 %v8012_v33 }
 0x3a5   : > { %v8148_v47 = vadd.f32 %v5304_v8, %v5192_v23  ;;  %v5195_v41 = vadd.f32 %v5194_v51, %v5193_v30  ;;  %4036 = vmatprep.mubr.bf16.mxu0 %v8053_v45 }
 0x3a6   : > { %3868 = vmatmul.mubr.bf16.gmra.mrb[236].mxu1 %v8019_v10 }
 0x3a7   : > { %v8152_v60 = vadd.f32 %v5307_v37, %v5195_v41  ;;  %3875 = vmatprep.mubr.bf16.mxu1 %v8045_v19  ;;  %v5308_v35 = vpop.f32.mrb[164].mxu0 }
 0x3a8   : > { %v5309_v46 = vpop.f32.mrb[165].mxu0 }
 0x3a9   : > { %v5196_v29 = vpop.f32.mrb[132].mxu1  ;;  %v5310_v34 = vadd.f32 %v5309_v46, %v5308_v35  ;;  %v5311_v27 = vpop.f32.mrb[166].mxu0 }
 0x3aa   : > { %v5197_v48 = vpop.f32.mrb[133].mxu1  ;;  %v5312_v12 = vpop.f32.mrb[167].mxu0 }
 0x3ab   : > { %v5198_v43 = vadd.f32 %v5197_v48, %v5196_v29  ;;  %v5199_v33 = vpop.f32.mrb[134].mxu1  ;;  %v5313_v25 = vadd.f32 %v5312_v12, %v5311_v27 }
 0x3ac   : > { %v5200_v2 = vpop.f32.mrb[135].mxu1  ;;  %4037 = vmatmul.mubr.bf16.gmra.mrb[16].mxu0 %v8031_v31 }
 0x3ad   : > { %v8156_v20 = vadd.f32 %v5310_v34, %v5198_v43  ;;  %v5201_v10 = vadd.f32 %v5200_v2, %v5199_v33  ;;  %4044 = vmatprep.mubr.bf16.mxu0 %v8069_v50 }
 0x3ae   : > { %3876 = vmatmul.mubr.bf16.gmra.mrb[240].mxu1 %v8036_v54 }
 0x3af   : > { %v8160_v58 = vadd.f32 %v5313_v25, %v5201_v10  ;;  %3883 = vmatprep.mubr.bf16.mxu1 %v8059_v26  ;;  %v5314_v57 = vpop.f32.mrb[168].mxu0 }
 0x3b0   : > { %v5315_v5 = vpop.f32.mrb[169].mxu0 }
 0x3b1   : > { %v5202_v11 = vpop.f32.mrb[136].mxu1  ;;  %v5316_v59 = vadd.f32 %v5315_v5, %v5314_v57  ;;  %v5317_v17 = vpop.f32.mrb[170].mxu0 }
 0x3b2   : > { %v5203_v38 = vpop.f32.mrb[137].mxu1  ;;  %v5318_v32 = vpop.f32.mrb[171].mxu0 }
 0x3b3   : > { %v5204_v14 = vadd.f32 %v5203_v38, %v5202_v11  ;;  %v5205_v31 = vpop.f32.mrb[138].mxu1  ;;  %v5319_v4 = vadd.f32 %v5318_v32, %v5317_v17 }
 0x3b4   : > { %v5206_v28 = vpop.f32.mrb[139].mxu1  ;;  %4045 = vmatmul.mubr.bf16.gmra.mrb[20].mxu0 %v8049_v36 }
 0x3b5   : > { %v8164_v24 = vadd.f32 %v5316_v59, %v5204_v14  ;;  %v5207_v54 = vadd.f32 %v5206_v28, %v5205_v31  ;;  %4052 = vmatprep.mubr.bf16.mxu0 %v7932_v21 }
 0x3b6   : > { %3884 = vmatmul.mubr.bf16.gmra.mrb[244].mxu1 %v8053_v45 }
 0x3b7   : > { %v8168_v15 = vadd.f32 %v5319_v4, %v5207_v54  ;;  %3891 = vmatprep.mubr.bf16.mxu1 %v8075_v22  ;;  %v5320_v52 = vpop.f32.mrb[172].mxu0 }
 0x3b8   : > { %v5321_v40 = vpop.f32.mrb[173].mxu0 }
 0x3b9   : > { %v5208_v39 = vpop.f32.mrb[140].mxu1  ;;  %v5322_v18 = vadd.f32 %v5321_v40, %v5320_v52  ;;  %v5323_v9 = vpop.f32.mrb[174].mxu0 }
 0x3ba   : > { %v5209_v8 = vpop.f32.mrb[141].mxu1  ;;  %v5324_v53 = vpop.f32.mrb[175].mxu0 }
 0x3bb   : > { %v5210_v49 = vadd.f32 %v5209_v8, %v5208_v39  ;;  %v5211_v42 = vpop.f32.mrb[142].mxu1  ;;  %v5325_v23 = vadd.f32 %v5324_v53, %v5323_v9 }
 0x3bc   : > { %v5212_v30 = vpop.f32.mrb[143].mxu1  ;;  %4053 = vmatmul.mubr.bf16.gmra.mrb[24].mxu0 %v8065_v56 }
 0x3bd   : > { %v8172_v37 = vadd.f32 %v5322_v18, %v5210_v49  ;;  %v5213_v45 = vadd.f32 %v5212_v30, %v5211_v42  ;;  %4060 = vmatprep.mubr.bf16.mxu0 %v8069_v50 }
 0x3be   : > { %3892 = vmatmul.mubr.bf16.gmra.mrb[248].mxu1 %v8069_v50 }
 0x3bf   : > { %v8176_v51 = vadd.f32 %v5325_v23, %v5213_v45  ;;  %3899 = vmatprep.mubr.bf16.mxu1 %v7934_v1  ;;  %v5326_v41 = vpop.f32.mrb[176].mxu0 }
 0x3c0   : > { %v5327_v35 = vpop.f32.mrb[177].mxu0 }
 0x3c1   : > { %v5214_v46 = vpop.f32.mrb[144].mxu1  ;;  %v5328_v29 = vadd.f32 %v5327_v35, %v5326_v41  ;;  %v5329_v34 = vpop.f32.mrb[178].mxu0 }
 0x3c2   : > { %v5215_v27 = vpop.f32.mrb[145].mxu1  ;;  %v5330_v48 = vpop.f32.mrb[179].mxu0 }
 0x3c3   : > { %v5216_v12 = vadd.f32 %v5215_v27, %v5214_v46  ;;  %v5217_v56 = vpop.f32.mrb[146].mxu1  ;;  %v5331_v43 = vadd.f32 %v5330_v48, %v5329_v34 }
 0x3c4   : > { %v5218_v33 = vpop.f32.mrb[147].mxu1  ;;  %4061 = vmatmul.mubr.bf16.gmra.mrb[28].mxu0 %v8049_v36 }
 0x3c5   : > { %v8180_v25 = vadd.f32 %v5328_v29, %v5216_v12  ;;  %v5219_v50 = vadd.f32 %v5218_v33, %v5217_v56 }
 0x3c6   : > { %3900 = vmatmul.mubr.bf16.gmra.mrb[252].mxu1 %v7932_v21 }
 0x3c7   : > { %v8183_v2 = vadd.f32 %v5331_v43, %v5219_v50  ;;  %5710 = vmatprep.mubr.bf16.mxu1 %v7592_v0  ;;  %v5332_v10 = vpop.f32.mrb[180].mxu0 }
 0x3c8   : > { %v5333_v57 = vpop.f32.mrb[181].mxu0 }
 0x3c9   : > { %v5220_v5 = vpop.f32.mrb[148].mxu1  ;;  %v5334_v11 = vadd.f32 %v5333_v57, %v5332_v10  ;;  %v5335_v59 = vpop.f32.mrb[182].mxu0 }
 0x3ca   : > { %v5221_v17 = vpop.f32.mrb[149].mxu1  ;;  %v5336_v38 = vpop.f32.mrb[183].mxu0 }
 0x3cb   : > { %v5222_v32 = vadd.f32 %v5221_v17, %v5220_v5  ;;  %v5223_v14 = vpop.f32.mrb[150].mxu1  ;;  %v5337_v31 = vadd.f32 %v5336_v38, %v5335_v59 }
 0x3cc   : > { %v5224_v36 = vpop.f32.mrb[151].mxu1 }
 0x3cd   : > { %v8186_v4 = vadd.f32 %v5334_v11, %v5222_v32  ;;  %v5225_v28 = vadd.f32 %v5224_v36, %v5223_v14 }
 0x3ce   : > { %5711 = vmatmul.mubr.bf16.vlgmr.msra.gmra.mrb[0].mxu1 %v7746_v16 }
 0x3cf   : > { %v8189_v21 = vadd.f32 %v5337_v31, %v5225_v28  ;;  %5714 = vmatprep.mubr.bf16.mxu1 %v7807_v7  ;;  %v5338_v0 = vpop.f32.mrb[184].mxu0 }
 0x3d0   : > { %v5339_v54 = vpop.f32.mrb[185].mxu0 }
 0x3d1   : > { %v5226_v52 = vpop.f32.mrb[152].mxu1  ;;  %v5340_v40 = vadd.f32 %v5339_v54, %v5338_v0  ;;  %v5341_v39 = vpop.f32.mrb[186].mxu0 }
 0x3d2   : > { %v5227_v18 = vpop.f32.mrb[153].mxu1  ;;  %v5342_v9 = vpop.f32.mrb[187].mxu0 }
 0x3d3   : > { %v5228_v8 = vadd.f32 %v5227_v18, %v5226_v52  ;;  %v5229_v53 = vpop.f32.mrb[154].mxu1  ;;  %v5343_v49 = vadd.f32 %v5342_v9, %v5341_v39 }
 0x3d4   : > { %v5230_v42 = vpop.f32.mrb[155].mxu1 }
 0x3d5   : > { %v8192_v23 = vadd.f32 %v5340_v40, %v5228_v8  ;;  %v5231_v30 = vadd.f32 %v5230_v42, %v5229_v53 }
 0x3d6   : > { %5715 = vmatmul.mubr.bf16.gmra.mrb[4].mxu1 %v8827_v61 }
 0x3d7   : > { %v8195_v16 = vadd.f32 %v5343_v49, %v5231_v30  ;;  %5718 = vmatprep.mubr.bf16.mxu1 %v8830_v6  ;;  %v5344_v7 = vpop.f32.mrb[188].mxu0 }
 0x3d8   : > { %v5345_v45 = vpop.f32.mrb[189].mxu0 }
 0x3d9   : > { %v5232_v41 = vpop.f32.mrb[156].mxu1  ;;  %v5346_v35 = vadd.f32 %v5345_v45, %v5344_v7  ;;  %v5347_v46 = vpop.f32.mrb[190].mxu0 }
 0x3da   : > { %v5233_v29 = vpop.f32.mrb[157].mxu1  ;;  %v5348_v34 = vpop.f32.mrb[191].mxu0 }
 0x3db   : > { %v5234_v27 = vadd.f32 %v5233_v29, %v5232_v41  ;;  %v5235_v48 = vpop.f32.mrb[158].mxu1  ;;  %v5349_v12 = vadd.f32 %v5348_v34, %v5347_v46 }
 0x3dc   : > { %v5236_v56 = vpop.f32.mrb[159].mxu1 }
 0x3dd   : > { %v8198_v43 = vadd.f32 %v5346_v35, %v5234_v27  ;;  %v5237_v33 = vadd.f32 %v5236_v56, %v5235_v48 }
 0x3de   : > { %5719 = vmatmul.mubr.bf16.gmra.mrb[8].mxu1 %v7915_v63 }
 0x3df   : > { %v8201_v61 = vadd.f32 %v5349_v12, %v5237_v33  ;;  %5722 = vmatprep.mubr.bf16.mxu1 %v7945_v3  ;;  %v5350_v6 = vpop.f32.mrb[192].mxu0 }
 0x3e0   : > { %v5351_v50 = vpop.f32.mrb[193].mxu0 }
 0x3e1   : > { %v5238_v10 = vpop.f32.mrb[160].mxu1  ;;  %v5352_v57 = vadd.f32 %v5351_v50, %v5350_v6  ;;  %v5353_v5 = vpop.f32.mrb[194].mxu0 }
 0x3e2   : > { %v5239_v11 = vpop.f32.mrb[161].mxu1  ;;  %v5354_v59 = vpop.f32.mrb[195].mxu0 }
 0x3e3   : > { %v5240_v17 = vadd.f32 %v5239_v11, %v5238_v10  ;;  %v5241_v38 = vpop.f32.mrb[162].mxu1  ;;  %v5355_v32 = vadd.f32 %v5354_v59, %v5353_v5 }
 0x3e4   : > { %v5242_v14 = vpop.f32.mrb[163].mxu1 }
 0x3e5   : > { %v8204_v31 = vadd.f32 %v5352_v57, %v5240_v17  ;;  %v5243_v36 = vadd.f32 %v5242_v14, %v5241_v38 }
 0x3e6   : > { %5723 = vmatmul.mubr.bf16.gmra.mrb[12].mxu1 %v7966_v44 }
 0x3e7   : > { %v8207_v63 = vadd.f32 %v5355_v32, %v5243_v36  ;;  %5726 = vmatprep.mubr.bf16.mxu1 %v7987_v13  ;;  %v5356_v3 = vpop.f32.mrb[196].mxu0 }
 0x3e8   : > { %v5357_v28 = vpop.f32.mrb[197].mxu0 }
 0x3e9   : > { %v5244_v0 = vpop.f32.mrb[164].mxu1  ;;  %v5358_v54 = vadd.f32 %v5357_v28, %v5356_v3  ;;  %v5359_v52 = vpop.f32.mrb[198].mxu0 }
 0x3ea   : > { %v5245_v40 = vpop.f32.mrb[165].mxu1  ;;  %v5360_v39 = vpop.f32.mrb[199].mxu0 }
 0x3eb   : > { %v5246_v18 = vadd.f32 %v5245_v40, %v5244_v0  ;;  %v5247_v9 = vpop.f32.mrb[166].mxu1  ;;  %v5361_v8 = vadd.f32 %v5360_v39, %v5359_v52 }
 0x3ec   : > { %v5248_v53 = vpop.f32.mrb[167].mxu1 }
 0x3ed   : > { %v8210_v49 = vadd.f32 %v5358_v54, %v5246_v18  ;;  %v5249_v42 = vadd.f32 %v5248_v53, %v5247_v9 }
 0x3ee   : > { %5727 = vmatmul.mubr.bf16.gmra.mrb[16].mxu1 %v8008_v62 }
 0x3ef   : > { %v8213_v44 = vadd.f32 %v5361_v8, %v5249_v42  ;;  %5730 = vmatprep.mubr.bf16.mxu1 %v8027_v55  ;;  %v5362_v13 = vpop.f32.mrb[200].mxu0 }
 0x3f0   : > { %v5363_v30 = vpop.f32.mrb[201].mxu0 }
 0x3f1   : > { %v5250_v7 = vpop.f32.mrb[168].mxu1  ;;  %v5364_v45 = vadd.f32 %v5363_v30, %v5362_v13  ;;  %v5365_v41 = vpop.f32.mrb[202].mxu0 }
 0x3f2   : > { %v5251_v35 = vpop.f32.mrb[169].mxu1  ;;  %v5366_v46 = vpop.f32.mrb[203].mxu0 }
 0x3f3   : > { %v5252_v29 = vadd.f32 %v5251_v35, %v5250_v7  ;;  %v5253_v34 = vpop.f32.mrb[170].mxu1  ;;  %v5367_v27 = vadd.f32 %v5366_v46, %v5365_v41 }
 0x3f4   : > { %v5254_v48 = vpop.f32.mrb[171].mxu1 }
 0x3f5   : > { %v8216_v12 = vadd.f32 %v5364_v45, %v5252_v29  ;;  %v5255_v56 = vadd.f32 %v5254_v48, %v5253_v34 }
 0x3f6   : > { %5731 = vmatmul.mubr.bf16.gmra.mrb[20].mxu1 %v8045_v19 }
 0x3f7   : > { %v8219_v62 = vadd.f32 %v5367_v27, %v5255_v56  ;;  %5734 = vmatprep.mubr.bf16.mxu1 %v8059_v26  ;;  %v5368_v55 = vpop.f32.mrb[204].mxu0 }
 0x3f8   : > { %v5369_v33 = vpop.f32.mrb[205].mxu0 }
 0x3f9   : > { %v5256_v6 = vpop.f32.mrb[172].mxu1  ;;  %v5370_v50 = vadd.f32 %v5369_v33, %v5368_v55  ;;  %v5371_v10 = vpop.f32.mrb[206].mxu0 }
 0x3fa   : > { %v5257_v57 = vpop.f32.mrb[173].mxu1  ;;  %v5372_v5 = vpop.f32.mrb[207].mxu0 }
 0x3fb   : > { %v5258_v11 = vadd.f32 %v5257_v57, %v5256_v6  ;;  %v5259_v59 = vpop.f32.mrb[174].mxu1  ;;  %v5373_v17 = vadd.f32 %v5372_v5, %v5371_v10 }
 0x3fc   : > { %v5260_v38 = vpop.f32.mrb[175].mxu1 }
 0x3fd   : > { %v8222_v32 = vadd.f32 %v5370_v50, %v5258_v11  ;;  %v5261_v14 = vadd.f32 %v5260_v38, %v5259_v59 }
 0x3fe   : > { %5735 = vmatmul.mubr.bf16.gmra.mrb[24].mxu1 %v8075_v22 }
 0x3ff   : > { %v8225_v19 = vadd.f32 %v5373_v17, %v5261_v14  ;;  %5738 = vmatprep.mubr.bf16.mxu1 %v7934_v1  ;;  %v5374_v26 = vpop.f32.mrb[208].mxu0 }
 0x400   : > { %v5375_v36 = vpop.f32.mrb[209].mxu0 }
 0x401   : > { %v5262_v3 = vpop.f32.mrb[176].mxu1  ;;  %v5376_v28 = vadd.f32 %v5375_v36, %v5374_v26  ;;  %v5377_v0 = vpop.f32.mrb[210].mxu0 }
 0x402   : > { %v5263_v54 = vpop.f32.mrb[177].mxu1  ;;  %v5378_v52 = vpop.f32.mrb[211].mxu0 }
 0x403   : > { %v5264_v40 = vadd.f32 %v5263_v54, %v5262_v3  ;;  %v5265_v39 = vpop.f32.mrb[178].mxu1  ;;  %v5379_v18 = vadd.f32 %v5378_v52, %v5377_v0 }
 0x404   : > { %v5266_v9 = vpop.f32.mrb[179].mxu1 }
 0x405   : > { %v8228_v8 = vadd.f32 %v5376_v28, %v5264_v40  ;;  %v5267_v53 = vadd.f32 %v5266_v9, %v5265_v39 }
 0x406   : > { %5739 = vmatmul.mubr.bf16.gmra.mrb[28].mxu1 %v8075_v22 }
 0x407   : > { %v8231_v42 = vadd.f32 %v5379_v18, %v5267_v53  ;;  %v5380_v13 = vpop.f32.mrb[212].mxu0 }
 0x408   : > { %v5381_v1 = vpop.f32.mrb[213].mxu0 }
 0x409   : > { %v5268_v30 = vpop.f32.mrb[180].mxu1  ;;  %v5382_v7 = vadd.f32 %v5381_v1, %v5380_v13  ;;  %v5383_v45 = vpop.f32.mrb[214].mxu0 }
 0x40a   : > { %v5269_v41 = vpop.f32.mrb[181].mxu1  ;;  %v5384_v35 = vpop.f32.mrb[215].mxu0 }
 0x40b   : > { %v5270_v46 = vadd.f32 %v5269_v41, %v5268_v30  ;;  %v5271_v29 = vpop.f32.mrb[182].mxu1  ;;  %v5385_v34 = vadd.f32 %v5384_v35, %v5383_v45 }
 0x40c   : > { %v5272_v27 = vpop.f32.mrb[183].mxu1 }
 0x40d   : > { %v8233_v48 = vadd.f32 %v5382_v7, %v5270_v46  ;;  %v5273_v56 = vadd.f32 %v5272_v27, %v5271_v29 }
 0x40f   : > { %v8235_v55 = vadd.f32 %v5385_v34, %v5273_v56  ;;  %v5386_v33 = vpop.f32.mrb[216].mxu0 }
 0x410   : > { %v5387_v22 = vpop.f32.mrb[217].mxu0 }
 0x411   : > { %v5274_v6 = vpop.f32.mrb[184].mxu1  ;;  %v5388_v50 = vadd.f32 %v5387_v22, %v5386_v33  ;;  %v5389_v10 = vpop.f32.mrb[218].mxu0 }
 0x412   : > { %v5275_v57 = vpop.f32.mrb[185].mxu1  ;;  %v5390_v5 = vpop.f32.mrb[219].mxu0 }
 0x413   : > { %v5276_v11 = vadd.f32 %v5275_v57, %v5274_v6  ;;  %v5277_v59 = vpop.f32.mrb[186].mxu1  ;;  %v5391_v17 = vadd.f32 %v5390_v5, %v5389_v10 }
 0x414   : > { %v5278_v38 = vpop.f32.mrb[187].mxu1 }
 0x415   : > { %v8237_v14 = vadd.f32 %v5388_v50, %v5276_v11  ;;  %v5279_v26 = vadd.f32 %v5278_v38, %v5277_v59 }
 0x417   : > { %v8239_v36 = vadd.f32 %v5391_v17, %v5279_v26  ;;  %v5392_v3 = vpop.f32.mrb[220].mxu0 }
 0x418   : > { %v5393_v28 = vpop.f32.mrb[221].mxu0 }
 0x419   : > { %v5280_v0 = vpop.f32.mrb[188].mxu1  ;;  %v5394_v54 = vadd.f32 %v5393_v28, %v5392_v3  ;;  %v5395_v52 = vpop.f32.mrb[222].mxu0 }
 0x41a   : > { %v5281_v40 = vpop.f32.mrb[189].mxu1  ;;  %v5396_v39 = vpop.f32.mrb[223].mxu0 }
 0x41b   : > { %v5282_v18 = vadd.f32 %v5281_v40, %v5280_v0  ;;  %v5283_v9 = vpop.f32.mrb[190].mxu1  ;;  %v5397_v53 = vadd.f32 %v5396_v39, %v5395_v52 }
 0x41c   : > { %v5284_v13 = vpop.f32.mrb[191].mxu1 }
 0x41d   : > { %v8241_v1 = vadd.f32 %v5394_v54, %v5282_v18  ;;  %v5285_v30 = vadd.f32 %v5284_v13, %v5283_v9 }
 0x41f   : > { %v8243_v7 = vadd.f32 %v5397_v53, %v5285_v30  ;;  %v5526_v45 = vpop.f32.mrb[224].mxu0 }
 0x420   : > { %v5527_v41 = vpop.f32.mrb[225].mxu0 }
 0x421   : > { %v5414_v35 = vpop.f32.mrb[192].mxu1  ;;  %v5528_v46 = vadd.f32 %v5527_v41, %v5526_v45  ;;  %v5529_v29 = vpop.f32.mrb[226].mxu0 }
 0x422   : > { %v5415_v34 = vpop.f32.mrb[193].mxu1  ;;  %v5530_v27 = vpop.f32.mrb[227].mxu0 }
 0x423   : > { %v5416_v56 = vadd.f32 %v5415_v34, %v5414_v35  ;;  %v5417_v33 = vpop.f32.mrb[194].mxu1  ;;  %v5531_v22 = vadd.f32 %v5530_v27, %v5529_v29 }
 0x424   : > { %v5418_v6 = vpop.f32.mrb[195].mxu1 }
 0x425   : > { %v3782_v50 = vadd.f32 %v5416_v56, %v8148_v47  ;;  %v5419_v10 = vadd.f32 %v5418_v6, %v5417_v33 }
 0x427   : > { %v3785_v57 = vadd.f32 %v5419_v10, %v8152_v60  ;;  %v5532_v5 = vpop.f32.mrb[228].mxu0  ;;  %v8247_v11 = vadd.f32 %v5528_v46, %v3782_v50 }
 0x428   : > { %v5533_v59 = vpop.f32.mrb[229].mxu0 }
 0x429   : > { %v5420_v17 = vpop.f32.mrb[196].mxu1  ;;  %v5534_v38 = vadd.f32 %v5533_v59, %v5532_v5  ;;  %v5535_v26 = vpop.f32.mrb[230].mxu0  ;;  %v8249_v3 = vadd.f32 %v5531_v22, %v3785_v57 }
 0x42a   : > { %v5421_v28 = vpop.f32.mrb[197].mxu1  ;;  %v5536_v0 = vpop.f32.mrb[231].mxu0 }
 0x42b   : > { %v5422_v54 = vadd.f32 %v5421_v28, %v5420_v17  ;;  %v5423_v52 = vpop.f32.mrb[198].mxu1  ;;  %v5537_v40 = vadd.f32 %v5536_v0, %v5535_v26 }
 0x42c   : > { %v5424_v39 = vpop.f32.mrb[199].mxu1 }
 0x42d   : > { %v3790_v47 = vadd.f32 %v5422_v54, %v8156_v20  ;;  %v5425_v18 = vadd.f32 %v5424_v39, %v5423_v52 }
 0x42f   : > { %v3793_v60 = vadd.f32 %v5425_v18, %v8160_v58  ;;  %v5538_v9 = vpop.f32.mrb[232].mxu0  ;;  %v8253_v53 = vadd.f32 %v5534_v38, %v3790_v47 }
 0x430   : > { %v5539_v13 = vpop.f32.mrb[233].mxu0 }
 0x431   : > { %v5426_v30 = vpop.f32.mrb[200].mxu1  ;;  %v5540_v45 = vadd.f32 %v5539_v13, %v5538_v9  ;;  %v5541_v41 = vpop.f32.mrb[234].mxu0  ;;  %v8255_v35 = vadd.f32 %v5537_v40, %v3793_v60 }
 0x432   : > { %v5427_v46 = vpop.f32.mrb[201].mxu1  ;;  %v5542_v29 = vpop.f32.mrb[235].mxu0 }
 0x433   : > { %v5428_v34 = vadd.f32 %v5427_v46, %v5426_v30  ;;  %v5429_v27 = vpop.f32.mrb[202].mxu1  ;;  %v5543_v56 = vadd.f32 %v5542_v29, %v5541_v41 }
 0x434   : > { %v5430_v33 = vpop.f32.mrb[203].mxu1 }
 0x435   : > { %v3798_v20 = vadd.f32 %v5428_v34, %v8164_v24  ;;  %v5431_v22 = vadd.f32 %v5430_v33, %v5429_v27 }
 0x437   : > { %v3801_v58 = vadd.f32 %v5431_v22, %v8168_v15  ;;  %v5544_v6 = vpop.f32.mrb[236].mxu0  ;;  %v8259_v50 = vadd.f32 %v5540_v45, %v3798_v20 }
 0x438   : > { %v5545_v10 = vpop.f32.mrb[237].mxu0 }
 0x439   : > { %v5432_v57 = vpop.f32.mrb[204].mxu1  ;;  %v5546_v5 = vadd.f32 %v5545_v10, %v5544_v6  ;;  %v5547_v59 = vpop.f32.mrb[238].mxu0  ;;  %v8261_v17 = vadd.f32 %v5543_v56, %v3801_v58 }
 0x43a   : > { %v5433_v38 = vpop.f32.mrb[205].mxu1  ;;  %v5548_v26 = vpop.f32.mrb[239].mxu0 }
 0x43b   : > { %v5434_v28 = vadd.f32 %v5433_v38, %v5432_v57  ;;  %v5435_v0 = vpop.f32.mrb[206].mxu1  ;;  %v5549_v54 = vadd.f32 %v5548_v26, %v5547_v59 }
 0x43c   : > { %v5436_v52 = vpop.f32.mrb[207].mxu1 }
 0x43d   : > { %v3806_v24 = vadd.f32 %v5434_v28, %v8172_v37  ;;  %v5437_v40 = vadd.f32 %v5436_v52, %v5435_v0 }
 0x43f   : > { %v3809_v15 = vadd.f32 %v5437_v40, %v8176_v51  ;;  %v5550_v39 = vpop.f32.mrb[240].mxu0  ;;  %v8265_v47 = vadd.f32 %v5546_v5, %v3806_v24 }
 0x440   : > { %v5551_v18 = vpop.f32.mrb[241].mxu0 }
 0x441   : > { %v5438_v60 = vpop.f32.mrb[208].mxu1  ;;  %v5552_v9 = vadd.f32 %v5551_v18, %v5550_v39  ;;  %v5553_v13 = vpop.f32.mrb[242].mxu0  ;;  %v8267_v30 = vadd.f32 %v5549_v54, %v3809_v15 }
 0x442   : > { %v5439_v45 = vpop.f32.mrb[209].mxu1  ;;  %v5554_v41 = vpop.f32.mrb[243].mxu0 }
 0x443   : > { %v5440_v46 = vadd.f32 %v5439_v45, %v5438_v60  ;;  %v5441_v29 = vpop.f32.mrb[210].mxu1  ;;  %v5555_v34 = vadd.f32 %v5554_v41, %v5553_v13 }
 0x444   : > { %v5442_v27 = vpop.f32.mrb[211].mxu1 }
 0x445   : > { %v3814_v37 = vadd.f32 %v5440_v46, %v8180_v25  ;;  %v5443_v56 = vadd.f32 %v5442_v27, %v5441_v29 }
 0x447   : > { %v3817_v51 = vadd.f32 %v5443_v56, %v8183_v2  ;;  %v5556_v33 = vpop.f32.mrb[244].mxu0  ;;  %v8271_v20 = vadd.f32 %v5552_v9, %v3814_v37 }
 0x448   : > { %v5557_v22 = vpop.f32.mrb[245].mxu0 }
 0x449   : > { %v5444_v58 = vpop.f32.mrb[212].mxu1  ;;  %v5558_v6 = vadd.f32 %v5557_v22, %v5556_v33  ;;  %v5559_v10 = vpop.f32.mrb[246].mxu0  ;;  %v8273_v57 = vadd.f32 %v5555_v34, %v3817_v51 }
 0x44a   : > { %v5445_v5 = vpop.f32.mrb[213].mxu1  ;;  %v5560_v59 = vpop.f32.mrb[247].mxu0 }
 0x44b   : > { %v5446_v38 = vadd.f32 %v5445_v5, %v5444_v58  ;;  %v5447_v26 = vpop.f32.mrb[214].mxu1  ;;  %v5561_v28 = vadd.f32 %v5560_v59, %v5559_v10 }
 0x44c   : > { %v5448_v0 = vpop.f32.mrb[215].mxu1 }
 0x44d   : > { %v3822_v25 = vadd.f32 %v5446_v38, %v8186_v4  ;;  %v5449_v54 = vadd.f32 %v5448_v0, %v5447_v26 }
 0x44f   : > { %v3825_v2 = vadd.f32 %v5449_v54, %v8189_v21  ;;  %v5562_v52 = vpop.f32.mrb[248].mxu0  ;;  %v8277_v24 = vadd.f32 %v5558_v6, %v3822_v25 }
 0x450   : > { %v5563_v40 = vpop.f32.mrb[249].mxu0 }
 0x451   : > { %v5450_v15 = vpop.f32.mrb[216].mxu1  ;;  %v5564_v39 = vadd.f32 %v5563_v40, %v5562_v52  ;;  %v5565_v18 = vpop.f32.mrb[250].mxu0  ;;  %v8279_v60 = vadd.f32 %v5561_v28, %v3825_v2 }
 0x452   : > { %v5451_v9 = vpop.f32.mrb[217].mxu1  ;;  %v5566_v13 = vpop.f32.mrb[251].mxu0 }
 0x453   : > { %v5452_v45 = vadd.f32 %v5451_v9, %v5450_v15  ;;  %v5453_v41 = vpop.f32.mrb[218].mxu1  ;;  %v5567_v46 = vadd.f32 %v5566_v13, %v5565_v18 }
 0x454   : > { %v5454_v29 = vpop.f32.mrb[219].mxu1 }
 0x455   : > { %v3830_v4 = vadd.f32 %v5452_v45, %v8192_v23  ;;  %v5455_v34 = vadd.f32 %v5454_v29, %v5453_v41 }
 0x457   : > { %v3833_v21 = vadd.f32 %v5455_v34, %v8195_v16  ;;  %v5568_v27 = vpop.f32.mrb[252].mxu0  ;;  %v8283_v37 = vadd.f32 %v5564_v39, %v3830_v4 }
 0x458   : > { %v5569_v56 = vpop.f32.mrb[253].mxu0 }
 0x459   : > { %v5456_v51 = vpop.f32.mrb[220].mxu1  ;;  %v5570_v33 = vadd.f32 %v5569_v56, %v5568_v27  ;;  %v5571_v22 = vpop.f32.mrb[254].mxu0  ;;  %v8285_v58 = vadd.f32 %v5567_v46, %v3833_v21 }
 0x45a   : > { %v5457_v6 = vpop.f32.mrb[221].mxu1  ;;  %v5572_v10 = vpop.f32.mrb[255].mxu0 }
 0x45b   : > { %v5458_v5 = vadd.f32 %v5457_v6, %v5456_v51  ;;  %v5459_v59 = vpop.f32.mrb[222].mxu1  ;;  %v5573_v38 = vadd.f32 %v5572_v10, %v5571_v22 }
 0x45c   : > { %v5460_v26 = vpop.f32.mrb[223].mxu1 }
 0x45d   : > { %v3838_v23 = vadd.f32 %v5458_v5, %v8198_v43  ;;  %v5461_v28 = vadd.f32 %v5460_v26, %v5459_v59 }
 0x45f   : > { %v3841_v16 = vadd.f32 %v5461_v28, %v8201_v61  ;;  %v5574_v0 = vpop.f32.mrb[0].mxu0  ;;  %v8289_v25 = vadd.f32 %v5570_v33, %v3838_v23 }
 0x460   : > { %v5575_v54 = vpop.f32.mrb[1].mxu0 }
 0x461   : > { %v5462_v2 = vpop.f32.mrb[224].mxu1  ;;  %v5576_v52 = vadd.f32 %v5575_v54, %v5574_v0  ;;  %v5577_v40 = vpop.f32.mrb[2].mxu0  ;;  %v8291_v15 = vadd.f32 %v5573_v38, %v3841_v16 }
 0x462   : > { %v5463_v39 = vpop.f32.mrb[225].mxu1  ;;  %v5578_v18 = vpop.f32.mrb[3].mxu0 }
 0x463   : > { %v5464_v9 = vadd.f32 %v5463_v39, %v5462_v2  ;;  %v5465_v13 = vpop.f32.mrb[226].mxu1  ;;  %v5579_v45 = vadd.f32 %v5578_v18, %v5577_v40 }
 0x464   : > { %v5466_v41 = vpop.f32.mrb[227].mxu1 }
 0x465   : > { %v3846_v43 = vadd.f32 %v5464_v9, %v8204_v31  ;;  %v5467_v46 = vadd.f32 %v5466_v41, %v5465_v13 }
 0x467   : > { %v3849_v61 = vadd.f32 %v5467_v46, %v8207_v63  ;;  %v5580_v29 = vpop.f32.mrb[4].mxu0  ;;  %v8295_v4 = vadd.f32 %v5576_v52, %v3846_v43 }
 0x468   : > { %v5581_v34 = vpop.f32.mrb[5].mxu0 }
 0x469   : > { %v5468_v21 = vpop.f32.mrb[228].mxu1  ;;  %v5582_v27 = vadd.f32 %v5581_v34, %v5580_v29  ;;  %v5583_v56 = vpop.f32.mrb[6].mxu0  ;;  %v8297_v51 = vadd.f32 %v5579_v45, %v3849_v61 }
 0x46a   : > { %v5469_v33 = vpop.f32.mrb[229].mxu1  ;;  %v5584_v22 = vpop.f32.mrb[7].mxu0 }
 0x46b   : > { %v5470_v6 = vadd.f32 %v5469_v33, %v5468_v21  ;;  %v5471_v10 = vpop.f32.mrb[230].mxu1  ;;  %v5585_v5 = vadd.f32 %v5584_v22, %v5583_v56 }
 0x46c   : > { %v5472_v59 = vpop.f32.mrb[231].mxu1 }
 0x46d   : > { %v3854_v31 = vadd.f32 %v5470_v6, %v8210_v49  ;;  %v5473_v38 = vadd.f32 %v5472_v59, %v5471_v10 }
 0x46f   : > { %v3857_v63 = vadd.f32 %v5473_v38, %v8213_v44  ;;  %v5586_v26 = vpop.f32.mrb[8].mxu0  ;;  %v8301_v23 = vadd.f32 %v5582_v27, %v3854_v31 }
 0x470   : > { %v5587_v28 = vpop.f32.mrb[9].mxu0 }
 0x471   : > { %v5474_v16 = vpop.f32.mrb[232].mxu1  ;;  %v5588_v0 = vadd.f32 %v5587_v28, %v5586_v26  ;;  %v5589_v54 = vpop.f32.mrb[10].mxu0  ;;  %v8303_v2 = vadd.f32 %v5585_v5, %v3857_v63 }
 0x472   : > { %v5475_v52 = vpop.f32.mrb[233].mxu1  ;;  %v5590_v40 = vpop.f32.mrb[11].mxu0 }
 0x473   : > { %v5476_v39 = vadd.f32 %v5475_v52, %v5474_v16  ;;  %v5477_v18 = vpop.f32.mrb[234].mxu1  ;;  %v5591_v9 = vadd.f32 %v5590_v40, %v5589_v54 }
 0x474   : > { %v5478_v13 = vpop.f32.mrb[235].mxu1 }
 0x475   : > { %v3862_v49 = vadd.f32 %v5476_v39, %v8216_v12  ;;  %v5479_v45 = vadd.f32 %v5478_v13, %v5477_v18 }
 0x477   : > { %v3865_v44 = vadd.f32 %v5479_v45, %v8219_v62  ;;  %v5592_v41 = vpop.f32.mrb[12].mxu0  ;;  %v8307_v43 = vadd.f32 %v5588_v0, %v3862_v49 }
 0x478   : > { %v5593_v46 = vpop.f32.mrb[13].mxu0 }
 0x479   : > { %v5480_v61 = vpop.f32.mrb[236].mxu1  ;;  %v5594_v29 = vadd.f32 %v5593_v46, %v5592_v41  ;;  %v5595_v34 = vpop.f32.mrb[14].mxu0  ;;  %v8309_v21 = vadd.f32 %v5591_v9, %v3865_v44 }
 0x47a   : > { %v5481_v27 = vpop.f32.mrb[237].mxu1  ;;  %v5596_v56 = vpop.f32.mrb[15].mxu0 }
 0x47b   : > { %v5482_v33 = vadd.f32 %v5481_v27, %v5480_v61  ;;  %v5483_v22 = vpop.f32.mrb[238].mxu1  ;;  %v5597_v6 = vadd.f32 %v5596_v56, %v5595_v34 }
 0x47c   : > { %v5484_v10 = vpop.f32.mrb[239].mxu1 }
 0x47d   : > { %v3870_v12 = vadd.f32 %v5482_v33, %v8222_v32  ;;  %v5485_v5 = vadd.f32 %v5484_v10, %v5483_v22 }
 0x47f   : > { %v3873_v62 = vadd.f32 %v5485_v5, %v8225_v19  ;;  %v5598_v59 = vpop.f32.mrb[16].mxu0  ;;  %v8313_v31 = vadd.f32 %v5594_v29, %v3870_v12 }
 0x480   : > { %v5599_v38 = vpop.f32.mrb[17].mxu0 }
 0x481   : > { %v5486_v63 = vpop.f32.mrb[240].mxu1  ;;  %v5600_v26 = vadd.f32 %v5599_v38, %v5598_v59  ;;  %v5601_v28 = vpop.f32.mrb[18].mxu0  ;;  %v8315_v16 = vadd.f32 %v5597_v6, %v3873_v62 }
 0x482   : > { %v5487_v0 = vpop.f32.mrb[241].mxu1  ;;  %v5602_v54 = vpop.f32.mrb[19].mxu0 }
 0x483   : > { %v5488_v52 = vadd.f32 %v5487_v0, %v5486_v63  ;;  %v5489_v40 = vpop.f32.mrb[242].mxu1  ;;  %v5603_v39 = vadd.f32 %v5602_v54, %v5601_v28 }
 0x484   : > { %v5490_v18 = vpop.f32.mrb[243].mxu1 }
 0x485   : > { %v3878_v32 = vadd.f32 %v5488_v52, %v8228_v8  ;;  %v5491_v9 = vadd.f32 %v5490_v18, %v5489_v40 }
 0x487   : > { %v3881_v19 = vadd.f32 %v5491_v9, %v8231_v42  ;;  %v5604_v13 = vpop.f32.mrb[20].mxu0  ;;  %v8319_v49 = vadd.f32 %v5600_v26, %v3878_v32 }
 0x488   : > { %v5605_v45 = vpop.f32.mrb[21].mxu0 }
 0x489   : > { %v5492_v44 = vpop.f32.mrb[244].mxu1  ;;  %v5606_v41 = vadd.f32 %v5605_v45, %v5604_v13  ;;  %v5607_v46 = vpop.f32.mrb[22].mxu0  ;;  %v8321_v61 = vadd.f32 %v5603_v39, %v3881_v19 }
 0x48a   : > { %v5493_v29 = vpop.f32.mrb[245].mxu1  ;;  %v5608_v34 = vpop.f32.mrb[23].mxu0 }
 0x48b   : > { %v5494_v27 = vadd.f32 %v5493_v29, %v5492_v44  ;;  %v5495_v56 = vpop.f32.mrb[246].mxu1  ;;  %v5609_v33 = vadd.f32 %v5608_v34, %v5607_v46 }
 0x48c   : > { %v5496_v22 = vpop.f32.mrb[247].mxu1 }
 0x48d   : > { %v3886_v8 = vadd.f32 %v5494_v27, %v8233_v48  ;;  %v5497_v6 = vadd.f32 %v5496_v22, %v5495_v56 }
 0x48f   : > { %v3889_v42 = vadd.f32 %v5497_v6, %v8235_v55  ;;  %v5610_v10 = vpop.f32.mrb[24].mxu0  ;;  %v8325_v12 = vadd.f32 %v5606_v41, %v3886_v8 }
 0x490   : > { %v5611_v5 = vpop.f32.mrb[25].mxu0 }
 0x491   : > { %v5498_v62 = vpop.f32.mrb[248].mxu1  ;;  %v5612_v59 = vadd.f32 %v5611_v5, %v5610_v10  ;;  %v5613_v38 = vpop.f32.mrb[26].mxu0  ;;  %v8327_v63 = vadd.f32 %v5609_v33, %v3889_v42 }
 0x492   : > { %v5499_v26 = vpop.f32.mrb[249].mxu1  ;;  %v5614_v28 = vpop.f32.mrb[27].mxu0 }
 0x493   : > { %v5500_v0 = vadd.f32 %v5499_v26, %v5498_v62  ;;  %v5501_v54 = vpop.f32.mrb[250].mxu1  ;;  %v5615_v52 = vadd.f32 %v5614_v28, %v5613_v38 }
 0x494   : > { %v5502_v40 = vpop.f32.mrb[251].mxu1 }
 0x495   : > { %v3894_v48 = vadd.f32 %v5500_v0, %v8237_v14  ;;  %v5503_v39 = vadd.f32 %v5502_v40, %v5501_v54 }
 0x497   : > { %v3897_v55 = vadd.f32 %v5503_v39, %v8239_v36  ;;  %v5616_v18 = vpop.f32.mrb[28].mxu0  ;;  %v8331_v32 = vadd.f32 %v5612_v59, %v3894_v48 }
 0x498   : > { %v5617_v9 = vpop.f32.mrb[29].mxu0 }
 0x499   : > { %v5504_v19 = vpop.f32.mrb[252].mxu1  ;;  %v5618_v13 = vadd.f32 %v5617_v9, %v5616_v18  ;;  %v5619_v45 = vpop.f32.mrb[30].mxu0  ;;  %v8333_v44 = vadd.f32 %v5615_v52, %v3897_v55 }
 0x49a   : > { %v5505_v41 = vpop.f32.mrb[253].mxu1  ;;  %v5620_v46 = vpop.f32.mrb[31].mxu0 }
 0x49b   : > { %v5506_v29 = vadd.f32 %v5505_v41, %v5504_v19  ;;  %v5507_v34 = vpop.f32.mrb[254].mxu1  ;;  %v5621_v27 = vadd.f32 %v5620_v46, %v5619_v45 }
 0x49c   : > { %v5508_v56 = vpop.f32.mrb[255].mxu1 }
 0x49d   : > { %v3902_v14 = vadd.f32 %v5506_v29, %v8241_v1  ;;  %v5509_v33 = vadd.f32 %v5508_v56, %v5507_v34 }
 0x49f   : > { %v3905_v36 = vadd.f32 %v5509_v33, %v8243_v7  ;;  %v8337_v22 = vadd.f32 %v5618_v13, %v3902_v14 }
 0x4a1   : > { %v5712_v8 = vpop.f32.mrb[0].mxu1  ;;  %v8339_v6 = vadd.f32 %v5621_v27, %v3905_v36 }
 0x4a2   : > { %v8342_v42 = vadd.f32 %v5712_v8, %v8253_v53  ;;  %v4103_v10 = vpop.f32.mrb[1].mxu1 }
 0x4a3   : > { %v8345_v5 = vadd.f32 %v4103_v10, %v8247_v11  ;;  %v5713_v62 = vpop.f32.mrb[2].mxu1 }
 0x4a4   : > { %v8348_v59 = vadd.f32 %v5713_v62, %v8255_v35  ;;  %v4106_v1 = vpop.f32.mrb[3].mxu1 }
 0x4a5   : > { %v8351_v38 = vadd.f32 %v4106_v1, %v8249_v3 }
 0x4a7   : > { %v4230_v7 = vadd.f32 %v8351_v38, %v8345_v5 }
 0x4a9   : > { %v4231_v26 = vadd.f32 %v4230_v7, %v8342_v42  ;;  %v5716_v28 = vpop.f32.mrb[4].mxu1 }
 0x4aa   : > { %v8357_v53 = vadd.f32 %v5716_v28, %v8265_v47  ;;  %v4119_v0 = vpop.f32.mrb[5].mxu1 }
 0x4ab   : > { %v8360_v11 = vadd.f32 %v4119_v0, %v8259_v50  ;;  %v4232_v35 = vadd.f32 %v4231_v26, %v8348_v59  ;;  %v5717_v54 = vpop.f32.mrb[6].mxu1 }
 0x4ac   : > { %v8364_v52 = vadd.f32 %v5717_v54, %v8267_v30  ;;  %v4122_v3 = vpop.f32.mrb[7].mxu1 }
 0x4ad   : > { %v4233_v40 = vadd.f32 %v4232_v35, %v8360_v11  ;;  %v8368_v48 = vadd.f32 %v4122_v3, %v8261_v17 }
 0x4af   : > { %v4234_v39 = vadd.f32 %v4233_v40, %v8368_v48 }
 0x4b1   : > { %v4235_v47 = vadd.f32 %v4234_v39, %v8357_v53  ;;  %v5720_v55 = vpop.f32.mrb[8].mxu1 }
 0x4b2   : > { %v8373_v50 = vadd.f32 %v5720_v55, %v8277_v24  ;;  %v4135_v18 = vpop.f32.mrb[9].mxu1 }
 0x4b3   : > { %v8376_v9 = vadd.f32 %v4135_v18, %v8271_v20  ;;  %v4236_v30 = vadd.f32 %v4235_v47, %v8364_v52  ;;  %v5721_v19 = vpop.f32.mrb[10].mxu1 }
 0x4b4   : > { %v8380_v13 = vadd.f32 %v5721_v19, %v8279_v60  ;;  %v4138_v17 = vpop.f32.mrb[11].mxu1 }
 0x4b5   : > { %v4237_v45 = vadd.f32 %v4236_v30, %v8376_v9  ;;  %v8384_v41 = vadd.f32 %v4138_v17, %v8273_v57 }
 0x4b7   : > { %v4238_v46 = vadd.f32 %v4237_v45, %v8384_v41 }
 0x4b9   : > { %v4239_v24 = vadd.f32 %v4238_v46, %v8373_v50  ;;  %v5724_v29 = vpop.f32.mrb[12].mxu1 }
 0x4ba   : > { %v8389_v20 = vadd.f32 %v5724_v29, %v8289_v25  ;;  %v4151_v34 = vpop.f32.mrb[13].mxu1 }
 0x4bb   : > { %v8392_v27 = vadd.f32 %v4151_v34, %v8283_v37  ;;  %v4240_v60 = vadd.f32 %v4239_v24, %v8380_v13  ;;  %v5725_v56 = vpop.f32.mrb[14].mxu1 }
 0x4bc   : > { %v8396_v14 = vadd.f32 %v5725_v56, %v8291_v15  ;;  %v4154_v57 = vpop.f32.mrb[15].mxu1 }
 0x4bd   : > { %v4241_v33 = vadd.f32 %v4240_v60, %v8392_v27  ;;  %v8400_v36 = vadd.f32 %v4154_v57, %v8285_v58 }
 0x4bf   : > { %v4242_v8 = vadd.f32 %v4241_v33, %v8400_v36 }
 0x4c1   : > { %v4243_v25 = vadd.f32 %v4242_v8, %v8389_v20  ;;  %v5728_v10 = vpop.f32.mrb[16].mxu1 }
 0x4c2   : > { %v8405_v37 = vadd.f32 %v5728_v10, %v8301_v23  ;;  %v4167_v62 = vpop.f32.mrb[17].mxu1 }
 0x4c3   : > { %v4168_v1 = vadd.f32 %v4167_v62, %v8295_v4  ;;  %v4244_v15 = vadd.f32 %v4243_v25, %v8396_v14  ;;  %v5729_v7 = vpop.f32.mrb[18].mxu1 }
 0x4c4   : > { %v4179_v26 = vadd.f32 %v5729_v7, %v8303_v2  ;;  %v4170_v28 = vpop.f32.mrb[19].mxu1 }
 0x4c5   : > { %v4245_v0 = vadd.f32 %v4244_v15, %v4168_v1  ;;  %v4171_v58 = vadd.f32 %v4170_v28, %v8297_v51 }
 0x4c7   : > { %v4246_v35 = vadd.f32 %v4245_v0, %v4171_v58 }
 0x4c9   : > { %v4247_v54 = vadd.f32 %v4246_v35, %v8405_v37  ;;  %v5732_v3 = vpop.f32.mrb[20].mxu1 }
 0x4ca   : > { %v4192_v40 = vadd.f32 %v5732_v3, %v8313_v31  ;;  %v4183_v23 = vpop.f32.mrb[21].mxu1 }
 0x4cb   : > { %v4184_v39 = vadd.f32 %v4183_v23, %v8307_v43  ;;  %v4248_v47 = vadd.f32 %v4247_v54, %v4179_v26  ;;  %v5733_v4 = vpop.f32.mrb[22].mxu1 }
 0x4cc   : > { %v4195_v55 = vadd.f32 %v5733_v4, %v8315_v16  ;;  %v4186_v18 = vpop.f32.mrb[23].mxu1 }
 0x4cd   : > { %v4249_v30 = vadd.f32 %v4248_v47, %v4184_v39  ;;  %v4187_v2 = vadd.f32 %v4186_v18, %v8309_v21 }
 0x4cf   : > { %v4250_v19 = vadd.f32 %v4249_v30, %v4187_v2 }
 0x4d1   : > { %v4251_v17 = vadd.f32 %v4250_v19, %v4192_v40  ;;  %v5736_v51 = vpop.f32.mrb[24].mxu1 }
 0x4d2   : > { %v4208_v45 = vadd.f32 %v5736_v51, %v8325_v12  ;;  %v4199_v46 = vpop.f32.mrb[25].mxu1 }
 0x4d3   : > { %v4200_v24 = vadd.f32 %v4199_v46, %v8319_v49  ;;  %v4252_v31 = vadd.f32 %v4251_v17, %v4195_v55  ;;  %v5737_v29 = vpop.f32.mrb[26].mxu1 }
 0x4d4   : > { %v4211_v43 = vadd.f32 %v5737_v29, %v8327_v63  ;;  %v4202_v34 = vpop.f32.mrb[27].mxu1 }
 0x4d5   : > { %v4253_v60 = vadd.f32 %v4252_v31, %v4200_v24  ;;  %v4203_v16 = vadd.f32 %v4202_v34, %v8321_v61 }
 0x4d7   : > { %v4254_v56 = vadd.f32 %v4253_v60, %v4203_v16 }
 0x4d9   : > { %v4255_v57 = vadd.f32 %v4254_v56, %v4208_v45  ;;  %v5740_v33 = vpop.f32.mrb[28].mxu1 }
 0x4da   : > { %v4224_v21 = vadd.f32 %v5740_v33, %v8337_v22  ;;  %v4215_v8 = vpop.f32.mrb[29].mxu1 }
 0x4db   : > { %v4216_v25 = vadd.f32 %v4215_v8, %v8331_v32  ;;  %v4256_v12 = vadd.f32 %v4255_v57, %v4211_v43  ;;  %v5741_v10 = vpop.f32.mrb[30].mxu1 }
 0x4dc   : > { %v4227_v49 = vadd.f32 %v5741_v10, %v8339_v6  ;;  %v4218_v62 = vpop.f32.mrb[31].mxu1 }
 0x4dd   : > { %v4257_v15 = vadd.f32 %v4256_v12, %v4216_v25  ;;  %v4219_v63 = vadd.f32 %v4218_v62, %v8333_v44 }
 0x4df   : > { %v4258_v7 = vadd.f32 %v4257_v15, %v4219_v63 }
 0x4e1   : > { %v4259_v28 = vadd.f32 %v4258_v7, %v4224_v21 }
 0x4e3   : > { %v4260_v0 = vadd.f32 %v4259_v28, %v4227_v49 }
 0x4e5   : > { %v4261_v61 = vrot.slane %v4260_v0, 4 }
 0x4e7   : > { %v4262_v35 = vadd.f32 %v4261_v61, %v4260_v0 }
 0x4e9   : > { %v4263_v54 = vrot.slane %v4262_v35, 2 }
 0x4eb   : > { %v4264_v3 = vadd.f32 %v4263_v54, %v4262_v35 }
 0x4ed   : > { %v4265_v23 = vrot.slane %v4264_v3, 1 }
 0x4ef   : > { %v4266_v22 = vadd.f32 %v4265_v23, %v4264_v3 }
 0x4f1   : > { %v4267_v47 = vmul.f32 0.00390625, %v4266_v22 }
 0x4f3   : > { %v8425_v32 = vsub.f32 %v8376_v9, %v4267_v47  ;;  %v8428_v4 = vsub.f32 %v8384_v41, %v4267_v47  ;;  %v8431_v6 = vsub.f32 %v8373_v50, %v4267_v47  ;;  %v8434_v44 = vsub.f32 %v8380_v13, %v4267_v47 }
 0x4f4   : > { %v8437_v18 = vsub.f32 %v8392_v27, %v4267_v47  ;;  %v8440_v30 = vsub.f32 %v8400_v36, %v4267_v47  ;;  %v8443_v19 = vsub.f32 %v8389_v20, %v4267_v47  ;;  %v8446_v9 = vsub.f32 %v8396_v14, %v4267_v47 }
 0x4f5   : > { %v8448_v41 = vsub.f32 %v4168_v1, %v4267_v47  ;;  %v8450_v17 = vsub.f32 %v4171_v58, %v4267_v47  ;;  %v8453_v50 = vsub.f32 %v8405_v37, %v4267_v47  ;;  %v8455_v13 = vsub.f32 %v4179_v26, %v4267_v47 }
 0x4f6   : > { %v8457_v27 = vsub.f32 %v4184_v39, %v4267_v47  ;;  %v8459_v51 = vsub.f32 %v4187_v2, %v4267_v47  ;;  %v8461_v36 = vsub.f32 %v4192_v40, %v4267_v47  ;;  %v8463_v20 = vsub.f32 %v4195_v55, %v4267_v47 }
 0x4f7   : > { %v8465_v46 = vsub.f32 %v4200_v24, %v4267_v47  ;;  %v8467_v14 = vsub.f32 %v4203_v16, %v4267_v47  ;;  %v8469_v1 = vsub.f32 %v4208_v45, %v4267_v47  ;;  %v8471_v58 = vsub.f32 %v4211_v43, %v4267_v47 }
 0x4f8   : > { %v8473_v37 = vsub.f32 %v4216_v25, %v4267_v47  ;;  %v8475_v26 = vsub.f32 %v4219_v63, %v4267_v47  ;;  %v8477_v39 = vsub.f32 %v4224_v21, %v4267_v47  ;;  %v8479_v2 = vsub.f32 %v4227_v49, %v4267_v47 }
 0x4f9   : > { %v8482_v40 = vsub.f32 %v8345_v5, %v4267_v47  ;;  %v8485_v55 = vsub.f32 %v8351_v38, %v4267_v47  ;;  %v8488_v24 = vsub.f32 %v8342_v42, %v4267_v47  ;;  %v8495_v29 = vsub.f32 %v8348_v59, %v4267_v47 }
 0x4fa   : > { %v8498_v43 = vsub.f32 %v8360_v11, %v4267_v47  ;;  %v8503_v34 = vsub.f32 %v8368_v48, %v4267_v47  ;;  %v8508_v16 = vsub.f32 %v8357_v53, %v4267_v47  ;;  %v8513_v11 = vsub.f32 %v8364_v52, %v4267_v47 }
 0x4fb   : > { %v4300_v45 = vmul.f32 %v8482_v40, %v8482_v40  ;;  %v4301_v31 = vmul.f32 %v8485_v55, %v8485_v55  ;;  %v4302_v5 = vmul.f32 %v8488_v24, %v8488_v24  ;;  %v4303_v42 = vmul.f32 %v8495_v29, %v8495_v29 }
 0x4fc   : > { %v4304_v59 = vmul.f32 %v8498_v43, %v8498_v43  ;;  %v4305_v57 = vmul.f32 %v8503_v34, %v8503_v34  ;;  %v4306_v48 = vmul.f32 %v8508_v16, %v8508_v16  ;;  %v4307_v8 = vmul.f32 %v8513_v11, %v8513_v11 }
 0x4fd   : > { %v4332_v38 = vadd.f32 %v4301_v31, %v4300_v45  ;;  %v4308_v25 = vmul.f32 %v8425_v32, %v8425_v32  ;;  %v4309_v52 = vmul.f32 %v8428_v4, %v8428_v4  ;;  %v4310_v49 = vmul.f32 %v8431_v6, %v8431_v6 }
 0x4fe   : > { %v4311_v15 = vmul.f32 %v8434_v44, %v8434_v44  ;;  %v4312_v7 = vmul.f32 %v8437_v18, %v8437_v18  ;;  %v4313_v0 = vmul.f32 %v8440_v30, %v8440_v30  ;;  %v4314_v35 = vmul.f32 %v8443_v19, %v8443_v19 }
 0x4ff   : > { %v4333_v60 = vadd.f32 %v4332_v38, %v4302_v5  ;;  %v4315_v3 = vmul.f32 %v8446_v9, %v8446_v9  ;;  %v4316_v22 = vmul.f32 %v8448_v41, %v8448_v41  ;;  %v4317_v45 = vmul.f32 %v8450_v17, %v8450_v17 }
 0x500   : > { %v4318_v5 = vmul.f32 %v8453_v50, %v8453_v50 }
 0x501   : > { %v4334_v56 = vadd.f32 %v4333_v60, %v4303_v42  ;;  %v4319_v42 = vmul.f32 %v8455_v13, %v8455_v13 }
 0x503   : > { %v4335_v33 = vadd.f32 %v4334_v56, %v4304_v59  ;;  %v4320_v59 = vmul.f32 %v8457_v27, %v8457_v27 }
 0x505   : > { %v4336_v21 = vadd.f32 %v4335_v33, %v4305_v57  ;;  %v4321_v57 = vmul.f32 %v8459_v51, %v8459_v51 }
 0x507   : > { %v4337_v53 = vadd.f32 %v4336_v21, %v4306_v48  ;;  %v4322_v48 = vmul.f32 %v8461_v36, %v8461_v36 }
 0x509   : > { %v4338_v12 = vadd.f32 %v4337_v53, %v4307_v8  ;;  %v4323_v8 = vmul.f32 %v8463_v20, %v8463_v20 }
 0x50b   : > { %v4339_v10 = vadd.f32 %v4338_v12, %v4308_v25  ;;  %v4324_v25 = vmul.f32 %v8465_v46, %v8465_v46 }
 0x50d   : > { %v4340_v62 = vadd.f32 %v4339_v10, %v4309_v52  ;;  %v4325_v52 = vmul.f32 %v8467_v14, %v8467_v14 }
 0x50f   : > { %v4341_v63 = vadd.f32 %v4340_v62, %v4310_v49  ;;  %v4326_v49 = vmul.f32 %v8469_v1, %v8469_v1 }
 0x511   : > { %v4342_v28 = vadd.f32 %v4341_v63, %v4311_v15  ;;  %v4327_v15 = vmul.f32 %v8471_v58, %v8471_v58 }
 0x513   : > { %v4343_v61 = vadd.f32 %v4342_v28, %v4312_v7  ;;  %v4328_v7 = vmul.f32 %v8473_v37, %v8473_v37 }
 0x515   : > { %v4344_v54 = vadd.f32 %v4343_v61, %v4313_v0  ;;  %v4329_v0 = vmul.f32 %v8475_v26, %v8475_v26 }
 0x517   : > { %v4345_v23 = vadd.f32 %v4344_v54, %v4314_v35  ;;  %v4330_v35 = vmul.f32 %v8477_v39, %v8477_v39 }
 0x519   : > { %v4346_v47 = vadd.f32 %v4345_v23, %v4315_v3  ;;  %v4331_v3 = vmul.f32 %v8479_v2, %v8479_v2 }
 0x51b   : > { %v4347_v31 = vadd.f32 %v4346_v47, %v4316_v22 }
 0x51d   : > { %v4348_v38 = vadd.f32 %v4347_v31, %v4317_v45 }
 0x51f   : > { %v4349_v60 = vadd.f32 %v4348_v38, %v4318_v5 }
 0x521   : > { %v4350_v56 = vadd.f32 %v4349_v60, %v4319_v42 }
 0x523   : > { %v4351_v33 = vadd.f32 %v4350_v56, %v4320_v59 }
 0x525   : > { %v4352_v21 = vadd.f32 %v4351_v33, %v4321_v57 }
 0x527   : > { %v4353_v53 = vadd.f32 %v4352_v21, %v4322_v48 }
 0x529   : > { %v4354_v12 = vadd.f32 %v4353_v53, %v4323_v8 }
 0x52b   : > { %v4355_v10 = vadd.f32 %v4354_v12, %v4324_v25 }
 0x52d   : > { %v4356_v62 = vadd.f32 %v4355_v10, %v4325_v52  ;;  %v5931_v52 = vld [vmem:[%s6193_s8 + $0xe8] sm:$0xff] }
 0x52f   : > { %v4357_v63 = vadd.f32 %v4356_v62, %v4326_v49  ;;  %v5935_v62 = vld [vmem:[%s6193_s8 + $0x18] sm:$0xff] }
 0x531   : > { %v4358_v28 = vadd.f32 %v4357_v63, %v4327_v15  ;;  %v5936_v15 = vld [vmem:[%s6193_s8 + $0x20] sm:$0xff]  ;;  %v5937_v63 = vld [vmem:[%s6193_s8 + $0x28] sm:$0xff] }
 0x533   : > { %v4359_v61 = vadd.f32 %v4358_v28, %v4328_v7  ;;  %v5938_v7 = vld [vmem:[%s6193_s8 + $0x30] sm:$0xff] }
 0x535   : > { %v4360_v54 = vadd.f32 %v4359_v61, %v4329_v0  ;;  %v5939_v0 = vld [vmem:[%s6193_s8 + $0x38] sm:$0xff] }
 0x537   : > { %v4361_v23 = vadd.f32 %v4360_v54, %v4330_v35  ;;  %v5940_v35 = vld [vmem:[%s6193_s8 + $0x40] sm:$0xff] }
 0x539   : > { %v4362_v22 = vadd.f32 %v4361_v23, %v4331_v3  ;;  %v5941_v3 = vld [vmem:[%s6193_s8 + $0x48] sm:$0xff] }
 0x53b   : > { %v4363_v47 = vrot.slane %v4362_v22, 4 }
 0x53d   : > { %v4364_v45 = vadd.f32 %v4363_v47, %v4362_v22  ;;  %v5942_v22 = vld [vmem:[%s6193_s8 + $0x50] sm:$0xff] }
 0x53f   : > { %v4365_v31 = vrot.slane %v4364_v45, 2 }
 0x541   : > { %v4366_v5 = vadd.f32 %v4365_v31, %v4364_v45  ;;  %v5943_v45 = vld [vmem:[%s6193_s8 + $0x58] sm:$0xff] }
 0x543   : > { %v4367_v38 = vrot.slane %v4366_v5, 1 }
 0x545   : > { %v4368_v42 = vadd.f32 %v4367_v38, %v4366_v5  ;;  %v5944_v5 = vld [vmem:[%s6193_s8 + $0x60] sm:$0xff] }
 0x547   : > { %v4369_v60 = vmul.f32 0.00390625, %v4368_v42  ;;  %v5945_v42 = vld [vmem:[%s6193_s8 + $0x68] sm:$0xff] }
 0x549   : > { %v4370_v59 = vadd.f32 1e-05, %v4369_v60 }
 0x54b   : > { %5929 = vrsqrt.f32 %v4370_v59  ;;  %v5946_v59 = vld [vmem:[%s6193_s8 + $0x70] sm:$0xff] }
 0x555   : > { %v5930_v56 = vpop.eup %5929 }
 0x556   : > { %v4401_v57 = vmul.f32 %v5930_v56, %v8475_v26  ;;  %v4372_v33 = vmul.f32 %v5930_v56, %v8482_v40  ;;  %v4373_v48 = vmul.f32 %v5930_v56, %v8485_v55  ;;  %v4374_v21 = vmul.f32 %v5930_v56, %v8488_v24 }
 0x557   : > { %v4375_v8 = vmul.f32 %v5930_v56, %v8495_v29  ;;  %v4376_v53 = vmul.f32 %v5930_v56, %v8498_v43  ;;  %v4377_v25 = vmul.f32 %v5930_v56, %v8503_v34  ;;  %v4378_v12 = vmul.f32 %v5930_v56, %v8508_v16 }
 0x558   : > { %v4433_v10 = vadd.f32 %v5931_v52, %v4401_v57  ;;  %v4379_v49 = vmul.f32 %v5930_v56, %v8513_v11  ;;  %v4380_v26 = vmul.f32 %v5930_v56, %v8425_v32  ;;  %v4381_v40 = vmul.f32 %v5930_v56, %v8428_v4  ;;  %v5934_v11 = vld [vmem:[%s6193_s8 + $0x10] sm:$0xff]  ;;  %v5947_v57 = vld [vmem:[%s6193_s8 + $0x78] sm:$0xff] }
 0x559   : > { %v4382_v55 = vmul.f32 %v5930_v56, %v8431_v6  ;;  %v4383_v24 = vmul.f32 %v5930_v56, %v8434_v44  ;;  %v4384_v29 = vmul.f32 %v5930_v56, %v8437_v18  ;;  %v4385_v43 = vmul.f32 %v5930_v56, %v8440_v30  ;;  %v5951_v52 = vld [vmem:[%s6193_s8 + $0x98] sm:$0xff] }
 0x55a   : > { %4465 = vst [vmem:[%s8588_s26 + $0xe8] sm:$0xff] %v4433_v10  ;;  %v4386_v34 = vmul.f32 %v5930_v56, %v8443_v19  ;;  %v4387_v16 = vmul.f32 %v5930_v56, %v8446_v9  ;;  %v4388_v32 = vmul.f32 %v5930_v56, %v8448_v41  ;;  %v4389_v4 = vmul.f32 %v5930_v56, %v8450_v17 }
 0x55b   : > { %v4390_v6 = vmul.f32 %v5930_v56, %v8453_v50  ;;  %v8597_v44 = vmul.f32 %v5930_v56, %v8455_v13  ;;  %v8600_v18 = vmul.f32 %v5930_v56, %v8457_v27  ;;  %v8603_v30 = vmul.f32 %v5930_v56, %v8459_v51 }
 0x55c   : > { %v8606_v19 = vmul.f32 %v5930_v56, %v8461_v36  ;;  %v8609_v9 = vmul.f32 %v5930_v56, %v8463_v20  ;;  %v8612_v41 = vmul.f32 %v5930_v56, %v8465_v46  ;;  %v8615_v17 = vmul.f32 %v5930_v56, %v8467_v14  ;;  %v5932_v20 = vld [vmem:[%s6193_s8] sm:$0xff]  ;;  %v5933_v14 = vld [vmem:[%s6193_s8 + $0x8] sm:$0xff] }
 0x55d   : > { %v8618_v50 = vmul.f32 %v5930_v56, %v8469_v1  ;;  %v8621_v13 = vmul.f32 %v5930_v56, %v8471_v58  ;;  %v8624_v27 = vmul.f32 %v5930_v56, %v8473_v37  ;;  %v8627_v51 = vmul.f32 %v5930_v56, %v8477_v39 }
 0x55e   : > { %v8630_v36 = vmul.f32 %v5930_v56, %v8479_v2  ;;  %v4404_v46 = vadd.f32 %v5932_v20, %v4372_v33  ;;  %v4405_v1 = vadd.f32 %v5933_v14, %v4373_v48  ;;  %v4406_v58 = vadd.f32 %v5934_v11, %v4374_v21  ;;  %v5948_v48 = vld [vmem:[%s6193_s8 + $0x80] sm:$0xff]  ;;  %v5962_v20 = vld [vmem:[%s6193_s8 + $0xf8] sm:$0xff] }
 0x55f   : > { %v4407_v37 = vadd.f32 %v5935_v62, %v4375_v8  ;;  %v4408_v39 = vadd.f32 %v5936_v15, %v4376_v53  ;;  %v4409_v2 = vadd.f32 %v5937_v63, %v4377_v25  ;;  %v4410_v28 = vadd.f32 %v5938_v7, %v4378_v12  ;;  %v5949_v8 = vld [vmem:[%s6193_s8 + $0x88] sm:$0xff]  ;;  %v5950_v25 = vld [vmem:[%s6193_s8 + $0x90] sm:$0xff] }
 0x560   : > { %v4411_v61 = vadd.f32 %v5939_v0, %v4379_v49  ;;  %v4412_v54 = vadd.f32 %v5940_v35, %v4380_v26  ;;  %v4413_v23 = vadd.f32 %v5941_v3, %v4381_v40  ;;  %v4414_v47 = vadd.f32 %v5942_v22, %v4382_v55  ;;  %4436 = vst [vmem:[%s8588_s26] sm:$0xff] %v4404_v46  ;;  %v5952_v49 = vld [vmem:[%s6193_s8 + $0xa0] sm:$0xff]  ;;  %v5953_v40 = vld [vmem:[%s6193_s8 + $0xa8] sm:$0xff] }
 0x561   : > { %4437 = vst [vmem:[%s8588_s26 + $0x8] sm:$0xff] %v4405_v1  ;;  %4438 = vst [vmem:[%s8588_s26 + $0x10] sm:$0xff] %v4406_v58  ;;  %v4415_v31 = vadd.f32 %v5943_v45, %v4383_v24  ;;  %v4416_v38 = vadd.f32 %v5944_v5, %v4384_v29  ;;  %v4417_v60 = vadd.f32 %v5945_v42, %v4385_v43  ;;  %v5954_v24 = vld [vmem:[%s6193_s8 + $0xb0] sm:$0xff]  ;;  %v5955_v43 = vld [vmem:[%s6193_s8 + $0xb8] sm:$0xff] }
 0x562   : > { %v4418_v56 = vadd.f32 %v5946_v59, %v4386_v34  ;;  %4439 = vst [vmem:[%s8588_s26 + $0x18] sm:$0xff] %v4407_v37  ;;  %4440 = vst [vmem:[%s8588_s26 + $0x20] sm:$0xff] %v4408_v39  ;;  %v4419_v33 = vadd.f32 %v5947_v57, %v4387_v16  ;;  %v4420_v21 = vadd.f32 %v5948_v48, %v4388_v32  ;;  %v5956_v16 = vld [vmem:[%s6193_s8 + $0xc0] sm:$0xff] }
 0x563   : > { %4441 = vst [vmem:[%s8588_s26 + $0x28] sm:$0xff] %v4409_v2  ;;  %4442 = vst [vmem:[%s8588_s26 + $0x30] sm:$0xff] %v4410_v28  ;;  %v4421_v53 = vadd.f32 %v5949_v8, %v4389_v4  ;;  %v4422_v12 = vadd.f32 %v5950_v25, %v4390_v6  ;;  %v4423_v10 = vadd.f32 %v5951_v52, %v8597_v44  ;;  %v5957_v4 = vld [vmem:[%s6193_s8 + $0xc8] sm:$0xff]  ;;  %v5958_v44 = vld [vmem:[%s6193_s8 + $0xd0] sm:$0xff] }
 0x564   : > { %4443 = vst [vmem:[%s8588_s26 + $0x38] sm:$0xff] %v4411_v61  ;;  %4444 = vst [vmem:[%s8588_s26 + $0x40] sm:$0xff] %v4412_v54  ;;  %v4424_v26 = vadd.f32 %v5952_v49, %v8600_v18  ;;  %v4425_v55 = vadd.f32 %v5953_v40, %v8603_v30  ;;  %v4426_v29 = vadd.f32 %v5954_v24, %v8606_v19  ;;  %v5959_v30 = vld [vmem:[%s6193_s8 + $0xd8] sm:$0xff] }
 0x565   : > { %4445 = vst [vmem:[%s8588_s26 + $0x48] sm:$0xff] %v4413_v23  ;;  %4446 = vst [vmem:[%s8588_s26 + $0x50] sm:$0xff] %v4414_v47  ;;  %v4427_v34 = vadd.f32 %v5955_v43, %v8609_v9  ;;  %v4428_v32 = vadd.f32 %v5956_v16, %v8612_v41  ;;  %v4429_v6 = vadd.f32 %v5957_v4, %v8615_v17  ;;  %v5960_v9 = vld [vmem:[%s6193_s8 + $0xe0] sm:$0xff]  ;;  %v5961_v17 = vld [vmem:[%s6193_s8 + $0xf0] sm:$0xff]  ;;  %s5963_s8 = scalar_lea.vmem %s8697_s28, 4096 }
 0x566   : > { %4447 = vst [vmem:[%s8588_s26 + $0x58] sm:$0xff] %v4415_v31  ;;  %4448 = vst [vmem:[%s8588_s26 + $0x60] sm:$0xff] %v4416_v38  ;;  %v4430_v18 = vadd.f32 %v5958_v44, %v8618_v50  ;;  %v4431_v19 = vadd.f32 %v5959_v30, %v8621_v13  ;;  %v4432_v41 = vadd.f32 %v5960_v9, %v8624_v27  ;;  %p5964_p11 = scmp.ne.s32.totalorder %s8697_s28, %s5963_s8  ;;  %p5971_p1 = scmp.lt.s32.totalorder %s5969_s7, %s5963_s8 }
 0x567   : > { %4449 = vst [vmem:[%s8588_s26 + $0x68] sm:$0xff] %v4417_v60  ;;  %4450 = vst [vmem:[%s8588_s26 + $0x70] sm:$0xff] %v4418_v56  ;;  %v4434_v50 = vadd.f32 %v5961_v17, %v8627_v51  ;;  %v4435_v46 = vadd.f32 %v5962_v20, %v8630_v36 }
 0x568   : > { %4451 = vst [vmem:[%s8588_s26 + $0x78] sm:$0xff] %v4419_v33  ;;  %4452 = vst [vmem:[%s8588_s26 + $0x80] sm:$0xff] %v4420_v21  ;;  %p5965_p12 = pnand %p5964_p11, %p6088_p5  ;;  %p5972_p2 = por %p5971_p1, %p5970_p0 }
 0x569   : > { %4453 = vst [vmem:[%s8588_s26 + $0x88] sm:$0xff] %v4421_v53  ;;  %4454 = vst [vmem:[%s8588_s26 + $0x90] sm:$0xff] %v4422_v12 }
 0x56a   : > { %4455 = vst [vmem:[%s8588_s26 + $0x98] sm:$0xff] %v4423_v10  ;;  %4456 = vst [vmem:[%s8588_s26 + $0xa0] sm:$0xff] %v4424_v26  ;;  %p5966_p13 = pneg %p5965_p12 }
 0x56b   : > { %4457 = vst [vmem:[%s8588_s26 + $0xa8] sm:$0xff] %v4425_v55  ;;  %4458 = vst [vmem:[%s8588_s26 + $0xb0] sm:$0xff] %v4426_v29 }
 0x56c   : > { %4459 = vst [vmem:[%s8588_s26 + $0xb8] sm:$0xff] %v4427_v34  ;;  %4460 = vst [vmem:[%s8588_s26 + $0xc0] sm:$0xff] %v4428_v32  ;;  %p5973_p3 = pnand %p5972_p2, %p5966_p13 }
 0x56d   : > { %4461 = vst [vmem:[%s8588_s26 + $0xc8] sm:$0xff] %v4429_v6  ;;  %4462 = vst [vmem:[%s8588_s26 + $0xd0] sm:$0xff] %v4430_v18 }
 0x56e   : > { %4463 = vst [vmem:[%s8588_s26 + $0xd8] sm:$0xff] %v4431_v19  ;;  %4464 = vst [vmem:[%s8588_s26 + $0xe0] sm:$0xff] %v4432_v41 }
 0x56f   : > { %4466 = vst [vmem:[%s8588_s26 + $0xf0] sm:$0xff] %v4434_v50  ;;  %4467 = vst [vmem:[%s8588_s26 + $0xf8] sm:$0xff] %v4435_v46 }
 0x570   : > { %5976 = shalt.err (!%p5973_p3)
}
 0x571   : > { %s5977_s9 = scalar_lea.hbm %s8693_s4, 4096  ;;  %s5981_s17 = scalar_lea.hbm %s8765_s3, 8192 }
 0x572   : > { %p5978_p4 = scmp.ne.s32.totalorder %s8693_s4, %s5977_s9  ;;  %p5982_p9 = scmp.lt.u32.totalorder %s8693_s4, %s8765_s3 }
 0x573   : > { %p5983_p10 = scmp.lt.u32.totalorder %s5981_s17, %s5977_s9  ;;  %p5985_p12 = scmp.lt.u32.totalorder %s5977_s9, %s8693_s4 }
 0x574   : > { %p5979_p7 = pnand %p5978_p4, %p6088_p5 }
 0x575   : > { %p5984_p11 = por %p5983_p10, %p5982_p9 }
 0x576   : > { %p5980_p8 = pneg %p5979_p7 }
 0x577   : > { %p5986_p13 = por %p5985_p12, %p5984_p11 }
 0x579   : > { %p5987_p0 = pnand %p5986_p13, %p5980_p8 }
 0x57b   : > { %5990 = shalt.err (!%p5987_p0)
}
 0x57c   : > { %s6028_s24 = smov 128   ;;  %s6029_s25 = smov 8  }
 0x57d   : > { %5742 = dma.vmem_to_hbm [thread:$0]  (%p6088_p5), %s8697_s28, 4096, %s8693_s4, %s8721_s16, %s6028_s24, %s6028_s24, %s6029_s25  }
 0x57e PF: > { %p5748_p1 = scmp.ge.s32.totalorder %s6025_s15, 2  ;;  %s4497_s26 = sand.u32 1, %s6013_s12  }
 0x57f   : > { %s4498_s27 = scalar_lea.sflag [#allocation3], %s4497_s26 }
 0x580   : > { %p5745_p2 = pnand %p5748_p1, %p6092_p6 }
 0x582   : > { %6008 = dma.done.wait (!%p5745_p2), %s4498_s27, 4096  }
 0x583   : > { %6010 = vsyncadd (!%p5745_p2), %s4498_s27, 4294963200  ;;  %p13_p3 = scmp.ge.s32.totalorder %s6075_s18, 4   ;;  %s8831_s12 = smov %s6017_s13 }
 0x584   : > { %s8832_s13 = smov %s6021_s14  ;;  %s8833_s14 = smov %s6086_s21 }
 0x585   : > { %s8834_s15 = smov %s6075_s18  ;;  %15 = sbr.rel (!%p13_p3) target bundleno = 3 (0x3), region = 67 }
 0x58c   :  { %4503 = vsyncpa [#allocation3], 1 }
 0x58d   :  { %4505 = vsyncpa [#allocation3 + $0x1], 1 }

</bundles_post_ra>
